<compile_context>
chip_gen: v5e
topology: v5e:2x2
jax: 0.10.0
libtpu: 0.0.40
codegen_flags: <defaults>
</compile_context>

<pallas_src>
import functools

import jax
import jax.numpy as jnp
from jax import lax
from jax.experimental import pallas as pl
from jax.experimental.pallas import tpu as pltpu


def _round_up(x, m):
    return ((x + m - 1) // m) * m


# ----------------------------------------------------------------------------
# Fused bidirectional LSTM layer kernel (both directions, full sequence)
# ----------------------------------------------------------------------------
def bilstm_kernel(
    x_ref,                          # [S, B, Ein_pad] f32 (time-major, lane-dense)
    wih_f_ref, whh_f_ref, b_f_ref,  # [Ein_pad,4H] bf16, [4H,4H] bf16, [1,4H] f32
    wih_b_ref, whh_b_ref, b_b_ref,  # same, backward direction
    out_ref,                        # [S, B, 4H] f32  (fwd h | bwd h | zero pad)
    gin_f_ref, gin_b_ref,           # [S, B, 4H] f32 scratch (hoisted input proj)
    hist_b_ref,                     # [S, B, 4H] f32 scratch (bwd hidden history)
):
    S, B, Ein = x_ref.shape
    G = out_ref.shape[-1]           # 4H (multiple of 128)
    H = G // 4

    # ---- hoisted input projection: one 128-lane-wide big-M matmul per dir ----
    x2d = x_ref[...].reshape(S * B, Ein).astype(jnp.bfloat16)
    gin_f_ref[...] = (
        jnp.dot(x2d, wih_f_ref[...], preferred_element_type=jnp.float32)
        + b_f_ref[...]
    ).reshape(S, B, G)
    gin_b_ref[...] = (
        jnp.dot(x2d, wih_b_ref[...], preferred_element_type=jnp.float32)
        + b_b_ref[...]
    ).reshape(S, B, G)

    # lane masks hoisted out of the loop (JAX does not CSE broadcast_in_dim)
    lane = lax.broadcasted_iota(jnp.int32, (B, G), 1)
    is_g_gate = jnp.logical_and(lane >= 2 * H, lane < 3 * H)

    whh_f = whh_f_ref[...]
    whh_b = whh_b_ref[...]

    # Lane layout of the fused gate vector: [ i | f | g | o ], each H lanes.
    # h/c state is carried as [B, 4H] with the real value in lanes 0:H; the
    # garbage lanes never leak (W_hh rows H:4H are zero, final combine masks).
    def cell(gin_t, h4, c4, whh):
        gates = gin_t + jnp.dot(
            h4.astype(jnp.bfloat16), whh, preferred_element_type=jnp.float32
        )
        act = jnp.where(is_g_gate, jnp.tanh(gates), jax.nn.sigmoid(gates))
        ig = act * pltpu.roll(act, 2 * H, axis=1)   # lanes 0:H -> i * g
        f0 = pltpu.roll(act, 3 * H, axis=1)         # lanes 0:H -> f
        c_new = f0 * c4 + ig                        # lanes 0:H valid
        o0 = pltpu.roll(act, H, axis=1)             # lanes 0:H -> o
        h_new = o0 * jnp.tanh(c_new)                # lanes 0:H valid
        return h_new, c_new

    def step(t, carry):
        hf4, cf4, hb4, cb4 = carry
        tb = S - 1 - t                              # backward time index
        hf_new, cf_new = cell(gin_f_ref[t], hf4, cf4, whh_f)
        hb_new, cb_new = cell(gin_b_ref[tb], hb4, cb4, whh_b)
        out_ref[t] = hf_new                         # fwd history (128-lane vst)
        hist_b_ref[tb] = hb_new                     # bwd history (128-lane vst)
        return hf_new, cf_new, hb_new, cb_new

    zeros = jnp.zeros((B, G), jnp.float32)
    unroll = S if S <= 16 else 4                    # avoid vreg/I-mem blow-up
    lax.fori_loop(0, S, step, (zeros, zeros, zeros, zeros), unroll=unroll)

    # ---- fwd/bwd combine, once, off the serial loop (lane-dense store) ----
    lane2 = lax.broadcasted_iota(jnp.int32, (S * B, G), 1)
    hf_all = out_ref[...].reshape(S * B, G)
    hb_all = pltpu.roll(hist_b_ref[...].reshape(S * B, G), H, axis=1)
    out_ref[...] = jnp.where(
        lane2 < H, hf_all, jnp.where(lane2 < 2 * H, hb_all, 0.0)
    ).reshape(S, B, G)


def _bilstm_vmem_limit(S, B, Ein, G):
    f32 = 4
    act = S * B * G * f32
    xin = S * B * Ein * f32
    wts = 2 * (Ein * G * 2 + G * G * 2 + G * f32)
    need = 2 * (xin + act) + 3 * act + 2 * wts      # pipeline bufs + scratch
    return int(min(64 * 2 ** 20, max(16 * 2 ** 20, 2 * need)))


def run_bilstm_layer(x, lp, hidden):
    """x: [S, B, Ein_pad] time-major (B multiple of 8, Ein_pad multiple of 128).
    Returns [S, B, 4H] with fwd h in lanes 0:H, bwd h in lanes H:2H, rest 0."""
    S, B, Ein = x.shape
    G = 4 * hidden
    return pl.pallas_call(
        bilstm_kernel,
        out_shape=jax.ShapeDtypeStruct((S, B, G), jnp.float32),
        grid=(1,),
        in_specs=[
            pl.BlockSpec((S, B, Ein), lambda i: (0, 0, 0)),
            pl.BlockSpec((Ein, G), lambda i: (0, 0)),
            pl.BlockSpec((G, G), lambda i: (0, 0)),
            pl.BlockSpec((1, G), lambda i: (0, 0)),
            pl.BlockSpec((Ein, G), lambda i: (0, 0)),
            pl.BlockSpec((G, G), lambda i: (0, 0)),
            pl.BlockSpec((1, G), lambda i: (0, 0)),
        ],
        out_specs=pl.BlockSpec((S, B, G), lambda i: (0, 0, 0)),
        scratch_shapes=[
            pltpu.VMEM((S, B, G), jnp.float32),     # gin forward
            pltpu.VMEM((S, B, G), jnp.float32),     # gin backward
            pltpu.VMEM((S, B, G), jnp.float32),     # bwd hidden history
        ],
        compiler_params=pltpu.CompilerParams(
            dimension_semantics=("arbitrary",),
            vmem_limit_bytes=_bilstm_vmem_limit(S, B, Ein, G),
        ),
    )(x, lp["wih_f"], lp["whh_f"], lp["b_f"], lp["wih_b"], lp["whh_b"], lp["b_b"])


# ----------------------------------------------------------------------------
# Head kernel: linear_1 -> ReLU -> linear_2 -> log_softmax   (tiled over N)
# ----------------------------------------------------------------------------
def head_kernel(x_ref, w1_ref, b1_ref, w2_ref, b2_ref, out_ref):
    # x_ref:  [TN, 4H] f32 (lanes 2H:4H are zero)  w1_ref: [4H, Hp] bf16
    # b1_ref: [1, Hp] f32                          w2_ref: [Hp, Cp] bf16
    # b2_ref: [1, Cp] f32 (-1e30 on padded classes) out_ref:[TN, Cp] f32
    h = jnp.dot(x_ref[...].astype(jnp.bfloat16), w1_ref[...],
                preferred_element_type=jnp.float32) + b1_ref[...]
    h = jnp.maximum(h, 0.0)
    logits = jnp.dot(h.astype(jnp.bfloat16), w2_ref[...],
                     preferred_element_type=jnp.float32) + b2_ref[...]
    m = jnp.max(logits, axis=-1, keepdims=True)
    z = logits - m
    lse = jnp.log(jnp.sum(jnp.exp(z), axis=-1, keepdims=True))
    out_ref[...] = z - lse


def run_head(x_flat, w1, b1, w2, b2, *, tile_n):
    N, in_f = x_flat.shape
    Hp = w1.shape[1]
    Cp = w2.shape[1]
    return pl.pallas_call(
        head_kernel,
        out_shape=jax.ShapeDtypeStruct((N, Cp), jnp.float32),
        grid=(N // tile_n,),
        in_specs=[
            pl.BlockSpec((tile_n, in_f), lambda i: (i, 0)),
            pl.BlockSpec((in_f, Hp), lambda i: (0, 0)),
            pl.BlockSpec((1, Hp), lambda i: (0, 0)),
            pl.BlockSpec((Hp, Cp), lambda i: (0, 0)),
            pl.BlockSpec((1, Cp), lambda i: (0, 0)),
        ],
        out_specs=pl.BlockSpec((tile_n, Cp), lambda i: (i, 0)),
        compiler_params=pltpu.CompilerParams(dimension_semantics=("parallel",)),
    )(x_flat, w1, b1, w2, b2)


# ----------------------------------------------------------------------------
# Parameter construction (deterministic, synthetic, PyTorch-equivalent layout)
# ----------------------------------------------------------------------------
def init_params(key, vocab_size, emb_size, num_classes, hidden, num_layers):
    H = hidden
    G = 4 * H
    assert G % 128 == 0, "fused-gate lane layout assumes 4*hidden % 128 == 0"
    ein0 = _round_up(max(emb_size, 128), 128)
    Hp = _round_up(max(H, 128), 128)
    Cp = _round_up(max(num_classes, 128), 128)

    def uni(k, shape, scale):
        return jax.random.uniform(k, shape, jnp.float32, -scale, scale)

    keys = jax.random.split(key, 1 + num_layers * 2 * 4 + 2)
    ki = iter(keys)

    emb = jax.random.normal(next(ki), (vocab_size, emb_size), jnp.float32) * 0.1
    emb = emb.at[0].set(0.0)                        # padding_idx=0 row is zeros
    emb_pad = jnp.zeros((vocab_size, ein0), jnp.float32).at[:, :emb_size].set(emb)
    params = {"emb": emb_pad}

    scale = 1.0 / float(H) ** 0.5
    lstm = []
    for layer in range(num_layers):
        in_size = emb_size if layer == 0 else 2 * H
        in_pad = ein0 if layer == 0 else G          # layer>0 input is [*, 4H] padded
        lp = {}
        for tag in ("f", "b"):                      # forward / backward direction
            w_ih = uni(next(ki), (4 * H, in_size), scale)   # PyTorch [4H, in], i,f,g,o
            w_hh = uni(next(ki), (4 * H, H), scale)          # PyTorch [4H, H]
            b_ih = uni(next(ki), (4 * H,), scale)
            b_hh = uni(next(ki), (4 * H,), scale)
            wih_t = jnp.transpose(w_ih)                      # [in, 4H]
            whh_t = jnp.transpose(w_hh)                      # [H, 4H]
            wih_pad = jnp.zeros((in_pad, G), jnp.float32).at[:in_size].set(wih_t)
            whh_pad = jnp.zeros((G, G), jnp.float32).at[:H].set(whh_t)  # rows H:4H = 0
            lp[f"wih_{tag}"] = wih_pad.astype(jnp.bfloat16)
            lp[f"whh_{tag}"] = whh_pad.astype(jnp.bfloat16)
            lp[f"b_{tag}"] = (b_ih + b_hh).reshape(1, G)     # f32
        lstm.append(lp)
    params["lstm"] = lstm

    k1, k2 = next(ki), next(ki)
    s1 = 1.0 / (2.0 * H) ** 0.5
    s2 = 1.0 / float(H) ** 0.5
    w1 = uni(k1, (H, 2 * H), s1)                    # PyTorch [out, in]
    w2 = uni(k2, (num_classes, H), s2)

    # Head weights padded so the whole head stays 128-lane dense; padded class
    # logits are forced to -1e30 (zero weight cols + -1e30 bias) so log_softmax
    # of the real classes is unaffected (f32 logits, safe).
    w1_t_pad = jnp.zeros((G, Hp), jnp.float32).at[:2 * H, :H].set(jnp.transpose(w1))
    w2_t_pad = jnp.zeros((Hp, Cp), jnp.float32).at[:H, :num_classes].set(jnp.transpose(w2))
    b2_pad = jnp.full((1, Cp), -1e30, jnp.float32).at[:, :num_classes].set(0.0)
    params["w1_t_pad"] = w1_t_pad.astype(jnp.bfloat16)
    params["b1_pad"] = jnp.zeros((1, Hp), jnp.float32)
    params["w2_t_pad"] = w2_t_pad.astype(jnp.bfloat16)
    params["b2_pad"] = b2_pad
    return params


# ----------------------------------------------------------------------------
# Full forward pass
# ----------------------------------------------------------------------------
@functools.partial(jax.jit, static_argnames=("hidden", "num_layers", "num_classes"))
def word_lstm_forward(params, X, *, hidden, num_layers, num_classes):
    # X: [B, S] int32 token indices
    B, S = X.shape
    H = hidden
    G = 4 * H

    # Embedding gather directly into time-major, lane-padded layout.
    x = jnp.take(params["emb"], jnp.transpose(X), axis=0)       # [S, B, Ein_pad]

    # Pad batch to a sublane multiple of 8 (padded rows sliced off at the end).
    Bp = max(8, _round_up(B, 8))
    if Bp != B:
        x = jnp.pad(x, ((0, 0), (0, Bp - B), (0, 0)))

    for layer in range(num_layers):
        x = run_bilstm_layer(x, params["lstm"][layer], H)       # [S, Bp, 4H]

    # Head consumes the lane-padded time-major activations directly.
    x_flat = x.reshape(S * Bp, G)
    N = x_flat.shape[0]
    tile_n = 512 if N >= 512 else N                             # N is a multiple of 8
    Np = _round_up(N, tile_n)
    if Np != N:
        x_flat = jnp.pad(x_flat, ((0, Np - N), (0, 0)))

    logp_pad = run_head(x_flat, params["w1_t_pad"], params["b1_pad"],
                        params["w2_t_pad"], params["b2_pad"], tile_n=tile_n)
    logp = logp_pad[:N, :num_classes].reshape(S, Bp, num_classes)
    logp = jnp.transpose(logp, (1, 0, 2))[:B]                   # [B, S, C]
    return logp


if __name__ == "__main__":
    VOCAB = 50
    EMB = 32
    HIDDEN = 32
    NUM_CLASSES = 8
    NUM_LAYERS = 2
    B, S = 2, 8

    key = jax.random.PRNGKey(0)
    k_params, k_data = jax.random.split(key)
    params = init_params(k_params, VOCAB, EMB, NUM_CLASSES, HIDDEN, NUM_LAYERS)

    X = jax.random.randint(k_data, (B, S), 0, VOCAB, dtype=jnp.int32)
    X = X.at[:, -1].set(0)  # include a padding token

    out = word_lstm_forward(params, X, hidden=HIDDEN, num_layers=NUM_LAYERS,
                            num_classes=NUM_CLASSES)
    out = jax.block_until_ready(out)

    assert out.shape == (B, S, NUM_CLASSES)
    # log_softmax rows must sum to ~1 in probability space
    assert jnp.allclose(jnp.sum(jnp.exp(out), axis=-1), 1.0, atol=1e-3)
    print("KERNEL_OK")
</pallas_src>

<mosaic_0001>
module attributes {stable_mosaic.version = 11 : i64} {
  func.func @head_kernel(%arg0: i32, %arg1: memref<64x128xf32, #tpu.memory_space<vmem>>, %arg2: memref<128x128xbf16, #tpu.memory_space<vmem>>, %arg3: memref<1x128xf32, #tpu.memory_space<vmem>>, %arg4: memref<128x128xbf16, #tpu.memory_space<vmem>>, %arg5: memref<1x128xf32, #tpu.memory_space<vmem>>, %arg6: memref<64x128xf32, #tpu.memory_space<vmem>>) attributes {dimension_semantics = [#tpu.dimension_semantics<parallel>], iteration_bounds = array<i64: 1>, scalar_prefetch = 0 : i64, scratch_operands = 0 : i64, tpu.core_type = #tpu.core_type<tc>, window_params = [{transform_indices = @transform_0, window_bounds = array<i64: 64, 128>}, {pipeline_mode = #tpu.pipeline_mode<synchronous>, transform_indices = @transform_1, window_bounds = array<i64: 128, 128>}, {pipeline_mode = #tpu.pipeline_mode<synchronous>, transform_indices = @transform_2, window_bounds = array<i64: 1, 128>}, {pipeline_mode = #tpu.pipeline_mode<synchronous>, transform_indices = @transform_3, window_bounds = array<i64: 128, 128>}, {pipeline_mode = #tpu.pipeline_mode<synchronous>, transform_indices = @transform_4, window_bounds = array<i64: 1, 128>}, {transform_indices = @transform_5, window_bounds = array<i64: 64, 128>}]} {
    %c0 = arith.constant 0 : index
    %c0_0 = arith.constant 0 : index
    %0 = vector.load %arg1[%c0, %c0_0] : memref<64x128xf32, #tpu.memory_space<vmem>>, vector<64x128xf32>
    %1 = arith.truncf %0 : vector<64x128xf32> to vector<64x128xbf16>
    %c0_1 = arith.constant 0 : index
    %c0_2 = arith.constant 0 : index
    %2 = vector.load %arg2[%c0_1, %c0_2] : memref<128x128xbf16, #tpu.memory_space<vmem>>, vector<128x128xbf16>
    %cst = arith.constant dense<0.000000e+00> : vector<64x128xf32>
    %3 = tpu.matmul %1, %2, %cst {dimension_numbers = #tpu.dot_dimension_numbers<[1], [0], [0], [1], [0, 0, 1, 1], [], []>} : vector<64x128xbf16>, vector<128x128xbf16>, vector<64x128xf32> -> vector<64x128xf32>
    %c0_3 = arith.constant 0 : index
    %c0_4 = arith.constant 0 : index
    %4 = vector.load %arg3[%c0_3, %c0_4] : memref<1x128xf32, #tpu.memory_space<vmem>>, vector<1x128xf32>
    %5 = vector.broadcast %4 : vector<1x128xf32> to vector<64x128xf32>
    %6 = arith.addf %3, %5 : vector<64x128xf32>
    %cst_5 = arith.constant 0.000000e+00 : f32
    %7 = vector.broadcast %cst_5 : f32 to vector<64x128xf32>
    %8 = arith.maximumf %6, %7 : vector<64x128xf32>
    %9 = arith.truncf %8 : vector<64x128xf32> to vector<64x128xbf16>
    %c0_6 = arith.constant 0 : index
    %c0_7 = arith.constant 0 : index
    %10 = vector.load %arg4[%c0_6, %c0_7] : memref<128x128xbf16, #tpu.memory_space<vmem>>, vector<128x128xbf16>
    %cst_8 = arith.constant dense<0.000000e+00> : vector<64x128xf32>
    %11 = tpu.matmul %9, %10, %cst_8 {dimension_numbers = #tpu.dot_dimension_numbers<[1], [0], [0], [1], [0, 0, 1, 1], [], []>} : vector<64x128xbf16>, vector<128x128xbf16>, vector<64x128xf32> -> vector<64x128xf32>
    %c0_9 = arith.constant 0 : index
    %c0_10 = arith.constant 0 : index
    %12 = vector.load %arg5[%c0_9, %c0_10] : memref<1x128xf32, #tpu.memory_space<vmem>>, vector<1x128xf32>
    %13 = vector.broadcast %12 : vector<1x128xf32> to vector<64x128xf32>
    %14 = arith.addf %11, %13 : vector<64x128xf32>
    %cst_11 = arith.constant dense<0xFF800000> : vector<64xf32>
    %15 = vector.multi_reduction <maximumf>, %14, %cst_11 [1] : vector<64x128xf32> to vector<64xf32>
    %16 = vector.shape_cast %15 : vector<64xf32> to vector<64x1xf32>
    %17 = vector.broadcast %16 : vector<64x1xf32> to vector<64x128xf32>
    %18 = arith.subf %14, %17 : vector<64x128xf32>
    %19 = math.exp %18 : vector<64x128xf32>
    %cst_12 = arith.constant dense<0.000000e+00> : vector<64xf32>
    %20 = vector.multi_reduction <add>, %19, %cst_12 [1] : vector<64x128xf32> to vector<64xf32>
    %21 = vector.shape_cast %20 : vector<64xf32> to vector<64x1xf32>
    %22 = math.log %21 : vector<64x1xf32>
    %23 = vector.broadcast %22 : vector<64x1xf32> to vector<64x128xf32>
    %24 = arith.subf %18, %23 : vector<64x128xf32>
    %c0_13 = arith.constant 0 : index
    %c0_14 = arith.constant 0 : index
    %25 = vector.load %arg6[%c0_13, %c0_14] : memref<64x128xf32, #tpu.memory_space<vmem>>, vector<64x128xf32>
    tpu.vector_store %arg6[%c0_13, %c0_14], %24 {strides = array<i32>} : memref<64x128xf32, #tpu.memory_space<vmem>>, vector<64x128xf32>,
    return
  }
  func.func @transform_0(%arg0: i32) -> (i32, i32) {
    %c0_i32 = arith.constant 0 : i32
    %c0_i32_0 = arith.constant 0 : i32
    return %arg0, %c0_i32 : i32, i32
  }
  func.func @transform_1(%arg0: i32) -> (i32, i32) {
    %c0_i32 = arith.constant 0 : i32
    %c0_i32_0 = arith.constant 0 : i32
    %c0_i32_1 = arith.constant 0 : i32
    return %c0_i32, %c0_i32_0 : i32, i32
  }
  func.func @transform_2(%arg0: i32) -> (i32, i32) {
    %c0_i32 = arith.constant 0 : i32
    %c0_i32_0 = arith.constant 0 : i32
    %c0_i32_1 = arith.constant 0 : i32
    return %c0_i32, %c0_i32_0 : i32, i32
  }
  func.func @transform_3(%arg0: i32) -> (i32, i32) {
    %c0_i32 = arith.constant 0 : i32
    %c0_i32_0 = arith.constant 0 : i32
    %c0_i32_1 = arith.constant 0 : i32
    return %c0_i32, %c0_i32_0 : i32, i32
  }
  func.func @transform_4(%arg0: i32) -> (i32, i32) {
    %c0_i32 = arith.constant 0 : i32
    %c0_i32_0 = arith.constant 0 : i32
    %c0_i32_1 = arith.constant 0 : i32
    return %c0_i32, %c0_i32_0 : i32, i32
  }
  func.func @transform_5(%arg0: i32) -> (i32, i32) {
    %c0_i32 = arith.constant 0 : i32
    %c0_i32_0 = arith.constant 0 : i32
    return %arg0, %c0_i32 : i32, i32
  }
}

module attributes {stable_mosaic.version = 11 : i64} {
  func.func @bilstm_kernel(%arg0: i32, %arg1: memref<8x8x128xf32, #tpu.memory_space<vmem>>, %arg2: memref<128x128xbf16, #tpu.memory_space<vmem>>, %arg3: memref<128x128xbf16, #tpu.memory_space<vmem>>, %arg4: memref<1x128xf32, #tpu.memory_space<vmem>>, %arg5: memref<128x128xbf16, #tpu.memory_space<vmem>>, %arg6: memref<128x128xbf16, #tpu.memory_space<vmem>>, %arg7: memref<1x128xf32, #tpu.memory_space<vmem>>, %arg8: memref<8x8x128xf32, #tpu.memory_space<vmem>>, %arg9: memref<8x8x128xf32, #tpu.memory_space<vmem>>, %arg10: memref<8x8x128xf32, #tpu.memory_space<vmem>>, %arg11: memref<8x8x128xf32, #tpu.memory_space<vmem>>) attributes {dimension_semantics = [#tpu.dimension_semantics<arbitrary>], iteration_bounds = array<i64: 1>, scalar_prefetch = 0 : i64, scratch_operands = 3 : i64, tpu.core_type = #tpu.core_type<tc>, window_params = [{pipeline_mode = #tpu.pipeline_mode<synchronous>, transform_indices = @transform_0, window_bounds = array<i64: 8, 8, 128>}, {pipeline_mode = #tpu.pipeline_mode<synchronous>, transform_indices = @transform_1, window_bounds = array<i64: 128, 128>}, {pipeline_mode = #tpu.pipeline_mode<synchronous>, transform_indices = @transform_2, window_bounds = array<i64: 128, 128>}, {pipeline_mode = #tpu.pipeline_mode<synchronous>, transform_indices = @transform_3, window_bounds = array<i64: 1, 128>}, {pipeline_mode = #tpu.pipeline_mode<synchronous>, transform_indices = @transform_4, window_bounds = array<i64: 128, 128>}, {pipeline_mode = #tpu.pipeline_mode<synchronous>, transform_indices = @transform_5, window_bounds = array<i64: 128, 128>}, {pipeline_mode = #tpu.pipeline_mode<synchronous>, transform_indices = @transform_6, window_bounds = array<i64: 1, 128>}, {pipeline_mode = #tpu.pipeline_mode<synchronous>, transform_indices = @transform_7, window_bounds = array<i64: 8, 8, 128>}]} {
    %c0 = arith.constant 0 : index
    %c0_0 = arith.constant 0 : index
    %c0_1 = arith.constant 0 : index
    %0 = vector.load %arg1[%c0, %c0_0, %c0_1] : memref<8x8x128xf32, #tpu.memory_space<vmem>>, vector<8x8x128xf32>
    %1 = vector.shape_cast %0 : vector<8x8x128xf32> to vector<64x128xf32>
    %2 = arith.truncf %1 : vector<64x128xf32> to vector<64x128xbf16>
    %c0_2 = arith.constant 0 : index
    %c0_3 = arith.constant 0 : index
    %3 = vector.load %arg2[%c0_2, %c0_3] : memref<128x128xbf16, #tpu.memory_space<vmem>>, vector<128x128xbf16>
    %cst = arith.constant dense<0.000000e+00> : vector<64x128xf32>
    %4 = tpu.matmul %2, %3, %cst {dimension_numbers = #tpu.dot_dimension_numbers<[1], [0], [0], [1], [0, 0, 1, 1], [], []>} : vector<64x128xbf16>, vector<128x128xbf16>, vector<64x128xf32> -> vector<64x128xf32>
    %c0_4 = arith.constant 0 : index
    %c0_5 = arith.constant 0 : index
    %5 = vector.load %arg4[%c0_4, %c0_5] : memref<1x128xf32, #tpu.memory_space<vmem>>, vector<1x128xf32>
    %6 = vector.broadcast %5 : vector<1x128xf32> to vector<64x128xf32>
    %7 = arith.addf %4, %6 : vector<64x128xf32>
    %8 = vector.shape_cast %7 : vector<64x128xf32> to vector<8x8x128xf32>
    %c0_6 = arith.constant 0 : index
    %c0_7 = arith.constant 0 : index
    %c0_8 = arith.constant 0 : index
    %9 = vector.load %arg9[%c0_6, %c0_7, %c0_8] : memref<8x8x128xf32, #tpu.memory_space<vmem>>, vector<8x8x128xf32>
    tpu.vector_store %arg9[%c0_6, %c0_7, %c0_8], %8 {strides = array<i32>} : memref<8x8x128xf32, #tpu.memory_space<vmem>>, vector<8x8x128xf32>,
    %c0_9 = arith.constant 0 : index
    %c0_10 = arith.constant 0 : index
    %10 = vector.load %arg5[%c0_9, %c0_10] : memref<128x128xbf16, #tpu.memory_space<vmem>>, vector<128x128xbf16>
    %cst_11 = arith.constant dense<0.000000e+00> : vector<64x128xf32>
    %11 = tpu.matmul %2, %10, %cst_11 {dimension_numbers = #tpu.dot_dimension_numbers<[1], [0], [0], [1], [0, 0, 1, 1], [], []>} : vector<64x128xbf16>, vector<128x128xbf16>, vector<64x128xf32> -> vector<64x128xf32>
    %c0_12 = arith.constant 0 : index
    %c0_13 = arith.constant 0 : index
    %12 = vector.load %arg7[%c0_12, %c0_13] : memref<1x128xf32, #tpu.memory_space<vmem>>, vector<1x128xf32>
    %13 = vector.broadcast %12 : vector<1x128xf32> to vector<64x128xf32>
    %14 = arith.addf %11, %13 : vector<64x128xf32>
    %15 = vector.shape_cast %14 : vector<64x128xf32> to vector<8x8x128xf32>
    %c0_14 = arith.constant 0 : index
    %c0_15 = arith.constant 0 : index
    %c0_16 = arith.constant 0 : index
    %16 = vector.load %arg10[%c0_14, %c0_15, %c0_16] : memref<8x8x128xf32, #tpu.memory_space<vmem>>, vector<8x8x128xf32>
    tpu.vector_store %arg10[%c0_14, %c0_15, %c0_16], %15 {strides = array<i32>} : memref<8x8x128xf32, #tpu.memory_space<vmem>>, vector<8x8x128xf32>,
    %17 = tpu.iota {dimensions = array<i32: 1>} : vector<8x128xi32>
    %c64_i32 = arith.constant 64 : i32
    %18 = vector.broadcast %c64_i32 : i32 to vector<8x128xi32>
    %19 = arith.cmpi sge, %17, %18 : vector<8x128xi32>
    %c96_i32 = arith.constant 96 : i32
    %20 = vector.broadcast %c96_i32 : i32 to vector<8x128xi32>
    %21 = arith.cmpi slt, %17, %20 : vector<8x128xi32>
    %22 = arith.andi %19, %21 : vector<8x128xi1>
    %c0_17 = arith.constant 0 : index
    %c0_18 = arith.constant 0 : index
    %23 = vector.load %arg3[%c0_17, %c0_18] : memref<128x128xbf16, #tpu.memory_space<vmem>>, vector<128x128xbf16>
    %c0_19 = arith.constant 0 : index
    %c0_20 = arith.constant 0 : index
    %24 = vector.load %arg6[%c0_19, %c0_20] : memref<128x128xbf16, #tpu.memory_space<vmem>>, vector<128x128xbf16>
    %cst_21 = arith.constant 0.000000e+00 : f32
    %25 = vector.broadcast %cst_21 : f32 to vector<8x128xf32>
    %c0_i32 = arith.constant 0 : i32
    %c7_i32 = arith.constant 7 : i32
    %26 = arith.subi %c7_i32, %c0_i32 : i32
    %27 = arith.index_cast %c0_i32 : i32 to index
    %c0_22 = arith.constant 0 : index
    %c0_23 = arith.constant 0 : index
    %28 = vector.load %arg9[%27, %c0_22, %c0_23] : memref<8x8x128xf32, #tpu.memory_space<vmem>>, vector<1x8x128xf32>
    %29 = vector.shape_cast %28 : vector<1x8x128xf32> to vector<8x128xf32>
    %30 = arith.truncf %25 : vector<8x128xf32> to vector<8x128xbf16>
    %cst_24 = arith.constant dense<0.000000e+00> : vector<8x128xf32>
    %31 = tpu.matmul %30, %23, %cst_24 {dimension_numbers = #tpu.dot_dimension_numbers<[1], [0], [0], [1], [0, 0, 1, 1], [], []>} : vector<8x128xbf16>, vector<128x128xbf16>, vector<8x128xf32> -> vector<8x128xf32>
    %32 = arith.addf %29, %31 : vector<8x128xf32>
    %33 = math.tanh %32 : vector<8x128xf32>
    %34 = arith.negf %32 : vector<8x128xf32>
    %35 = math.exp %34 : vector<8x128xf32>
    %cst_25 = arith.constant 1.000000e+00 : f32
    %36 = vector.broadcast %cst_25 : f32 to vector<8x128xf32>
    %37 = arith.addf %36, %35 : vector<8x128xf32>
    %38 = arith.divf %36, %37 : vector<8x128xf32>
    %39 = arith.select %22, %33, %38 : vector<8x128xi1>, vector<8x128xf32>
    %c64_i32_26 = arith.constant 64 : i32
    %40 = tpu.dynamic_rotate %39 by %c64_i32_26 dim 1 : vector<8x128xf32>, i32 -> vector<8x128xf32>
    %41 = arith.mulf %39, %40 : vector<8x128xf32>
    %c96_i32_27 = arith.constant 96 : i32
    %42 = tpu.dynamic_rotate %39 by %c96_i32_27 dim 1 : vector<8x128xf32>, i32 -> vector<8x128xf32>
    %43 = arith.mulf %42, %25 : vector<8x128xf32>
    %44 = arith.addf %43, %41 : vector<8x128xf32>
    %c32_i32 = arith.constant 32 : i32
    %45 = tpu.dynamic_rotate %39 by %c32_i32 dim 1 : vector<8x128xf32>, i32 -> vector<8x128xf32>
    %46 = math.tanh %44 : vector<8x128xf32>
    %47 = arith.mulf %45, %46 : vector<8x128xf32>
    %48 = arith.index_cast %26 : i32 to index
    %c0_28 = arith.constant 0 : index
    %c0_29 = arith.constant 0 : index
    %49 = vector.load %arg10[%48, %c0_28, %c0_29] : memref<8x8x128xf32, #tpu.memory_space<vmem>>, vector<1x8x128xf32>
    %50 = vector.shape_cast %49 : vector<1x8x128xf32> to vector<8x128xf32>
    %51 = arith.truncf %25 : vector<8x128xf32> to vector<8x128xbf16>
    %cst_30 = arith.constant dense<0.000000e+00> : vector<8x128xf32>
    %52 = tpu.matmul %51, %24, %cst_30 {dimension_numbers = #tpu.dot_dimension_numbers<[1], [0], [0], [1], [0, 0, 1, 1], [], []>} : vector<8x128xbf16>, vector<128x128xbf16>, vector<8x128xf32> -> vector<8x128xf32>
    %53 = arith.addf %50, %52 : vector<8x128xf32>
    %54 = math.tanh %53 : vector<8x128xf32>
    %55 = arith.negf %53 : vector<8x128xf32>
    %56 = math.exp %55 : vector<8x128xf32>
    %cst_31 = arith.constant 1.000000e+00 : f32
    %57 = vector.broadcast %cst_31 : f32 to vector<8x128xf32>
    %58 = arith.addf %57, %56 : vector<8x128xf32>
    %59 = arith.divf %57, %58 : vector<8x128xf32>
    %60 = arith.select %22, %54, %59 : vector<8x128xi1>, vector<8x128xf32>
    %c64_i32_32 = arith.constant 64 : i32
    %61 = tpu.dynamic_rotate %60 by %c64_i32_32 dim 1 : vector<8x128xf32>, i32 -> vector<8x128xf32>
    %62 = arith.mulf %60, %61 : vector<8x128xf32>
    %c96_i32_33 = arith.constant 96 : i32
    %63 = tpu.dynamic_rotate %60 by %c96_i32_33 dim 1 : vector<8x128xf32>, i32 -> vector<8x128xf32>
    %64 = arith.mulf %63, %25 : vector<8x128xf32>
    %65 = arith.addf %64, %62 : vector<8x128xf32>
    %c32_i32_34 = arith.constant 32 : i32
    %66 = tpu.dynamic_rotate %60 by %c32_i32_34 dim 1 : vector<8x128xf32>, i32 -> vector<8x128xf32>
    %67 = math.tanh %65 : vector<8x128xf32>
    %68 = arith.mulf %66, %67 : vector<8x128xf32>
    %69 = arith.index_cast %c0_i32 : i32 to index
    %c0_35 = arith.constant 0 : index
    %c0_36 = arith.constant 0 : index
    %70 = vector.load %arg8[%69, %c0_35, %c0_36] : memref<8x8x128xf32, #tpu.memory_space<vmem>>, vector<1x8x128xf32>
    %71 = vector.shape_cast %70 : vector<1x8x128xf32> to vector<8x128xf32>
    %72 = vector.shape_cast %47 : vector<8x128xf32> to vector<1x8x128xf32>
    tpu.vector_store %arg8[%69, %c0_35, %c0_36], %72 {strides = array<i32>} : memref<8x8x128xf32, #tpu.memory_space<vmem>>, vector<1x8x128xf32>,
    %73 = arith.index_cast %26 : i32 to index
    %c0_37 = arith.constant 0 : index
    %c0_38 = arith.constant 0 : index
    %74 = vector.load %arg11[%73, %c0_37, %c0_38] : memref<8x8x128xf32, #tpu.memory_space<vmem>>, vector<1x8x128xf32>
    %75 = vector.shape_cast %74 : vector<1x8x128xf32> to vector<8x128xf32>
    %76 = vector.shape_cast %68 : vector<8x128xf32> to vector<1x8x128xf32>
    tpu.vector_store %arg11[%73, %c0_37, %c0_38], %76 {strides = array<i32>} : memref<8x8x128xf32, #tpu.memory_space<vmem>>, vector<1x8x128xf32>,
    %c1_i32 = arith.constant 1 : i32
    %c7_i32_39 = arith.constant 7 : i32
    %77 = arith.subi %c7_i32_39, %c1_i32 : i32
    %78 = arith.index_cast %c1_i32 : i32 to index
    %c0_40 = arith.constant 0 : index
    %c0_41 = arith.constant 0 : index
    %79 = vector.load %arg9[%78, %c0_40, %c0_41] : memref<8x8x128xf32, #tpu.memory_space<vmem>>, vector<1x8x128xf32>
    %80 = vector.shape_cast %79 : vector<1x8x128xf32> to vector<8x128xf32>
    %81 = arith.truncf %47 : vector<8x128xf32> to vector<8x128xbf16>
    %cst_42 = arith.constant dense<0.000000e+00> : vector<8x128xf32>
    %82 = tpu.matmul %81, %23, %cst_42 {dimension_numbers = #tpu.dot_dimension_numbers<[1], [0], [0], [1], [0, 0, 1, 1], [], []>} : vector<8x128xbf16>, vector<128x128xbf16>, vector<8x128xf32> -> vector<8x128xf32>
    %83 = arith.addf %80, %82 : vector<8x128xf32>
    %84 = math.tanh %83 : vector<8x128xf32>
    %85 = arith.negf %83 : vector<8x128xf32>
    %86 = math.exp %85 : vector<8x128xf32>
    %cst_43 = arith.constant 1.000000e+00 : f32
    %87 = vector.broadcast %cst_43 : f32 to vector<8x128xf32>
    %88 = arith.addf %87, %86 : vector<8x128xf32>
    %89 = arith.divf %87, %88 : vector<8x128xf32>
    %90 = arith.select %22, %84, %89 : vector<8x128xi1>, vector<8x128xf32>
    %c64_i32_44 = arith.constant 64 : i32
    %91 = tpu.dynamic_rotate %90 by %c64_i32_44 dim 1 : vector<8x128xf32>, i32 -> vector<8x128xf32>
    %92 = arith.mulf %90, %91 : vector<8x128xf32>
    %c96_i32_45 = arith.constant 96 : i32
    %93 = tpu.dynamic_rotate %90 by %c96_i32_45 dim 1 : vector<8x128xf32>, i32 -> vector<8x128xf32>
    %94 = arith.mulf %93, %44 : vector<8x128xf32>
    %95 = arith.addf %94, %92 : vector<8x128xf32>
    %c32_i32_46 = arith.constant 32 : i32
    %96 = tpu.dynamic_rotate %90 by %c32_i32_46 dim 1 : vector<8x128xf32>, i32 -> vector<8x128xf32>
    %97 = math.tanh %95 : vector<8x128xf32>
    %98 = arith.mulf %96, %97 : vector<8x128xf32>
    %99 = arith.index_cast %77 : i32 to index
    %c0_47 = arith.constant 0 : index
    %c0_48 = arith.constant 0 : index
    %100 = vector.load %arg10[%99, %c0_47, %c0_48] : memref<8x8x128xf32, #tpu.memory_space<vmem>>, vector<1x8x128xf32>
    %101 = vector.shape_cast %100 : vector<1x8x128xf32> to vector<8x128xf32>
    %102 = arith.truncf %68 : vector<8x128xf32> to vector<8x128xbf16>
    %cst_49 = arith.constant dense<0.000000e+00> : vector<8x128xf32>
    %103 = tpu.matmul %102, %24, %cst_49 {dimension_numbers = #tpu.dot_dimension_numbers<[1], [0], [0], [1], [0, 0, 1, 1], [], []>} : vector<8x128xbf16>, vector<128x128xbf16>, vector<8x128xf32> -> vector<8x128xf32>
    %104 = arith.addf %101, %103 : vector<8x128xf32>
    %105 = math.tanh %104 : vector<8x128xf32>
    %106 = arith.negf %104 : vector<8x128xf32>
    %107 = math.exp %106 : vector<8x128xf32>
    %cst_50 = arith.constant 1.000000e+00 : f32
    %108 = vector.broadcast %cst_50 : f32 to vector<8x128xf32>
    %109 = arith.addf %108, %107 : vector<8x128xf32>
    %110 = arith.divf %108, %109 : vector<8x128xf32>
    %111 = arith.select %22, %105, %110 : vector<8x128xi1>, vector<8x128xf32>
    %c64_i32_51 = arith.constant 64 : i32
    %112 = tpu.dynamic_rotate %111 by %c64_i32_51 dim 1 : vector<8x128xf32>, i32 -> vector<8x128xf32>
    %113 = arith.mulf %111, %112 : vector<8x128xf32>
    %c96_i32_52 = arith.constant 96 : i32
    %114 = tpu.dynamic_rotate %111 by %c96_i32_52 dim 1 : vector<8x128xf32>, i32 -> vector<8x128xf32>
    %115 = arith.mulf %114, %65 : vector<8x128xf32>
    %116 = arith.addf %115, %113 : vector<8x128xf32>
    %c32_i32_53 = arith.constant 32 : i32
    %117 = tpu.dynamic_rotate %111 by %c32_i32_53 dim 1 : vector<8x128xf32>, i32 -> vector<8x128xf32>
    %118 = math.tanh %116 : vector<8x128xf32>
    %119 = arith.mulf %117, %118 : vector<8x128xf32>
    %120 = arith.index_cast %c1_i32 : i32 to index
    %c0_54 = arith.constant 0 : index
    %c0_55 = arith.constant 0 : index
    %121 = vector.load %arg8[%120, %c0_54, %c0_55] : memref<8x8x128xf32, #tpu.memory_space<vmem>>, vector<1x8x128xf32>
    %122 = vector.shape_cast %121 : vector<1x8x128xf32> to vector<8x128xf32>
    %123 = vector.shape_cast %98 : vector<8x128xf32> to vector<1x8x128xf32>
    tpu.vector_store %arg8[%120, %c0_54, %c0_55], %123 {strides = array<i32>} : memref<8x8x128xf32, #tpu.memory_space<vmem>>, vector<1x8x128xf32>,
    %124 = arith.index_cast %77 : i32 to index
    %c0_56 = arith.constant 0 : index
    %c0_57 = arith.constant 0 : index
    %125 = vector.load %arg11[%124, %c0_56, %c0_57] : memref<8x8x128xf32, #tpu.memory_space<vmem>>, vector<1x8x128xf32>
    %126 = vector.shape_cast %125 : vector<1x8x128xf32> to vector<8x128xf32>
    %127 = vector.shape_cast %119 : vector<8x128xf32> to vector<1x8x128xf32>
    tpu.vector_store %arg11[%124, %c0_56, %c0_57], %127 {strides = array<i32>} : memref<8x8x128xf32, #tpu.memory_space<vmem>>, vector<1x8x128xf32>,
    %c2_i32 = arith.constant 2 : i32
    %c7_i32_58 = arith.constant 7 : i32
    %128 = arith.subi %c7_i32_58, %c2_i32 : i32
    %129 = arith.index_cast %c2_i32 : i32 to index
    %c0_59 = arith.constant 0 : index
    %c0_60 = arith.constant 0 : index
    %130 = vector.load %arg9[%129, %c0_59, %c0_60] : memref<8x8x128xf32, #tpu.memory_space<vmem>>, vector<1x8x128xf32>
    %131 = vector.shape_cast %130 : vector<1x8x128xf32> to vector<8x128xf32>
    %132 = arith.truncf %98 : vector<8x128xf32> to vector<8x128xbf16>
    %cst_61 = arith.constant dense<0.000000e+00> : vector<8x128xf32>
    %133 = tpu.matmul %132, %23, %cst_61 {dimension_numbers = #tpu.dot_dimension_numbers<[1], [0], [0], [1], [0, 0, 1, 1], [], []>} : vector<8x128xbf16>, vector<128x128xbf16>, vector<8x128xf32> -> vector<8x128xf32>
    %134 = arith.addf %131, %133 : vector<8x128xf32>
    %135 = math.tanh %134 : vector<8x128xf32>
    %136 = arith.negf %134 : vector<8x128xf32>
    %137 = math.exp %136 : vector<8x128xf32>
    %cst_62 = arith.constant 1.000000e+00 : f32
    %138 = vector.broadcast %cst_62 : f32 to vector<8x128xf32>
    %139 = arith.addf %138, %137 : vector<8x128xf32>
    %140 = arith.divf %138, %139 : vector<8x128xf32>
    %141 = arith.select %22, %135, %140 : vector<8x128xi1>, vector<8x128xf32>
    %c64_i32_63 = arith.constant 64 : i32
    %142 = tpu.dynamic_rotate %141 by %c64_i32_63 dim 1 : vector<8x128xf32>, i32 -> vector<8x128xf32>
    %143 = arith.mulf %141, %142 : vector<8x128xf32>
    %c96_i32_64 = arith.constant 96 : i32
    %144 = tpu.dynamic_rotate %141 by %c96_i32_64 dim 1 : vector<8x128xf32>, i32 -> vector<8x128xf32>
    %145 = arith.mulf %144, %95 : vector<8x128xf32>
    %146 = arith.addf %145, %143 : vector<8x128xf32>
    %c32_i32_65 = arith.constant 32 : i32
    %147 = tpu.dynamic_rotate %141 by %c32_i32_65 dim 1 : vector<8x128xf32>, i32 -> vector<8x128xf32>
    %148 = math.tanh %146 : vector<8x128xf32>
    %149 = arith.mulf %147, %148 : vector<8x128xf32>
    %150 = arith.index_cast %128 : i32 to index
    %c0_66 = arith.constant 0 : index
    %c0_67 = arith.constant 0 : index
    %151 = vector.load %arg10[%150, %c0_66, %c0_67] : memref<8x8x128xf32, #tpu.memory_space<vmem>>, vector<1x8x128xf32>
    %152 = vector.shape_cast %151 : vector<1x8x128xf32> to vector<8x128xf32>
    %153 = arith.truncf %119 : vector<8x128xf32> to vector<8x128xbf16>
    %cst_68 = arith.constant dense<0.000000e+00> : vector<8x128xf32>
    %154 = tpu.matmul %153, %24, %cst_68 {dimension_numbers = #tpu.dot_dimension_numbers<[1], [0], [0], [1], [0, 0, 1, 1], [], []>} : vector<8x128xbf16>, vector<128x128xbf16>, vector<8x128xf32> -> vector<8x128xf32>
    %155 = arith.addf %152, %154 : vector<8x128xf32>
    %156 = math.tanh %155 : vector<8x128xf32>
    %157 = arith.negf %155 : vector<8x128xf32>
    %158 = math.exp %157 : vector<8x128xf32>
    %cst_69 = arith.constant 1.000000e+00 : f32
    %159 = vector.broadcast %cst_69 : f32 to vector<8x128xf32>
    %160 = arith.addf %159, %158 : vector<8x128xf32>
    %161 = arith.divf %159, %160 : vector<8x128xf32>
    %162 = arith.select %22, %156, %161 : vector<8x128xi1>, vector<8x128xf32>
    %c64_i32_70 = arith.constant 64 : i32
    %163 = tpu.dynamic_rotate %162 by %c64_i32_70 dim 1 : vector<8x128xf32>, i32 -> vector<8x128xf32>
    %164 = arith.mulf %162, %163 : vector<8x128xf32>
    %c96_i32_71 = arith.constant 96 : i32
    %165 = tpu.dynamic_rotate %162 by %c96_i32_71 dim 1 : vector<8x128xf32>, i32 -> vector<8x128xf32>
    %166 = arith.mulf %165, %116 : vector<8x128xf32>
    %167 = arith.addf %166, %164 : vector<8x128xf32>
    %c32_i32_72 = arith.constant 32 : i32
    %168 = tpu.dynamic_rotate %162 by %c32_i32_72 dim 1 : vector<8x128xf32>, i32 -> vector<8x128xf32>
    %169 = math.tanh %167 : vector<8x128xf32>
    %170 = arith.mulf %168, %169 : vector<8x128xf32>
    %171 = arith.index_cast %c2_i32 : i32 to index
    %c0_73 = arith.constant 0 : index
    %c0_74 = arith.constant 0 : index
    %172 = vector.load %arg8[%171, %c0_73, %c0_74] : memref<8x8x128xf32, #tpu.memory_space<vmem>>, vector<1x8x128xf32>
    %173 = vector.shape_cast %172 : vector<1x8x128xf32> to vector<8x128xf32>
    %174 = vector.shape_cast %149 : vector<8x128xf32> to vector<1x8x128xf32>
    tpu.vector_store %arg8[%171, %c0_73, %c0_74], %174 {strides = array<i32>} : memref<8x8x128xf32, #tpu.memory_space<vmem>>, vector<1x8x128xf32>,
    %175 = arith.index_cast %128 : i32 to index
    %c0_75 = arith.constant 0 : index
    %c0_76 = arith.constant 0 : index
    %176 = vector.load %arg11[%175, %c0_75, %c0_76] : memref<8x8x128xf32, #tpu.memory_space<vmem>>, vector<1x8x128xf32>
    %177 = vector.shape_cast %176 : vector<1x8x128xf32> to vector<8x128xf32>
    %178 = vector.shape_cast %170 : vector<8x128xf32> to vector<1x8x128xf32>
    tpu.vector_store %arg11[%175, %c0_75, %c0_76], %178 {strides = array<i32>} : memref<8x8x128xf32, #tpu.memory_space<vmem>>, vector<1x8x128xf32>,
    %c3_i32 = arith.constant 3 : i32
    %c7_i32_77 = arith.constant 7 : i32
    %179 = arith.subi %c7_i32_77, %c3_i32 : i32
    %180 = arith.index_cast %c3_i32 : i32 to index
    %c0_78 = arith.constant 0 : index
    %c0_79 = arith.constant 0 : index
    %181 = vector.load %arg9[%180, %c0_78, %c0_79] : memref<8x8x128xf32, #tpu.memory_space<vmem>>, vector<1x8x128xf32>
    %182 = vector.shape_cast %181 : vector<1x8x128xf32> to vector<8x128xf32>
    %183 = arith.truncf %149 : vector<8x128xf32> to vector<8x128xbf16>
    %cst_80 = arith.constant dense<0.000000e+00> : vector<8x128xf32>
    %184 = tpu.matmul %183, %23, %cst_80 {dimension_numbers = #tpu.dot_dimension_numbers<[1], [0], [0], [1], [0, 0, 1, 1], [], []>} : vector<8x128xbf16>, vector<128x128xbf16>, vector<8x128xf32> -> vector<8x128xf32>
    %185 = arith.addf %182, %184 : vector<8x128xf32>
    %186 = math.tanh %185 : vector<8x128xf32>
    %187 = arith.negf %185 : vector<8x128xf32>
    %188 = math.exp %187 : vector<8x128xf32>
    %cst_81 = arith.constant 1.000000e+00 : f32
    %189 = vector.broadcast %cst_81 : f32 to vector<8x128xf32>
    %190 = arith.addf %189, %188 : vector<8x128xf32>
    %191 = arith.divf %189, %190 : vector<8x128xf32>
    %192 = arith.select %22, %186, %191 : vector<8x128xi1>, vector<8x128xf32>
    %c64_i32_82 = arith.constant 64 : i32
    %193 = tpu.dynamic_rotate %192 by %c64_i32_82 dim 1 : vector<8x128xf32>, i32 -> vector<8x128xf32>
    %194 = arith.mulf %192, %193 : vector<8x128xf32>
    %c96_i32_83 = arith.constant 96 : i32
    %195 = tpu.dynamic_rotate %192 by %c96_i32_83 dim 1 : vector<8x128xf32>, i32 -> vector<8x128xf32>
    %196 = arith.mulf %195, %146 : vector<8x128xf32>
    %197 = arith.addf %196, %194 : vector<8x128xf32>
    %c32_i32_84 = arith.constant 32 : i32
    %198 = tpu.dynamic_rotate %192 by %c32_i32_84 dim 1 : vector<8x128xf32>, i32 -> vector<8x128xf32>
    %199 = math.tanh %197 : vector<8x128xf32>
    %200 = arith.mulf %198, %199 : vector<8x128xf32>
    %201 = arith.index_cast %179 : i32 to index
    %c0_85 = arith.constant 0 : index
    %c0_86 = arith.constant 0 : index
    %202 = vector.load %arg10[%201, %c0_85, %c0_86] : memref<8x8x128xf32, #tpu.memory_space<vmem>>, vector<1x8x128xf32>
    %203 = vector.shape_cast %202 : vector<1x8x128xf32> to vector<8x128xf32>
    %204 = arith.truncf %170 : vector<8x128xf32> to vector<8x128xbf16>
    %cst_87 = arith.constant dense<0.000000e+00> : vector<8x128xf32>
    %205 = tpu.matmul %204, %24, %cst_87 {dimension_numbers = #tpu.dot_dimension_numbers<[1], [0], [0], [1], [0, 0, 1, 1], [], []>} : vector<8x128xbf16>, vector<128x128xbf16>, vector<8x128xf32> -> vector<8x128xf32>
    %206 = arith.addf %203, %205 : vector<8x128xf32>
    %207 = math.tanh %206 : vector<8x128xf32>
    %208 = arith.negf %206 : vector<8x128xf32>
    %209 = math.exp %208 : vector<8x128xf32>
    %cst_88 = arith.constant 1.000000e+00 : f32
    %210 = vector.broadcast %cst_88 : f32 to vector<8x128xf32>
    %211 = arith.addf %210, %209 : vector<8x128xf32>
    %212 = arith.divf %210, %211 : vector<8x128xf32>
    %213 = arith.select %22, %207, %212 : vector<8x128xi1>, vector<8x128xf32>
    %c64_i32_89 = arith.constant 64 : i32
    %214 = tpu.dynamic_rotate %213 by %c64_i32_89 dim 1 : vector<8x128xf32>, i32 -> vector<8x128xf32>
    %215 = arith.mulf %213, %214 : vector<8x128xf32>
    %c96_i32_90 = arith.constant 96 : i32
    %216 = tpu.dynamic_rotate %213 by %c96_i32_90 dim 1 : vector<8x128xf32>, i32 -> vector<8x128xf32>
    %217 = arith.mulf %216, %167 : vector<8x128xf32>
    %218 = arith.addf %217, %215 : vector<8x128xf32>
    %c32_i32_91 = arith.constant 32 : i32
    %219 = tpu.dynamic_rotate %213 by %c32_i32_91 dim 1 : vector<8x128xf32>, i32 -> vector<8x128xf32>
    %220 = math.tanh %218 : vector<8x128xf32>
    %221 = arith.mulf %219, %220 : vector<8x128xf32>
    %222 = arith.index_cast %c3_i32 : i32 to index
    %c0_92 = arith.constant 0 : index
    %c0_93 = arith.constant 0 : index
    %223 = vector.load %arg8[%222, %c0_92, %c0_93] : memref<8x8x128xf32, #tpu.memory_space<vmem>>, vector<1x8x128xf32>
    %224 = vector.shape_cast %223 : vector<1x8x128xf32> to vector<8x128xf32>
    %225 = vector.shape_cast %200 : vector<8x128xf32> to vector<1x8x128xf32>
    tpu.vector_store %arg8[%222, %c0_92, %c0_93], %225 {strides = array<i32>} : memref<8x8x128xf32, #tpu.memory_space<vmem>>, vector<1x8x128xf32>,
    %226 = arith.index_cast %179 : i32 to index
    %c0_94 = arith.constant 0 : index
    %c0_95 = arith.constant 0 : index
    %227 = vector.load %arg11[%226, %c0_94, %c0_95] : memref<8x8x128xf32, #tpu.memory_space<vmem>>, vector<1x8x128xf32>
    %228 = vector.shape_cast %227 : vector<1x8x128xf32> to vector<8x128xf32>
    %229 = vector.shape_cast %221 : vector<8x128xf32> to vector<1x8x128xf32>
    tpu.vector_store %arg11[%226, %c0_94, %c0_95], %229 {strides = array<i32>} : memref<8x8x128xf32, #tpu.memory_space<vmem>>, vector<1x8x128xf32>,
    %c4_i32 = arith.constant 4 : i32
    %c7_i32_96 = arith.constant 7 : i32
    %230 = arith.subi %c7_i32_96, %c4_i32 : i32
    %231 = arith.index_cast %c4_i32 : i32 to index
    %c0_97 = arith.constant 0 : index
    %c0_98 = arith.constant 0 : index
    %232 = vector.load %arg9[%231, %c0_97, %c0_98] : memref<8x8x128xf32, #tpu.memory_space<vmem>>, vector<1x8x128xf32>
    %233 = vector.shape_cast %232 : vector<1x8x128xf32> to vector<8x128xf32>
    %234 = arith.truncf %200 : vector<8x128xf32> to vector<8x128xbf16>
    %cst_99 = arith.constant dense<0.000000e+00> : vector<8x128xf32>
    %235 = tpu.matmul %234, %23, %cst_99 {dimension_numbers = #tpu.dot_dimension_numbers<[1], [0], [0], [1], [0, 0, 1, 1], [], []>} : vector<8x128xbf16>, vector<128x128xbf16>, vector<8x128xf32> -> vector<8x128xf32>
    %236 = arith.addf %233, %235 : vector<8x128xf32>
    %237 = math.tanh %236 : vector<8x128xf32>
    %238 = arith.negf %236 : vector<8x128xf32>
    %239 = math.exp %238 : vector<8x128xf32>
    %cst_100 = arith.constant 1.000000e+00 : f32
    %240 = vector.broadcast %cst_100 : f32 to vector<8x128xf32>
    %241 = arith.addf %240, %239 : vector<8x128xf32>
    %242 = arith.divf %240, %241 : vector<8x128xf32>
    %243 = arith.select %22, %237, %242 : vector<8x128xi1>, vector<8x128xf32>
    %c64_i32_101 = arith.constant 64 : i32
    %244 = tpu.dynamic_rotate %243 by %c64_i32_101 dim 1 : vector<8x128xf32>, i32 -> vector<8x128xf32>
    %245 = arith.mulf %243, %244 : vector<8x128xf32>
    %c96_i32_102 = arith.constant 96 : i32
    %246 = tpu.dynamic_rotate %243 by %c96_i32_102 dim 1 : vector<8x128xf32>, i32 -> vector<8x128xf32>
    %247 = arith.mulf %246, %197 : vector<8x128xf32>
    %248 = arith.addf %247, %245 : vector<8x128xf32>
    %c32_i32_103 = arith.constant 32 : i32
    %249 = tpu.dynamic_rotate %243 by %c32_i32_103 dim 1 : vector<8x128xf32>, i32 -> vector<8x128xf32>
    %250 = math.tanh %248 : vector<8x128xf32>
    %251 = arith.mulf %249, %250 : vector<8x128xf32>
    %252 = arith.index_cast %230 : i32 to index
    %c0_104 = arith.constant 0 : index
    %c0_105 = arith.constant 0 : index
    %253 = vector.load %arg10[%252, %c0_104, %c0_105] : memref<8x8x128xf32, #tpu.memory_space<vmem>>, vector<1x8x128xf32>
    %254 = vector.shape_cast %253 : vector<1x8x128xf32> to vector<8x128xf32>
    %255 = arith.truncf %221 : vector<8x128xf32> to vector<8x128xbf16>
    %cst_106 = arith.constant dense<0.000000e+00> : vector<8x128xf32>
    %256 = tpu.matmul %255, %24, %cst_106 {dimension_numbers = #tpu.dot_dimension_numbers<[1], [0], [0], [1], [0, 0, 1, 1], [], []>} : vector<8x128xbf16>, vector<128x128xbf16>, vector<8x128xf32> -> vector<8x128xf32>
    %257 = arith.addf %254, %256 : vector<8x128xf32>
    %258 = math.tanh %257 : vector<8x128xf32>
    %259 = arith.negf %257 : vector<8x128xf32>
    %260 = math.exp %259 : vector<8x128xf32>
    %cst_107 = arith.constant 1.000000e+00 : f32
    %261 = vector.broadcast %cst_107 : f32 to vector<8x128xf32>
    %262 = arith.addf %261, %260 : vector<8x128xf32>
    %263 = arith.divf %261, %262 : vector<8x128xf32>
    %264 = arith.select %22, %258, %263 : vector<8x128xi1>, vector<8x128xf32>
    %c64_i32_108 = arith.constant 64 : i32
    %265 = tpu.dynamic_rotate %264 by %c64_i32_108 dim 1 : vector<8x128xf32>, i32 -> vector<8x128xf32>
    %266 = arith.mulf %264, %265 : vector<8x128xf32>
    %c96_i32_109 = arith.constant 96 : i32
    %267 = tpu.dynamic_rotate %264 by %c96_i32_109 dim 1 : vector<8x128xf32>, i32 -> vector<8x128xf32>
    %268 = arith.mulf %267, %218 : vector<8x128xf32>
    %269 = arith.addf %268, %266 : vector<8x128xf32>
    %c32_i32_110 = arith.constant 32 : i32
    %270 = tpu.dynamic_rotate %264 by %c32_i32_110 dim 1 : vector<8x128xf32>, i32 -> vector<8x128xf32>
    %271 = math.tanh %269 : vector<8x128xf32>
    %272 = arith.mulf %270, %271 : vector<8x128xf32>
    %273 = arith.index_cast %c4_i32 : i32 to index
    %c0_111 = arith.constant 0 : index
    %c0_112 = arith.constant 0 : index
    %274 = vector.load %arg8[%273, %c0_111, %c0_112] : memref<8x8x128xf32, #tpu.memory_space<vmem>>, vector<1x8x128xf32>
    %275 = vector.shape_cast %274 : vector<1x8x128xf32> to vector<8x128xf32>
    %276 = vector.shape_cast %251 : vector<8x128xf32> to vector<1x8x128xf32>
    tpu.vector_store %arg8[%273, %c0_111, %c0_112], %276 {strides = array<i32>} : memref<8x8x128xf32, #tpu.memory_space<vmem>>, vector<1x8x128xf32>,
    %277 = arith.index_cast %230 : i32 to index
    %c0_113 = arith.constant 0 : index
    %c0_114 = arith.constant 0 : index
    %278 = vector.load %arg11[%277, %c0_113, %c0_114] : memref<8x8x128xf32, #tpu.memory_space<vmem>>, vector<1x8x128xf32>
    %279 = vector.shape_cast %278 : vector<1x8x128xf32> to vector<8x128xf32>
    %280 = vector.shape_cast %272 : vector<8x128xf32> to vector<1x8x128xf32>
    tpu.vector_store %arg11[%277, %c0_113, %c0_114], %280 {strides = array<i32>} : memref<8x8x128xf32, #tpu.memory_space<vmem>>, vector<1x8x128xf32>,
    %c5_i32 = arith.constant 5 : i32
    %c7_i32_115 = arith.constant 7 : i32
    %281 = arith.subi %c7_i32_115, %c5_i32 : i32
    %282 = arith.index_cast %c5_i32 : i32 to index
    %c0_116 = arith.constant 0 : index
    %c0_117 = arith.constant 0 : index
    %283 = vector.load %arg9[%282, %c0_116, %c0_117] : memref<8x8x128xf32, #tpu.memory_space<vmem>>, vector<1x8x128xf32>
    %284 = vector.shape_cast %283 : vector<1x8x128xf32> to vector<8x128xf32>
    %285 = arith.truncf %251 : vector<8x128xf32> to vector<8x128xbf16>
    %cst_118 = arith.constant dense<0.000000e+00> : vector<8x128xf32>
    %286 = tpu.matmul %285, %23, %cst_118 {dimension_numbers = #tpu.dot_dimension_numbers<[1], [0], [0], [1], [0, 0, 1, 1], [], []>} : vector<8x128xbf16>, vector<128x128xbf16>, vector<8x128xf32> -> vector<8x128xf32>
    %287 = arith.addf %284, %286 : vector<8x128xf32>
    %288 = math.tanh %287 : vector<8x128xf32>
    %289 = arith.negf %287 : vector<8x128xf32>
    %290 = math.exp %289 : vector<8x128xf32>
    %cst_119 = arith.constant 1.000000e+00 : f32
    %291 = vector.broadcast %cst_119 : f32 to vector<8x128xf32>
    %292 = arith.addf %291, %290 : vector<8x128xf32>
    %293 = arith.divf %291, %292 : vector<8x128xf32>
    %294 = arith.select %22, %288, %293 : vector<8x128xi1>, vector<8x128xf32>
    %c64_i32_120 = arith.constant 64 : i32
    %295 = tpu.dynamic_rotate %294 by %c64_i32_120 dim 1 : vector<8x128xf32>, i32 -> vector<8x128xf32>
    %296 = arith.mulf %294, %295 : vector<8x128xf32>
    %c96_i32_121 = arith.constant 96 : i32
    %297 = tpu.dynamic_rotate %294 by %c96_i32_121 dim 1 : vector<8x128xf32>, i32 -> vector<8x128xf32>
    %298 = arith.mulf %297, %248 : vector<8x128xf32>
    %299 = arith.addf %298, %296 : vector<8x128xf32>
    %c32_i32_122 = arith.constant 32 : i32
    %300 = tpu.dynamic_rotate %294 by %c32_i32_122 dim 1 : vector<8x128xf32>, i32 -> vector<8x128xf32>
    %301 = math.tanh %299 : vector<8x128xf32>
    %302 = arith.mulf %300, %301 : vector<8x128xf32>
    %303 = arith.index_cast %281 : i32 to index
    %c0_123 = arith.constant 0 : index
    %c0_124 = arith.constant 0 : index
    %304 = vector.load %arg10[%303, %c0_123, %c0_124] : memref<8x8x128xf32, #tpu.memory_space<vmem>>, vector<1x8x128xf32>
    %305 = vector.shape_cast %304 : vector<1x8x128xf32> to vector<8x128xf32>
    %306 = arith.truncf %272 : vector<8x128xf32> to vector<8x128xbf16>
    %cst_125 = arith.constant dense<0.000000e+00> : vector<8x128xf32>
    %307 = tpu.matmul %306, %24, %cst_125 {dimension_numbers = #tpu.dot_dimension_numbers<[1], [0], [0], [1], [0, 0, 1, 1], [], []>} : vector<8x128xbf16>, vector<128x128xbf16>, vector<8x128xf32> -> vector<8x128xf32>
    %308 = arith.addf %305, %307 : vector<8x128xf32>
    %309 = math.tanh %308 : vector<8x128xf32>
    %310 = arith.negf %308 : vector<8x128xf32>
    %311 = math.exp %310 : vector<8x128xf32>
    %cst_126 = arith.constant 1.000000e+00 : f32
    %312 = vector.broadcast %cst_126 : f32 to vector<8x128xf32>
    %313 = arith.addf %312, %311 : vector<8x128xf32>
    %314 = arith.divf %312, %313 : vector<8x128xf32>
    %315 = arith.select %22, %309, %314 : vector<8x128xi1>, vector<8x128xf32>
    %c64_i32_127 = arith.constant 64 : i32
    %316 = tpu.dynamic_rotate %315 by %c64_i32_127 dim 1 : vector<8x128xf32>, i32 -> vector<8x128xf32>
    %317 = arith.mulf %315, %316 : vector<8x128xf32>
    %c96_i32_128 = arith.constant 96 : i32
    %318 = tpu.dynamic_rotate %315 by %c96_i32_128 dim 1 : vector<8x128xf32>, i32 -> vector<8x128xf32>
    %319 = arith.mulf %318, %269 : vector<8x128xf32>
    %320 = arith.addf %319, %317 : vector<8x128xf32>
    %c32_i32_129 = arith.constant 32 : i32
    %321 = tpu.dynamic_rotate %315 by %c32_i32_129 dim 1 : vector<8x128xf32>, i32 -> vector<8x128xf32>
    %322 = math.tanh %320 : vector<8x128xf32>
    %323 = arith.mulf %321, %322 : vector<8x128xf32>
    %324 = arith.index_cast %c5_i32 : i32 to index
    %c0_130 = arith.constant 0 : index
    %c0_131 = arith.constant 0 : index
    %325 = vector.load %arg8[%324, %c0_130, %c0_131] : memref<8x8x128xf32, #tpu.memory_space<vmem>>, vector<1x8x128xf32>
    %326 = vector.shape_cast %325 : vector<1x8x128xf32> to vector<8x128xf32>
    %327 = vector.shape_cast %302 : vector<8x128xf32> to vector<1x8x128xf32>
    tpu.vector_store %arg8[%324, %c0_130, %c0_131], %327 {strides = array<i32>} : memref<8x8x128xf32, #tpu.memory_space<vmem>>, vector<1x8x128xf32>,
    %328 = arith.index_cast %281 : i32 to index
    %c0_132 = arith.constant 0 : index
    %c0_133 = arith.constant 0 : index
    %329 = vector.load %arg11[%328, %c0_132, %c0_133] : memref<8x8x128xf32, #tpu.memory_space<vmem>>, vector<1x8x128xf32>
    %330 = vector.shape_cast %329 : vector<1x8x128xf32> to vector<8x128xf32>
    %331 = vector.shape_cast %323 : vector<8x128xf32> to vector<1x8x128xf32>
    tpu.vector_store %arg11[%328, %c0_132, %c0_133], %331 {strides = array<i32>} : memref<8x8x128xf32, #tpu.memory_space<vmem>>, vector<1x8x128xf32>,
    %c6_i32 = arith.constant 6 : i32
    %c7_i32_134 = arith.constant 7 : i32
    %332 = arith.subi %c7_i32_134, %c6_i32 : i32
    %333 = arith.index_cast %c6_i32 : i32 to index
    %c0_135 = arith.constant 0 : index
    %c0_136 = arith.constant 0 : index
    %334 = vector.load %arg9[%333, %c0_135, %c0_136] : memref<8x8x128xf32, #tpu.memory_space<vmem>>, vector<1x8x128xf32>
    %335 = vector.shape_cast %334 : vector<1x8x128xf32> to vector<8x128xf32>
    %336 = arith.truncf %302 : vector<8x128xf32> to vector<8x128xbf16>
    %cst_137 = arith.constant dense<0.000000e+00> : vector<8x128xf32>
    %337 = tpu.matmul %336, %23, %cst_137 {dimension_numbers = #tpu.dot_dimension_numbers<[1], [0], [0], [1], [0, 0, 1, 1], [], []>} : vector<8x128xbf16>, vector<128x128xbf16>, vector<8x128xf32> -> vector<8x128xf32>
    %338 = arith.addf %335, %337 : vector<8x128xf32>
    %339 = math.tanh %338 : vector<8x128xf32>
    %340 = arith.negf %338 : vector<8x128xf32>
    %341 = math.exp %340 : vector<8x128xf32>
    %cst_138 = arith.constant 1.000000e+00 : f32
    %342 = vector.broadcast %cst_138 : f32 to vector<8x128xf32>
    %343 = arith.addf %342, %341 : vector<8x128xf32>
    %344 = arith.divf %342, %343 : vector<8x128xf32>
    %345 = arith.select %22, %339, %344 : vector<8x128xi1>, vector<8x128xf32>
    %c64_i32_139 = arith.constant 64 : i32
    %346 = tpu.dynamic_rotate %345 by %c64_i32_139 dim 1 : vector<8x128xf32>, i32 -> vector<8x128xf32>
    %347 = arith.mulf %345, %346 : vector<8x128xf32>
    %c96_i32_140 = arith.constant 96 : i32
    %348 = tpu.dynamic_rotate %345 by %c96_i32_140 dim 1 : vector<8x128xf32>, i32 -> vector<8x128xf32>
    %349 = arith.mulf %348, %299 : vector<8x128xf32>
    %350 = arith.addf %349, %347 : vector<8x128xf32>
    %c32_i32_141 = arith.constant 32 : i32
    %351 = tpu.dynamic_rotate %345 by %c32_i32_141 dim 1 : vector<8x128xf32>, i32 -> vector<8x128xf32>
    %352 = math.tanh %350 : vector<8x128xf32>
    %353 = arith.mulf %351, %352 : vector<8x128xf32>
    %354 = arith.index_cast %332 : i32 to index
    %c0_142 = arith.constant 0 : index
    %c0_143 = arith.constant 0 : index
    %355 = vector.load %arg10[%354, %c0_142, %c0_143] : memref<8x8x128xf32, #tpu.memory_space<vmem>>, vector<1x8x128xf32>
    %356 = vector.shape_cast %355 : vector<1x8x128xf32> to vector<8x128xf32>
    %357 = arith.truncf %323 : vector<8x128xf32> to vector<8x128xbf16>
    %cst_144 = arith.constant dense<0.000000e+00> : vector<8x128xf32>
    %358 = tpu.matmul %357, %24, %cst_144 {dimension_numbers = #tpu.dot_dimension_numbers<[1], [0], [0], [1], [0, 0, 1, 1], [], []>} : vector<8x128xbf16>, vector<128x128xbf16>, vector<8x128xf32> -> vector<8x128xf32>
    %359 = arith.addf %356, %358 : vector<8x128xf32>
    %360 = math.tanh %359 : vector<8x128xf32>
    %361 = arith.negf %359 : vector<8x128xf32>
    %362 = math.exp %361 : vector<8x128xf32>
    %cst_145 = arith.constant 1.000000e+00 : f32
    %363 = vector.broadcast %cst_145 : f32 to vector<8x128xf32>
    %364 = arith.addf %363, %362 : vector<8x128xf32>
    %365 = arith.divf %363, %364 : vector<8x128xf32>
    %366 = arith.select %22, %360, %365 : vector<8x128xi1>, vector<8x128xf32>
    %c64_i32_146 = arith.constant 64 : i32
    %367 = tpu.dynamic_rotate %366 by %c64_i32_146 dim 1 : vector<8x128xf32>, i32 -> vector<8x128xf32>
    %368 = arith.mulf %366, %367 : vector<8x128xf32>
    %c96_i32_147 = arith.constant 96 : i32
    %369 = tpu.dynamic_rotate %366 by %c96_i32_147 dim 1 : vector<8x128xf32>, i32 -> vector<8x128xf32>
    %370 = arith.mulf %369, %320 : vector<8x128xf32>
    %371 = arith.addf %370, %368 : vector<8x128xf32>
    %c32_i32_148 = arith.constant 32 : i32
    %372 = tpu.dynamic_rotate %366 by %c32_i32_148 dim 1 : vector<8x128xf32>, i32 -> vector<8x128xf32>
    %373 = math.tanh %371 : vector<8x128xf32>
    %374 = arith.mulf %372, %373 : vector<8x128xf32>
    %375 = arith.index_cast %c6_i32 : i32 to index
    %c0_149 = arith.constant 0 : index
    %c0_150 = arith.constant 0 : index
    %376 = vector.load %arg8[%375, %c0_149, %c0_150] : memref<8x8x128xf32, #tpu.memory_space<vmem>>, vector<1x8x128xf32>
    %377 = vector.shape_cast %376 : vector<1x8x128xf32> to vector<8x128xf32>
    %378 = vector.shape_cast %353 : vector<8x128xf32> to vector<1x8x128xf32>
    tpu.vector_store %arg8[%375, %c0_149, %c0_150], %378 {strides = array<i32>} : memref<8x8x128xf32, #tpu.memory_space<vmem>>, vector<1x8x128xf32>,
    %379 = arith.index_cast %332 : i32 to index
    %c0_151 = arith.constant 0 : index
    %c0_152 = arith.constant 0 : index
    %380 = vector.load %arg11[%379, %c0_151, %c0_152] : memref<8x8x128xf32, #tpu.memory_space<vmem>>, vector<1x8x128xf32>
    %381 = vector.shape_cast %380 : vector<1x8x128xf32> to vector<8x128xf32>
    %382 = vector.shape_cast %374 : vector<8x128xf32> to vector<1x8x128xf32>
    tpu.vector_store %arg11[%379, %c0_151, %c0_152], %382 {strides = array<i32>} : memref<8x8x128xf32, #tpu.memory_space<vmem>>, vector<1x8x128xf32>,
    %c7_i32_153 = arith.constant 7 : i32
    %c7_i32_154 = arith.constant 7 : i32
    %383 = arith.subi %c7_i32_154, %c7_i32_153 : i32
    %384 = arith.index_cast %c7_i32_153 : i32 to index
    %c0_155 = arith.constant 0 : index
    %c0_156 = arith.constant 0 : index
    %385 = vector.load %arg9[%384, %c0_155, %c0_156] : memref<8x8x128xf32, #tpu.memory_space<vmem>>, vector<1x8x128xf32>
    %386 = vector.shape_cast %385 : vector<1x8x128xf32> to vector<8x128xf32>
    %387 = arith.truncf %353 : vector<8x128xf32> to vector<8x128xbf16>
    %cst_157 = arith.constant dense<0.000000e+00> : vector<8x128xf32>
    %388 = tpu.matmul %387, %23, %cst_157 {dimension_numbers = #tpu.dot_dimension_numbers<[1], [0], [0], [1], [0, 0, 1, 1], [], []>} : vector<8x128xbf16>, vector<128x128xbf16>, vector<8x128xf32> -> vector<8x128xf32>
    %389 = arith.addf %386, %388 : vector<8x128xf32>
    %390 = math.tanh %389 : vector<8x128xf32>
    %391 = arith.negf %389 : vector<8x128xf32>
    %392 = math.exp %391 : vector<8x128xf32>
    %cst_158 = arith.constant 1.000000e+00 : f32
    %393 = vector.broadcast %cst_158 : f32 to vector<8x128xf32>
    %394 = arith.addf %393, %392 : vector<8x128xf32>
    %395 = arith.divf %393, %394 : vector<8x128xf32>
    %396 = arith.select %22, %390, %395 : vector<8x128xi1>, vector<8x128xf32>
    %c64_i32_159 = arith.constant 64 : i32
    %397 = tpu.dynamic_rotate %396 by %c64_i32_159 dim 1 : vector<8x128xf32>, i32 -> vector<8x128xf32>
    %398 = arith.mulf %396, %397 : vector<8x128xf32>
    %c96_i32_160 = arith.constant 96 : i32
    %399 = tpu.dynamic_rotate %396 by %c96_i32_160 dim 1 : vector<8x128xf32>, i32 -> vector<8x128xf32>
    %400 = arith.mulf %399, %350 : vector<8x128xf32>
    %401 = arith.addf %400, %398 : vector<8x128xf32>
    %c32_i32_161 = arith.constant 32 : i32
    %402 = tpu.dynamic_rotate %396 by %c32_i32_161 dim 1 : vector<8x128xf32>, i32 -> vector<8x128xf32>
    %403 = math.tanh %401 : vector<8x128xf32>
    %404 = arith.mulf %402, %403 : vector<8x128xf32>
    %405 = arith.index_cast %383 : i32 to index
    %c0_162 = arith.constant 0 : index
    %c0_163 = arith.constant 0 : index
    %406 = vector.load %arg10[%405, %c0_162, %c0_163] : memref<8x8x128xf32, #tpu.memory_space<vmem>>, vector<1x8x128xf32>
    %407 = vector.shape_cast %406 : vector<1x8x128xf32> to vector<8x128xf32>
    %408 = arith.truncf %374 : vector<8x128xf32> to vector<8x128xbf16>
    %cst_164 = arith.constant dense<0.000000e+00> : vector<8x128xf32>
    %409 = tpu.matmul %408, %24, %cst_164 {dimension_numbers = #tpu.dot_dimension_numbers<[1], [0], [0], [1], [0, 0, 1, 1], [], []>} : vector<8x128xbf16>, vector<128x128xbf16>, vector<8x128xf32> -> vector<8x128xf32>
    %410 = arith.addf %407, %409 : vector<8x128xf32>
    %411 = math.tanh %410 : vector<8x128xf32>
    %412 = arith.negf %410 : vector<8x128xf32>
    %413 = math.exp %412 : vector<8x128xf32>
    %cst_165 = arith.constant 1.000000e+00 : f32
    %414 = vector.broadcast %cst_165 : f32 to vector<8x128xf32>
    %415 = arith.addf %414, %413 : vector<8x128xf32>
    %416 = arith.divf %414, %415 : vector<8x128xf32>
    %417 = arith.select %22, %411, %416 : vector<8x128xi1>, vector<8x128xf32>
    %c64_i32_166 = arith.constant 64 : i32
    %418 = tpu.dynamic_rotate %417 by %c64_i32_166 dim 1 : vector<8x128xf32>, i32 -> vector<8x128xf32>
    %419 = arith.mulf %417, %418 : vector<8x128xf32>
    %c96_i32_167 = arith.constant 96 : i32
    %420 = tpu.dynamic_rotate %417 by %c96_i32_167 dim 1 : vector<8x128xf32>, i32 -> vector<8x128xf32>
    %421 = arith.mulf %420, %371 : vector<8x128xf32>
    %422 = arith.addf %421, %419 : vector<8x128xf32>
    %c32_i32_168 = arith.constant 32 : i32
    %423 = tpu.dynamic_rotate %417 by %c32_i32_168 dim 1 : vector<8x128xf32>, i32 -> vector<8x128xf32>
    %424 = math.tanh %422 : vector<8x128xf32>
    %425 = arith.mulf %423, %424 : vector<8x128xf32>
    %426 = arith.index_cast %c7_i32_153 : i32 to index
    %c0_169 = arith.constant 0 : index
    %c0_170 = arith.constant 0 : index
    %427 = vector.load %arg8[%426, %c0_169, %c0_170] : memref<8x8x128xf32, #tpu.memory_space<vmem>>, vector<1x8x128xf32>
    %428 = vector.shape_cast %427 : vector<1x8x128xf32> to vector<8x128xf32>
    %429 = vector.shape_cast %404 : vector<8x128xf32> to vector<1x8x128xf32>
    tpu.vector_store %arg8[%426, %c0_169, %c0_170], %429 {strides = array<i32>} : memref<8x8x128xf32, #tpu.memory_space<vmem>>, vector<1x8x128xf32>,
    %430 = arith.index_cast %383 : i32 to index
    %c0_171 = arith.constant 0 : index
    %c0_172 = arith.constant 0 : index
    %431 = vector.load %arg11[%430, %c0_171, %c0_172] : memref<8x8x128xf32, #tpu.memory_space<vmem>>, vector<1x8x128xf32>
    %432 = vector.shape_cast %431 : vector<1x8x128xf32> to vector<8x128xf32>
    %433 = vector.shape_cast %425 : vector<8x128xf32> to vector<1x8x128xf32>
    tpu.vector_store %arg11[%430, %c0_171, %c0_172], %433 {strides = array<i32>} : memref<8x8x128xf32, #tpu.memory_space<vmem>>, vector<1x8x128xf32>,
    %c8_i32 = arith.constant 8 : i32
    %434 = tpu.iota {dimensions = array<i32: 1>} : vector<64x128xi32>
    %c0_173 = arith.constant 0 : index
    %c0_174 = arith.constant 0 : index
    %c0_175 = arith.constant 0 : index
    %435 = vector.load %arg8[%c0_173, %c0_174, %c0_175] : memref<8x8x128xf32, #tpu.memory_space<vmem>>, vector<8x8x128xf32>
    %436 = vector.shape_cast %435 : vector<8x8x128xf32> to vector<64x128xf32>
    %c0_176 = arith.constant 0 : index
    %c0_177 = arith.constant 0 : index
    %c0_178 = arith.constant 0 : index
    %437 = vector.load %arg11[%c0_176, %c0_177, %c0_178] : memref<8x8x128xf32, #tpu.memory_space<vmem>>, vector<8x8x128xf32>
    %438 = vector.shape_cast %437 : vector<8x8x128xf32> to vector<64x128xf32>
    %c32_i32_179 = arith.constant 32 : i32
    %439 = tpu.dynamic_rotate %438 by %c32_i32_179 dim 1 : vector<64x128xf32>, i32 -> vector<64x128xf32>
    %c32_i32_180 = arith.constant 32 : i32
    %440 = vector.broadcast %c32_i32_180 : i32 to vector<64x128xi32>
    %441 = arith.cmpi slt, %434, %440 : vector<64x128xi32>
    %c64_i32_181 = arith.constant 64 : i32
    %442 = vector.broadcast %c64_i32_181 : i32 to vector<64x128xi32>
    %443 = arith.cmpi slt, %434, %442 : vector<64x128xi32>
    %cst_182 = arith.constant 0.000000e+00 : f32
    %444 = vector.broadcast %cst_182 : f32 to vector<64x128xf32>
    %445 = arith.select %443, %439, %444 : vector<64x128xi1>, vector<64x128xf32>
    %446 = arith.select %441, %436, %445 : vector<64x128xi1>, vector<64x128xf32>
    %447 = vector.shape_cast %446 : vector<64x128xf32> to vector<8x8x128xf32>
    %c0_183 = arith.constant 0 : index
    %c0_184 = arith.constant 0 : index
    %c0_185 = arith.constant 0 : index
    %448 = vector.load %arg8[%c0_183, %c0_184, %c0_185] : memref<8x8x128xf32, #tpu.memory_space<vmem>>, vector<8x8x128xf32>
    tpu.vector_store %arg8[%c0_183, %c0_184, %c0_185], %447 {strides = array<i32>} : memref<8x8x128xf32, #tpu.memory_space<vmem>>, vector<8x8x128xf32>,
    return
  }
  func.func @transform_0(%arg0: i32) -> (i32, i32, i32) {
    %c0_i32 = arith.constant 0 : i32
    %c0_i32_0 = arith.constant 0 : i32
    %c0_i32_1 = arith.constant 0 : i32
    %c0_i32_2 = arith.constant 0 : i32
    return %c0_i32, %c0_i32_0, %c0_i32_1 : i32, i32, i32
  }
  func.func @transform_1(%arg0: i32) -> (i32, i32) {
    %c0_i32 = arith.constant 0 : i32
    %c0_i32_0 = arith.constant 0 : i32
    %c0_i32_1 = arith.constant 0 : i32
    return %c0_i32, %c0_i32_0 : i32, i32
  }
  func.func @transform_2(%arg0: i32) -> (i32, i32) {
    %c0_i32 = arith.constant 0 : i32
    %c0_i32_0 = arith.constant 0 : i32
    %c0_i32_1 = arith.constant 0 : i32
    return %c0_i32, %c0_i32_0 : i32, i32
  }
  func.func @transform_3(%arg0: i32) -> (i32, i32) {
    %c0_i32 = arith.constant 0 : i32
    %c0_i32_0 = arith.constant 0 : i32
    %c0_i32_1 = arith.constant 0 : i32
    return %c0_i32, %c0_i32_0 : i32, i32
  }
  func.func @transform_4(%arg0: i32) -> (i32, i32) {
    %c0_i32 = arith.constant 0 : i32
    %c0_i32_0 = arith.constant 0 : i32
    %c0_i32_1 = arith.constant 0 : i32
    return %c0_i32, %c0_i32_0 : i32, i32
  }
  func.func @transform_5(%arg0: i32) -> (i32, i32) {
    %c0_i32 = arith.constant 0 : i32
    %c0_i32_0 = arith.constant 0 : i32
    %c0_i32_1 = arith.constant 0 : i32
    return %c0_i32, %c0_i32_0 : i32, i32
  }
  func.func @transform_6(%arg0: i32) -> (i32, i32) {
    %c0_i32 = arith.constant 0 : i32
    %c0_i32_0 = arith.constant 0 : i32
    %c0_i32_1 = arith.constant 0 : i32
    return %c0_i32, %c0_i32_0 : i32, i32
  }
  func.func @transform_7(%arg0: i32) -> (i32, i32, i32) {
    %c0_i32 = arith.constant 0 : i32
    %c0_i32_0 = arith.constant 0 : i32
    %c0_i32_1 = arith.constant 0 : i32
    %c0_i32_2 = arith.constant 0 : i32
    return %c0_i32, %c0_i32_0, %c0_i32_1 : i32, i32, i32
  }
}

module attributes {stable_mosaic.version = 11 : i64} {
  func.func @bilstm_kernel(%arg0: i32, %arg1: memref<8x8x128xf32, #tpu.memory_space<vmem>>, %arg2: memref<128x128xbf16, #tpu.memory_space<vmem>>, %arg3: memref<128x128xbf16, #tpu.memory_space<vmem>>, %arg4: memref<1x128xf32, #tpu.memory_space<vmem>>, %arg5: memref<128x128xbf16, #tpu.memory_space<vmem>>, %arg6: memref<128x128xbf16, #tpu.memory_space<vmem>>, %arg7: memref<1x128xf32, #tpu.memory_space<vmem>>, %arg8: memref<8x8x128xf32, #tpu.memory_space<vmem>>, %arg9: memref<8x8x128xf32, #tpu.memory_space<vmem>>, %arg10: memref<8x8x128xf32, #tpu.memory_space<vmem>>, %arg11: memref<8x8x128xf32, #tpu.memory_space<vmem>>) attributes {dimension_semantics = [#tpu.dimension_semantics<arbitrary>], iteration_bounds = array<i64: 1>, scalar_prefetch = 0 : i64, scratch_operands = 3 : i64, tpu.core_type = #tpu.core_type<tc>, window_params = [{pipeline_mode = #tpu.pipeline_mode<synchronous>, transform_indices = @transform_0, window_bounds = array<i64: 8, 8, 128>}, {pipeline_mode = #tpu.pipeline_mode<synchronous>, transform_indices = @transform_1, window_bounds = array<i64: 128, 128>}, {pipeline_mode = #tpu.pipeline_mode<synchronous>, transform_indices = @transform_2, window_bounds = array<i64: 128, 128>}, {pipeline_mode = #tpu.pipeline_mode<synchronous>, transform_indices = @transform_3, window_bounds = array<i64: 1, 128>}, {pipeline_mode = #tpu.pipeline_mode<synchronous>, transform_indices = @transform_4, window_bounds = array<i64: 128, 128>}, {pipeline_mode = #tpu.pipeline_mode<synchronous>, transform_indices = @transform_5, window_bounds = array<i64: 128, 128>}, {pipeline_mode = #tpu.pipeline_mode<synchronous>, transform_indices = @transform_6, window_bounds = array<i64: 1, 128>}, {pipeline_mode = #tpu.pipeline_mode<synchronous>, transform_indices = @transform_7, window_bounds = array<i64: 8, 8, 128>}]} {
    %c0 = arith.constant 0 : index
    %c0_0 = arith.constant 0 : index
    %c0_1 = arith.constant 0 : index
    %0 = vector.load %arg1[%c0, %c0_0, %c0_1] : memref<8x8x128xf32, #tpu.memory_space<vmem>>, vector<8x8x128xf32>
    %1 = vector.shape_cast %0 : vector<8x8x128xf32> to vector<64x128xf32>
    %2 = arith.truncf %1 : vector<64x128xf32> to vector<64x128xbf16>
    %c0_2 = arith.constant 0 : index
    %c0_3 = arith.constant 0 : index
    %3 = vector.load %arg2[%c0_2, %c0_3] : memref<128x128xbf16, #tpu.memory_space<vmem>>, vector<128x128xbf16>
    %cst = arith.constant dense<0.000000e+00> : vector<64x128xf32>
    %4 = tpu.matmul %2, %3, %cst {dimension_numbers = #tpu.dot_dimension_numbers<[1], [0], [0], [1], [0, 0, 1, 1], [], []>} : vector<64x128xbf16>, vector<128x128xbf16>, vector<64x128xf32> -> vector<64x128xf32>
    %c0_4 = arith.constant 0 : index
    %c0_5 = arith.constant 0 : index
    %5 = vector.load %arg4[%c0_4, %c0_5] : memref<1x128xf32, #tpu.memory_space<vmem>>, vector<1x128xf32>
    %6 = vector.broadcast %5 : vector<1x128xf32> to vector<64x128xf32>
    %7 = arith.addf %4, %6 : vector<64x128xf32>
    %8 = vector.shape_cast %7 : vector<64x128xf32> to vector<8x8x128xf32>
    %c0_6 = arith.constant 0 : index
    %c0_7 = arith.constant 0 : index
    %c0_8 = arith.constant 0 : index
    %9 = vector.load %arg9[%c0_6, %c0_7, %c0_8] : memref<8x8x128xf32, #tpu.memory_space<vmem>>, vector<8x8x128xf32>
    tpu.vector_store %arg9[%c0_6, %c0_7, %c0_8], %8 {strides = array<i32>} : memref<8x8x128xf32, #tpu.memory_space<vmem>>, vector<8x8x128xf32>,
    %c0_9 = arith.constant 0 : index
    %c0_10 = arith.constant 0 : index
    %10 = vector.load %arg5[%c0_9, %c0_10] : memref<128x128xbf16, #tpu.memory_space<vmem>>, vector<128x128xbf16>
    %cst_11 = arith.constant dense<0.000000e+00> : vector<64x128xf32>
    %11 = tpu.matmul %2, %10, %cst_11 {dimension_numbers = #tpu.dot_dimension_numbers<[1], [0], [0], [1], [0, 0, 1, 1], [], []>} : vector<64x128xbf16>, vector<128x128xbf16>, vector<64x128xf32> -> vector<64x128xf32>
    %c0_12 = arith.constant 0 : index
    %c0_13 = arith.constant 0 : index
    %12 = vector.load %arg7[%c0_12, %c0_13] : memref<1x128xf32, #tpu.memory_space<vmem>>, vector<1x128xf32>
    %13 = vector.broadcast %12 : vector<1x128xf32> to vector<64x128xf32>
    %14 = arith.addf %11, %13 : vector<64x128xf32>
    %15 = vector.shape_cast %14 : vector<64x128xf32> to vector<8x8x128xf32>
    %c0_14 = arith.constant 0 : index
    %c0_15 = arith.constant 0 : index
    %c0_16 = arith.constant 0 : index
    %16 = vector.load %arg10[%c0_14, %c0_15, %c0_16] : memref<8x8x128xf32, #tpu.memory_space<vmem>>, vector<8x8x128xf32>
    tpu.vector_store %arg10[%c0_14, %c0_15, %c0_16], %15 {strides = array<i32>} : memref<8x8x128xf32, #tpu.memory_space<vmem>>, vector<8x8x128xf32>,
    %17 = tpu.iota {dimensions = array<i32: 1>} : vector<8x128xi32>
    %c64_i32 = arith.constant 64 : i32
    %18 = vector.broadcast %c64_i32 : i32 to vector<8x128xi32>
    %19 = arith.cmpi sge, %17, %18 : vector<8x128xi32>
    %c96_i32 = arith.constant 96 : i32
    %20 = vector.broadcast %c96_i32 : i32 to vector<8x128xi32>
    %21 = arith.cmpi slt, %17, %20 : vector<8x128xi32>
    %22 = arith.andi %19, %21 : vector<8x128xi1>
    %c0_17 = arith.constant 0 : index
    %c0_18 = arith.constant 0 : index
    %23 = vector.load %arg3[%c0_17, %c0_18] : memref<128x128xbf16, #tpu.memory_space<vmem>>, vector<128x128xbf16>
    %c0_19 = arith.constant 0 : index
    %c0_20 = arith.constant 0 : index
    %24 = vector.load %arg6[%c0_19, %c0_20] : memref<128x128xbf16, #tpu.memory_space<vmem>>, vector<128x128xbf16>
    %cst_21 = arith.constant 0.000000e+00 : f32
    %25 = vector.broadcast %cst_21 : f32 to vector<8x128xf32>
    %c0_i32 = arith.constant 0 : i32
    %c7_i32 = arith.constant 7 : i32
    %26 = arith.subi %c7_i32, %c0_i32 : i32
    %27 = arith.index_cast %c0_i32 : i32 to index
    %c0_22 = arith.constant 0 : index
    %c0_23 = arith.constant 0 : index
    %28 = vector.load %arg9[%27, %c0_22, %c0_23] : memref<8x8x128xf32, #tpu.memory_space<vmem>>, vector<1x8x128xf32>
    %29 = vector.shape_cast %28 : vector<1x8x128xf32> to vector<8x128xf32>
    %30 = arith.truncf %25 : vector<8x128xf32> to vector<8x128xbf16>
    %cst_24 = arith.constant dense<0.000000e+00> : vector<8x128xf32>
    %31 = tpu.matmul %30, %23, %cst_24 {dimension_numbers = #tpu.dot_dimension_numbers<[1], [0], [0], [1], [0, 0, 1, 1], [], []>} : vector<8x128xbf16>, vector<128x128xbf16>, vector<8x128xf32> -> vector<8x128xf32>
    %32 = arith.addf %29, %31 : vector<8x128xf32>
    %33 = math.tanh %32 : vector<8x128xf32>
    %34 = arith.negf %32 : vector<8x128xf32>
    %35 = math.exp %34 : vector<8x128xf32>
    %cst_25 = arith.constant 1.000000e+00 : f32
    %36 = vector.broadcast %cst_25 : f32 to vector<8x128xf32>
    %37 = arith.addf %36, %35 : vector<8x128xf32>
    %38 = arith.divf %36, %37 : vector<8x128xf32>
    %39 = arith.select %22, %33, %38 : vector<8x128xi1>, vector<8x128xf32>
    %c64_i32_26 = arith.constant 64 : i32
    %40 = tpu.dynamic_rotate %39 by %c64_i32_26 dim 1 : vector<8x128xf32>, i32 -> vector<8x128xf32>
    %41 = arith.mulf %39, %40 : vector<8x128xf32>
    %c96_i32_27 = arith.constant 96 : i32
    %42 = tpu.dynamic_rotate %39 by %c96_i32_27 dim 1 : vector<8x128xf32>, i32 -> vector<8x128xf32>
    %43 = arith.mulf %42, %25 : vector<8x128xf32>
    %44 = arith.addf %43, %41 : vector<8x128xf32>
    %c32_i32 = arith.constant 32 : i32
    %45 = tpu.dynamic_rotate %39 by %c32_i32 dim 1 : vector<8x128xf32>, i32 -> vector<8x128xf32>
    %46 = math.tanh %44 : vector<8x128xf32>
    %47 = arith.mulf %45, %46 : vector<8x128xf32>
    %48 = arith.index_cast %26 : i32 to index
    %c0_28 = arith.constant 0 : index
    %c0_29 = arith.constant 0 : index
    %49 = vector.load %arg10[%48, %c0_28, %c0_29] : memref<8x8x128xf32, #tpu.memory_space<vmem>>, vector<1x8x128xf32>
    %50 = vector.shape_cast %49 : vector<1x8x128xf32> to vector<8x128xf32>
    %51 = arith.truncf %25 : vector<8x128xf32> to vector<8x128xbf16>
    %cst_30 = arith.constant dense<0.000000e+00> : vector<8x128xf32>
    %52 = tpu.matmul %51, %24, %cst_30 {dimension_numbers = #tpu.dot_dimension_numbers<[1], [0], [0], [1], [0, 0, 1, 1], [], []>} : vector<8x128xbf16>, vector<128x128xbf16>, vector<8x128xf32> -> vector<8x128xf32>
    %53 = arith.addf %50, %52 : vector<8x128xf32>
    %54 = math.tanh %53 : vector<8x128xf32>
    %55 = arith.negf %53 : vector<8x128xf32>
    %56 = math.exp %55 : vector<8x128xf32>
    %cst_31 = arith.constant 1.000000e+00 : f32
    %57 = vector.broadcast %cst_31 : f32 to vector<8x128xf32>
    %58 = arith.addf %57, %56 : vector<8x128xf32>
    %59 = arith.divf %57, %58 : vector<8x128xf32>
    %60 = arith.select %22, %54, %59 : vector<8x128xi1>, vector<8x128xf32>
    %c64_i32_32 = arith.constant 64 : i32
    %61 = tpu.dynamic_rotate %60 by %c64_i32_32 dim 1 : vector<8x128xf32>, i32 -> vector<8x128xf32>
    %62 = arith.mulf %60, %61 : vector<8x128xf32>
    %c96_i32_33 = arith.constant 96 : i32
    %63 = tpu.dynamic_rotate %60 by %c96_i32_33 dim 1 : vector<8x128xf32>, i32 -> vector<8x128xf32>
    %64 = arith.mulf %63, %25 : vector<8x128xf32>
    %65 = arith.addf %64, %62 : vector<8x128xf32>
    %c32_i32_34 = arith.constant 32 : i32
    %66 = tpu.dynamic_rotate %60 by %c32_i32_34 dim 1 : vector<8x128xf32>, i32 -> vector<8x128xf32>
    %67 = math.tanh %65 : vector<8x128xf32>
    %68 = arith.mulf %66, %67 : vector<8x128xf32>
    %69 = arith.index_cast %c0_i32 : i32 to index
    %c0_35 = arith.constant 0 : index
    %c0_36 = arith.constant 0 : index
    %70 = vector.load %arg8[%69, %c0_35, %c0_36] : memref<8x8x128xf32, #tpu.memory_space<vmem>>, vector<1x8x128xf32>
    %71 = vector.shape_cast %70 : vector<1x8x128xf32> to vector<8x128xf32>
    %72 = vector.shape_cast %47 : vector<8x128xf32> to vector<1x8x128xf32>
    tpu.vector_store %arg8[%69, %c0_35, %c0_36], %72 {strides = array<i32>} : memref<8x8x128xf32, #tpu.memory_space<vmem>>, vector<1x8x128xf32>,
    %73 = arith.index_cast %26 : i32 to index
    %c0_37 = arith.constant 0 : index
    %c0_38 = arith.constant 0 : index
    %74 = vector.load %arg11[%73, %c0_37, %c0_38] : memref<8x8x128xf32, #tpu.memory_space<vmem>>, vector<1x8x128xf32>
    %75 = vector.shape_cast %74 : vector<1x8x128xf32> to vector<8x128xf32>
    %76 = vector.shape_cast %68 : vector<8x128xf32> to vector<1x8x128xf32>
    tpu.vector_store %arg11[%73, %c0_37, %c0_38], %76 {strides = array<i32>} : memref<8x8x128xf32, #tpu.memory_space<vmem>>, vector<1x8x128xf32>,
    %c1_i32 = arith.constant 1 : i32
    %c7_i32_39 = arith.constant 7 : i32
    %77 = arith.subi %c7_i32_39, %c1_i32 : i32
    %78 = arith.index_cast %c1_i32 : i32 to index
    %c0_40 = arith.constant 0 : index
    %c0_41 = arith.constant 0 : index
    %79 = vector.load %arg9[%78, %c0_40, %c0_41] : memref<8x8x128xf32, #tpu.memory_space<vmem>>, vector<1x8x128xf32>
    %80 = vector.shape_cast %79 : vector<1x8x128xf32> to vector<8x128xf32>
    %81 = arith.truncf %47 : vector<8x128xf32> to vector<8x128xbf16>
    %cst_42 = arith.constant dense<0.000000e+00> : vector<8x128xf32>
    %82 = tpu.matmul %81, %23, %cst_42 {dimension_numbers = #tpu.dot_dimension_numbers<[1], [0], [0], [1], [0, 0, 1, 1], [], []>} : vector<8x128xbf16>, vector<128x128xbf16>, vector<8x128xf32> -> vector<8x128xf32>
    %83 = arith.addf %80, %82 : vector<8x128xf32>
    %84 = math.tanh %83 : vector<8x128xf32>
    %85 = arith.negf %83 : vector<8x128xf32>
    %86 = math.exp %85 : vector<8x128xf32>
    %cst_43 = arith.constant 1.000000e+00 : f32
    %87 = vector.broadcast %cst_43 : f32 to vector<8x128xf32>
    %88 = arith.addf %87, %86 : vector<8x128xf32>
    %89 = arith.divf %87, %88 : vector<8x128xf32>
    %90 = arith.select %22, %84, %89 : vector<8x128xi1>, vector<8x128xf32>
    %c64_i32_44 = arith.constant 64 : i32
    %91 = tpu.dynamic_rotate %90 by %c64_i32_44 dim 1 : vector<8x128xf32>, i32 -> vector<8x128xf32>
    %92 = arith.mulf %90, %91 : vector<8x128xf32>
    %c96_i32_45 = arith.constant 96 : i32
    %93 = tpu.dynamic_rotate %90 by %c96_i32_45 dim 1 : vector<8x128xf32>, i32 -> vector<8x128xf32>
    %94 = arith.mulf %93, %44 : vector<8x128xf32>
    %95 = arith.addf %94, %92 : vector<8x128xf32>
    %c32_i32_46 = arith.constant 32 : i32
    %96 = tpu.dynamic_rotate %90 by %c32_i32_46 dim 1 : vector<8x128xf32>, i32 -> vector<8x128xf32>
    %97 = math.tanh %95 : vector<8x128xf32>
    %98 = arith.mulf %96, %97 : vector<8x128xf32>
    %99 = arith.index_cast %77 : i32 to index
    %c0_47 = arith.constant 0 : index
    %c0_48 = arith.constant 0 : index
    %100 = vector.load %arg10[%99, %c0_47, %c0_48] : memref<8x8x128xf32, #tpu.memory_space<vmem>>, vector<1x8x128xf32>
    %101 = vector.shape_cast %100 : vector<1x8x128xf32> to vector<8x128xf32>
    %102 = arith.truncf %68 : vector<8x128xf32> to vector<8x128xbf16>
    %cst_49 = arith.constant dense<0.000000e+00> : vector<8x128xf32>
    %103 = tpu.matmul %102, %24, %cst_49 {dimension_numbers = #tpu.dot_dimension_numbers<[1], [0], [0], [1], [0, 0, 1, 1], [], []>} : vector<8x128xbf16>, vector<128x128xbf16>, vector<8x128xf32> -> vector<8x128xf32>
    %104 = arith.addf %101, %103 : vector<8x128xf32>
    %105 = math.tanh %104 : vector<8x128xf32>
    %106 = arith.negf %104 : vector<8x128xf32>
    %107 = math.exp %106 : vector<8x128xf32>
    %cst_50 = arith.constant 1.000000e+00 : f32
    %108 = vector.broadcast %cst_50 : f32 to vector<8x128xf32>
    %109 = arith.addf %108, %107 : vector<8x128xf32>
    %110 = arith.divf %108, %109 : vector<8x128xf32>
    %111 = arith.select %22, %105, %110 : vector<8x128xi1>, vector<8x128xf32>
    %c64_i32_51 = arith.constant 64 : i32
    %112 = tpu.dynamic_rotate %111 by %c64_i32_51 dim 1 : vector<8x128xf32>, i32 -> vector<8x128xf32>
    %113 = arith.mulf %111, %112 : vector<8x128xf32>
    %c96_i32_52 = arith.constant 96 : i32
    %114 = tpu.dynamic_rotate %111 by %c96_i32_52 dim 1 : vector<8x128xf32>, i32 -> vector<8x128xf32>
    %115 = arith.mulf %114, %65 : vector<8x128xf32>
    %116 = arith.addf %115, %113 : vector<8x128xf32>
    %c32_i32_53 = arith.constant 32 : i32
    %117 = tpu.dynamic_rotate %111 by %c32_i32_53 dim 1 : vector<8x128xf32>, i32 -> vector<8x128xf32>
    %118 = math.tanh %116 : vector<8x128xf32>
    %119 = arith.mulf %117, %118 : vector<8x128xf32>
    %120 = arith.index_cast %c1_i32 : i32 to index
    %c0_54 = arith.constant 0 : index
    %c0_55 = arith.constant 0 : index
    %121 = vector.load %arg8[%120, %c0_54, %c0_55] : memref<8x8x128xf32, #tpu.memory_space<vmem>>, vector<1x8x128xf32>
    %122 = vector.shape_cast %121 : vector<1x8x128xf32> to vector<8x128xf32>
    %123 = vector.shape_cast %98 : vector<8x128xf32> to vector<1x8x128xf32>
    tpu.vector_store %arg8[%120, %c0_54, %c0_55], %123 {strides = array<i32>} : memref<8x8x128xf32, #tpu.memory_space<vmem>>, vector<1x8x128xf32>,
    %124 = arith.index_cast %77 : i32 to index
    %c0_56 = arith.constant 0 : index
    %c0_57 = arith.constant 0 : index
    %125 = vector.load %arg11[%124, %c0_56, %c0_57] : memref<8x8x128xf32, #tpu.memory_space<vmem>>, vector<1x8x128xf32>
    %126 = vector.shape_cast %125 : vector<1x8x128xf32> to vector<8x128xf32>
    %127 = vector.shape_cast %119 : vector<8x128xf32> to vector<1x8x128xf32>
    tpu.vector_store %arg11[%124, %c0_56, %c0_57], %127 {strides = array<i32>} : memref<8x8x128xf32, #tpu.memory_space<vmem>>, vector<1x8x128xf32>,
    %c2_i32 = arith.constant 2 : i32
    %c7_i32_58 = arith.constant 7 : i32
    %128 = arith.subi %c7_i32_58, %c2_i32 : i32
    %129 = arith.index_cast %c2_i32 : i32 to index
    %c0_59 = arith.constant 0 : index
    %c0_60 = arith.constant 0 : index
    %130 = vector.load %arg9[%129, %c0_59, %c0_60] : memref<8x8x128xf32, #tpu.memory_space<vmem>>, vector<1x8x128xf32>
    %131 = vector.shape_cast %130 : vector<1x8x128xf32> to vector<8x128xf32>
    %132 = arith.truncf %98 : vector<8x128xf32> to vector<8x128xbf16>
    %cst_61 = arith.constant dense<0.000000e+00> : vector<8x128xf32>
    %133 = tpu.matmul %132, %23, %cst_61 {dimension_numbers = #tpu.dot_dimension_numbers<[1], [0], [0], [1], [0, 0, 1, 1], [], []>} : vector<8x128xbf16>, vector<128x128xbf16>, vector<8x128xf32> -> vector<8x128xf32>
    %134 = arith.addf %131, %133 : vector<8x128xf32>
    %135 = math.tanh %134 : vector<8x128xf32>
    %136 = arith.negf %134 : vector<8x128xf32>
    %137 = math.exp %136 : vector<8x128xf32>
    %cst_62 = arith.constant 1.000000e+00 : f32
    %138 = vector.broadcast %cst_62 : f32 to vector<8x128xf32>
    %139 = arith.addf %138, %137 : vector<8x128xf32>
    %140 = arith.divf %138, %139 : vector<8x128xf32>
    %141 = arith.select %22, %135, %140 : vector<8x128xi1>, vector<8x128xf32>
    %c64_i32_63 = arith.constant 64 : i32
    %142 = tpu.dynamic_rotate %141 by %c64_i32_63 dim 1 : vector<8x128xf32>, i32 -> vector<8x128xf32>
    %143 = arith.mulf %141, %142 : vector<8x128xf32>
    %c96_i32_64 = arith.constant 96 : i32
    %144 = tpu.dynamic_rotate %141 by %c96_i32_64 dim 1 : vector<8x128xf32>, i32 -> vector<8x128xf32>
    %145 = arith.mulf %144, %95 : vector<8x128xf32>
    %146 = arith.addf %145, %143 : vector<8x128xf32>
    %c32_i32_65 = arith.constant 32 : i32
    %147 = tpu.dynamic_rotate %141 by %c32_i32_65 dim 1 : vector<8x128xf32>, i32 -> vector<8x128xf32>
    %148 = math.tanh %146 : vector<8x128xf32>
    %149 = arith.mulf %147, %148 : vector<8x128xf32>
    %150 = arith.index_cast %128 : i32 to index
    %c0_66 = arith.constant 0 : index
    %c0_67 = arith.constant 0 : index
    %151 = vector.load %arg10[%150, %c0_66, %c0_67] : memref<8x8x128xf32, #tpu.memory_space<vmem>>, vector<1x8x128xf32>
    %152 = vector.shape_cast %151 : vector<1x8x128xf32> to vector<8x128xf32>
    %153 = arith.truncf %119 : vector<8x128xf32> to vector<8x128xbf16>
    %cst_68 = arith.constant dense<0.000000e+00> : vector<8x128xf32>
    %154 = tpu.matmul %153, %24, %cst_68 {dimension_numbers = #tpu.dot_dimension_numbers<[1], [0], [0], [1], [0, 0, 1, 1], [], []>} : vector<8x128xbf16>, vector<128x128xbf16>, vector<8x128xf32> -> vector<8x128xf32>
    %155 = arith.addf %152, %154 : vector<8x128xf32>
    %156 = math.tanh %155 : vector<8x128xf32>
    %157 = arith.negf %155 : vector<8x128xf32>
    %158 = math.exp %157 : vector<8x128xf32>
    %cst_69 = arith.constant 1.000000e+00 : f32
    %159 = vector.broadcast %cst_69 : f32 to vector<8x128xf32>
    %160 = arith.addf %159, %158 : vector<8x128xf32>
    %161 = arith.divf %159, %160 : vector<8x128xf32>
    %162 = arith.select %22, %156, %161 : vector<8x128xi1>, vector<8x128xf32>
    %c64_i32_70 = arith.constant 64 : i32
    %163 = tpu.dynamic_rotate %162 by %c64_i32_70 dim 1 : vector<8x128xf32>, i32 -> vector<8x128xf32>
    %164 = arith.mulf %162, %163 : vector<8x128xf32>
    %c96_i32_71 = arith.constant 96 : i32
    %165 = tpu.dynamic_rotate %162 by %c96_i32_71 dim 1 : vector<8x128xf32>, i32 -> vector<8x128xf32>
    %166 = arith.mulf %165, %116 : vector<8x128xf32>
    %167 = arith.addf %166, %164 : vector<8x128xf32>
    %c32_i32_72 = arith.constant 32 : i32
    %168 = tpu.dynamic_rotate %162 by %c32_i32_72 dim 1 : vector<8x128xf32>, i32 -> vector<8x128xf32>
    %169 = math.tanh %167 : vector<8x128xf32>
    %170 = arith.mulf %168, %169 : vector<8x128xf32>
    %171 = arith.index_cast %c2_i32 : i32 to index
    %c0_73 = arith.constant 0 : index
    %c0_74 = arith.constant 0 : index
    %172 = vector.load %arg8[%171, %c0_73, %c0_74] : memref<8x8x128xf32, #tpu.memory_space<vmem>>, vector<1x8x128xf32>
    %173 = vector.shape_cast %172 : vector<1x8x128xf32> to vector<8x128xf32>
    %174 = vector.shape_cast %149 : vector<8x128xf32> to vector<1x8x128xf32>
    tpu.vector_store %arg8[%171, %c0_73, %c0_74], %174 {strides = array<i32>} : memref<8x8x128xf32, #tpu.memory_space<vmem>>, vector<1x8x128xf32>,
    %175 = arith.index_cast %128 : i32 to index
    %c0_75 = arith.constant 0 : index
    %c0_76 = arith.constant 0 : index
    %176 = vector.load %arg11[%175, %c0_75, %c0_76] : memref<8x8x128xf32, #tpu.memory_space<vmem>>, vector<1x8x128xf32>
    %177 = vector.shape_cast %176 : vector<1x8x128xf32> to vector<8x128xf32>
    %178 = vector.shape_cast %170 : vector<8x128xf32> to vector<1x8x128xf32>
    tpu.vector_store %arg11[%175, %c0_75, %c0_76], %178 {strides = array<i32>} : memref<8x8x128xf32, #tpu.memory_space<vmem>>, vector<1x8x128xf32>,
    %c3_i32 = arith.constant 3 : i32
    %c7_i32_77 = arith.constant 7 : i32
    %179 = arith.subi %c7_i32_77, %c3_i32 : i32
    %180 = arith.index_cast %c3_i32 : i32 to index
    %c0_78 = arith.constant 0 : index
    %c0_79 = arith.constant 0 : index
    %181 = vector.load %arg9[%180, %c0_78, %c0_79] : memref<8x8x128xf32, #tpu.memory_space<vmem>>, vector<1x8x128xf32>
    %182 = vector.shape_cast %181 : vector<1x8x128xf32> to vector<8x128xf32>
    %183 = arith.truncf %149 : vector<8x128xf32> to vector<8x128xbf16>
    %cst_80 = arith.constant dense<0.000000e+00> : vector<8x128xf32>
    %184 = tpu.matmul %183, %23, %cst_80 {dimension_numbers = #tpu.dot_dimension_numbers<[1], [0], [0], [1], [0, 0, 1, 1], [], []>} : vector<8x128xbf16>, vector<128x128xbf16>, vector<8x128xf32> -> vector<8x128xf32>
    %185 = arith.addf %182, %184 : vector<8x128xf32>
    %186 = math.tanh %185 : vector<8x128xf32>
    %187 = arith.negf %185 : vector<8x128xf32>
    %188 = math.exp %187 : vector<8x128xf32>
    %cst_81 = arith.constant 1.000000e+00 : f32
    %189 = vector.broadcast %cst_81 : f32 to vector<8x128xf32>
    %190 = arith.addf %189, %188 : vector<8x128xf32>
    %191 = arith.divf %189, %190 : vector<8x128xf32>
    %192 = arith.select %22, %186, %191 : vector<8x128xi1>, vector<8x128xf32>
    %c64_i32_82 = arith.constant 64 : i32
    %193 = tpu.dynamic_rotate %192 by %c64_i32_82 dim 1 : vector<8x128xf32>, i32 -> vector<8x128xf32>
    %194 = arith.mulf %192, %193 : vector<8x128xf32>
    %c96_i32_83 = arith.constant 96 : i32
    %195 = tpu.dynamic_rotate %192 by %c96_i32_83 dim 1 : vector<8x128xf32>, i32 -> vector<8x128xf32>
    %196 = arith.mulf %195, %146 : vector<8x128xf32>
    %197 = arith.addf %196, %194 : vector<8x128xf32>
    %c32_i32_84 = arith.constant 32 : i32
    %198 = tpu.dynamic_rotate %192 by %c32_i32_84 dim 1 : vector<8x128xf32>, i32 -> vector<8x128xf32>
    %199 = math.tanh %197 : vector<8x128xf32>
    %200 = arith.mulf %198, %199 : vector<8x128xf32>
    %201 = arith.index_cast %179 : i32 to index
    %c0_85 = arith.constant 0 : index
    %c0_86 = arith.constant 0 : index
    %202 = vector.load %arg10[%201, %c0_85, %c0_86] : memref<8x8x128xf32, #tpu.memory_space<vmem>>, vector<1x8x128xf32>
    %203 = vector.shape_cast %202 : vector<1x8x128xf32> to vector<8x128xf32>
    %204 = arith.truncf %170 : vector<8x128xf32> to vector<8x128xbf16>
    %cst_87 = arith.constant dense<0.000000e+00> : vector<8x128xf32>
    %205 = tpu.matmul %204, %24, %cst_87 {dimension_numbers = #tpu.dot_dimension_numbers<[1], [0], [0], [1], [0, 0, 1, 1], [], []>} : vector<8x128xbf16>, vector<128x128xbf16>, vector<8x128xf32> -> vector<8x128xf32>
    %206 = arith.addf %203, %205 : vector<8x128xf32>
    %207 = math.tanh %206 : vector<8x128xf32>
    %208 = arith.negf %206 : vector<8x128xf32>
    %209 = math.exp %208 : vector<8x128xf32>
    %cst_88 = arith.constant 1.000000e+00 : f32
    %210 = vector.broadcast %cst_88 : f32 to vector<8x128xf32>
    %211 = arith.addf %210, %209 : vector<8x128xf32>
    %212 = arith.divf %210, %211 : vector<8x128xf32>
    %213 = arith.select %22, %207, %212 : vector<8x128xi1>, vector<8x128xf32>
    %c64_i32_89 = arith.constant 64 : i32
    %214 = tpu.dynamic_rotate %213 by %c64_i32_89 dim 1 : vector<8x128xf32>, i32 -> vector<8x128xf32>
    %215 = arith.mulf %213, %214 : vector<8x128xf32>
    %c96_i32_90 = arith.constant 96 : i32
    %216 = tpu.dynamic_rotate %213 by %c96_i32_90 dim 1 : vector<8x128xf32>, i32 -> vector<8x128xf32>
    %217 = arith.mulf %216, %167 : vector<8x128xf32>
    %218 = arith.addf %217, %215 : vector<8x128xf32>
    %c32_i32_91 = arith.constant 32 : i32
    %219 = tpu.dynamic_rotate %213 by %c32_i32_91 dim 1 : vector<8x128xf32>, i32 -> vector<8x128xf32>
    %220 = math.tanh %218 : vector<8x128xf32>
    %221 = arith.mulf %219, %220 : vector<8x128xf32>
    %222 = arith.index_cast %c3_i32 : i32 to index
    %c0_92 = arith.constant 0 : index
    %c0_93 = arith.constant 0 : index
    %223 = vector.load %arg8[%222, %c0_92, %c0_93] : memref<8x8x128xf32, #tpu.memory_space<vmem>>, vector<1x8x128xf32>
    %224 = vector.shape_cast %223 : vector<1x8x128xf32> to vector<8x128xf32>
    %225 = vector.shape_cast %200 : vector<8x128xf32> to vector<1x8x128xf32>
    tpu.vector_store %arg8[%222, %c0_92, %c0_93], %225 {strides = array<i32>} : memref<8x8x128xf32, #tpu.memory_space<vmem>>, vector<1x8x128xf32>,
    %226 = arith.index_cast %179 : i32 to index
    %c0_94 = arith.constant 0 : index
    %c0_95 = arith.constant 0 : index
    %227 = vector.load %arg11[%226, %c0_94, %c0_95] : memref<8x8x128xf32, #tpu.memory_space<vmem>>, vector<1x8x128xf32>
    %228 = vector.shape_cast %227 : vector<1x8x128xf32> to vector<8x128xf32>
    %229 = vector.shape_cast %221 : vector<8x128xf32> to vector<1x8x128xf32>
    tpu.vector_store %arg11[%226, %c0_94, %c0_95], %229 {strides = array<i32>} : memref<8x8x128xf32, #tpu.memory_space<vmem>>, vector<1x8x128xf32>,
    %c4_i32 = arith.constant 4 : i32
    %c7_i32_96 = arith.constant 7 : i32
    %230 = arith.subi %c7_i32_96, %c4_i32 : i32
    %231 = arith.index_cast %c4_i32 : i32 to index
    %c0_97 = arith.constant 0 : index
    %c0_98 = arith.constant 0 : index
    %232 = vector.load %arg9[%231, %c0_97, %c0_98] : memref<8x8x128xf32, #tpu.memory_space<vmem>>, vector<1x8x128xf32>
    %233 = vector.shape_cast %232 : vector<1x8x128xf32> to vector<8x128xf32>
    %234 = arith.truncf %200 : vector<8x128xf32> to vector<8x128xbf16>
    %cst_99 = arith.constant dense<0.000000e+00> : vector<8x128xf32>
    %235 = tpu.matmul %234, %23, %cst_99 {dimension_numbers = #tpu.dot_dimension_numbers<[1], [0], [0], [1], [0, 0, 1, 1], [], []>} : vector<8x128xbf16>, vector<128x128xbf16>, vector<8x128xf32> -> vector<8x128xf32>
    %236 = arith.addf %233, %235 : vector<8x128xf32>
    %237 = math.tanh %236 : vector<8x128xf32>
    %238 = arith.negf %236 : vector<8x128xf32>
    %239 = math.exp %238 : vector<8x128xf32>
    %cst_100 = arith.constant 1.000000e+00 : f32
    %240 = vector.broadcast %cst_100 : f32 to vector<8x128xf32>
    %241 = arith.addf %240, %239 : vector<8x128xf32>
    %242 = arith.divf %240, %241 : vector<8x128xf32>
    %243 = arith.select %22, %237, %242 : vector<8x128xi1>, vector<8x128xf32>
    %c64_i32_101 = arith.constant 64 : i32
    %244 = tpu.dynamic_rotate %243 by %c64_i32_101 dim 1 : vector<8x128xf32>, i32 -> vector<8x128xf32>
    %245 = arith.mulf %243, %244 : vector<8x128xf32>
    %c96_i32_102 = arith.constant 96 : i32
    %246 = tpu.dynamic_rotate %243 by %c96_i32_102 dim 1 : vector<8x128xf32>, i32 -> vector<8x128xf32>
    %247 = arith.mulf %246, %197 : vector<8x128xf32>
    %248 = arith.addf %247, %245 : vector<8x128xf32>
    %c32_i32_103 = arith.constant 32 : i32
    %249 = tpu.dynamic_rotate %243 by %c32_i32_103 dim 1 : vector<8x128xf32>, i32 -> vector<8x128xf32>
    %250 = math.tanh %248 : vector<8x128xf32>
    %251 = arith.mulf %249, %250 : vector<8x128xf32>
    %252 = arith.index_cast %230 : i32 to index
    %c0_104 = arith.constant 0 : index
    %c0_105 = arith.constant 0 : index
    %253 = vector.load %arg10[%252, %c0_104, %c0_105] : memref<8x8x128xf32, #tpu.memory_space<vmem>>, vector<1x8x128xf32>
    %254 = vector.shape_cast %253 : vector<1x8x128xf32> to vector<8x128xf32>
    %255 = arith.truncf %221 : vector<8x128xf32> to vector<8x128xbf16>
    %cst_106 = arith.constant dense<0.000000e+00> : vector<8x128xf32>
    %256 = tpu.matmul %255, %24, %cst_106 {dimension_numbers = #tpu.dot_dimension_numbers<[1], [0], [0], [1], [0, 0, 1, 1], [], []>} : vector<8x128xbf16>, vector<128x128xbf16>, vector<8x128xf32> -> vector<8x128xf32>
    %257 = arith.addf %254, %256 : vector<8x128xf32>
    %258 = math.tanh %257 : vector<8x128xf32>
    %259 = arith.negf %257 : vector<8x128xf32>
    %260 = math.exp %259 : vector<8x128xf32>
    %cst_107 = arith.constant 1.000000e+00 : f32
    %261 = vector.broadcast %cst_107 : f32 to vector<8x128xf32>
    %262 = arith.addf %261, %260 : vector<8x128xf32>
    %263 = arith.divf %261, %262 : vector<8x128xf32>
    %264 = arith.select %22, %258, %263 : vector<8x128xi1>, vector<8x128xf32>
    %c64_i32_108 = arith.constant 64 : i32
    %265 = tpu.dynamic_rotate %264 by %c64_i32_108 dim 1 : vector<8x128xf32>, i32 -> vector<8x128xf32>
    %266 = arith.mulf %264, %265 : vector<8x128xf32>
    %c96_i32_109 = arith.constant 96 : i32
    %267 = tpu.dynamic_rotate %264 by %c96_i32_109 dim 1 : vector<8x128xf32>, i32 -> vector<8x128xf32>
    %268 = arith.mulf %267, %218 : vector<8x128xf32>
    %269 = arith.addf %268, %266 : vector<8x128xf32>
    %c32_i32_110 = arith.constant 32 : i32
    %270 = tpu.dynamic_rotate %264 by %c32_i32_110 dim 1 : vector<8x128xf32>, i32 -> vector<8x128xf32>
    %271 = math.tanh %269 : vector<8x128xf32>
    %272 = arith.mulf %270, %271 : vector<8x128xf32>
    %273 = arith.index_cast %c4_i32 : i32 to index
    %c0_111 = arith.constant 0 : index
    %c0_112 = arith.constant 0 : index
    %274 = vector.load %arg8[%273, %c0_111, %c0_112] : memref<8x8x128xf32, #tpu.memory_space<vmem>>, vector<1x8x128xf32>
    %275 = vector.shape_cast %274 : vector<1x8x128xf32> to vector<8x128xf32>
    %276 = vector.shape_cast %251 : vector<8x128xf32> to vector<1x8x128xf32>
    tpu.vector_store %arg8[%273, %c0_111, %c0_112], %276 {strides = array<i32>} : memref<8x8x128xf32, #tpu.memory_space<vmem>>, vector<1x8x128xf32>,
    %277 = arith.index_cast %230 : i32 to index
    %c0_113 = arith.constant 0 : index
    %c0_114 = arith.constant 0 : index
    %278 = vector.load %arg11[%277, %c0_113, %c0_114] : memref<8x8x128xf32, #tpu.memory_space<vmem>>, vector<1x8x128xf32>
    %279 = vector.shape_cast %278 : vector<1x8x128xf32> to vector<8x128xf32>
    %280 = vector.shape_cast %272 : vector<8x128xf32> to vector<1x8x128xf32>
    tpu.vector_store %arg11[%277, %c0_113, %c0_114], %280 {strides = array<i32>} : memref<8x8x128xf32, #tpu.memory_space<vmem>>, vector<1x8x128xf32>,
    %c5_i32 = arith.constant 5 : i32
    %c7_i32_115 = arith.constant 7 : i32
    %281 = arith.subi %c7_i32_115, %c5_i32 : i32
    %282 = arith.index_cast %c5_i32 : i32 to index
    %c0_116 = arith.constant 0 : index
    %c0_117 = arith.constant 0 : index
    %283 = vector.load %arg9[%282, %c0_116, %c0_117] : memref<8x8x128xf32, #tpu.memory_space<vmem>>, vector<1x8x128xf32>
    %284 = vector.shape_cast %283 : vector<1x8x128xf32> to vector<8x128xf32>
    %285 = arith.truncf %251 : vector<8x128xf32> to vector<8x128xbf16>
    %cst_118 = arith.constant dense<0.000000e+00> : vector<8x128xf32>
    %286 = tpu.matmul %285, %23, %cst_118 {dimension_numbers = #tpu.dot_dimension_numbers<[1], [0], [0], [1], [0, 0, 1, 1], [], []>} : vector<8x128xbf16>, vector<128x128xbf16>, vector<8x128xf32> -> vector<8x128xf32>
    %287 = arith.addf %284, %286 : vector<8x128xf32>
    %288 = math.tanh %287 : vector<8x128xf32>
    %289 = arith.negf %287 : vector<8x128xf32>
    %290 = math.exp %289 : vector<8x128xf32>
    %cst_119 = arith.constant 1.000000e+00 : f32
    %291 = vector.broadcast %cst_119 : f32 to vector<8x128xf32>
    %292 = arith.addf %291, %290 : vector<8x128xf32>
    %293 = arith.divf %291, %292 : vector<8x128xf32>
    %294 = arith.select %22, %288, %293 : vector<8x128xi1>, vector<8x128xf32>
    %c64_i32_120 = arith.constant 64 : i32
    %295 = tpu.dynamic_rotate %294 by %c64_i32_120 dim 1 : vector<8x128xf32>, i32 -> vector<8x128xf32>
    %296 = arith.mulf %294, %295 : vector<8x128xf32>
    %c96_i32_121 = arith.constant 96 : i32
    %297 = tpu.dynamic_rotate %294 by %c96_i32_121 dim 1 : vector<8x128xf32>, i32 -> vector<8x128xf32>
    %298 = arith.mulf %297, %248 : vector<8x128xf32>
    %299 = arith.addf %298, %296 : vector<8x128xf32>
    %c32_i32_122 = arith.constant 32 : i32
    %300 = tpu.dynamic_rotate %294 by %c32_i32_122 dim 1 : vector<8x128xf32>, i32 -> vector<8x128xf32>
    %301 = math.tanh %299 : vector<8x128xf32>
    %302 = arith.mulf %300, %301 : vector<8x128xf32>
    %303 = arith.index_cast %281 : i32 to index
    %c0_123 = arith.constant 0 : index
    %c0_124 = arith.constant 0 : index
    %304 = vector.load %arg10[%303, %c0_123, %c0_124] : memref<8x8x128xf32, #tpu.memory_space<vmem>>, vector<1x8x128xf32>
    %305 = vector.shape_cast %304 : vector<1x8x128xf32> to vector<8x128xf32>
    %306 = arith.truncf %272 : vector<8x128xf32> to vector<8x128xbf16>
    %cst_125 = arith.constant dense<0.000000e+00> : vector<8x128xf32>
    %307 = tpu.matmul %306, %24, %cst_125 {dimension_numbers = #tpu.dot_dimension_numbers<[1], [0], [0], [1], [0, 0, 1, 1], [], []>} : vector<8x128xbf16>, vector<128x128xbf16>, vector<8x128xf32> -> vector<8x128xf32>
    %308 = arith.addf %305, %307 : vector<8x128xf32>
    %309 = math.tanh %308 : vector<8x128xf32>
    %310 = arith.negf %308 : vector<8x128xf32>
    %311 = math.exp %310 : vector<8x128xf32>
    %cst_126 = arith.constant 1.000000e+00 : f32
    %312 = vector.broadcast %cst_126 : f32 to vector<8x128xf32>
    %313 = arith.addf %312, %311 : vector<8x128xf32>
    %314 = arith.divf %312, %313 : vector<8x128xf32>
    %315 = arith.select %22, %309, %314 : vector<8x128xi1>, vector<8x128xf32>
    %c64_i32_127 = arith.constant 64 : i32
    %316 = tpu.dynamic_rotate %315 by %c64_i32_127 dim 1 : vector<8x128xf32>, i32 -> vector<8x128xf32>
    %317 = arith.mulf %315, %316 : vector<8x128xf32>
    %c96_i32_128 = arith.constant 96 : i32
    %318 = tpu.dynamic_rotate %315 by %c96_i32_128 dim 1 : vector<8x128xf32>, i32 -> vector<8x128xf32>
    %319 = arith.mulf %318, %269 : vector<8x128xf32>
    %320 = arith.addf %319, %317 : vector<8x128xf32>
    %c32_i32_129 = arith.constant 32 : i32
    %321 = tpu.dynamic_rotate %315 by %c32_i32_129 dim 1 : vector<8x128xf32>, i32 -> vector<8x128xf32>
    %322 = math.tanh %320 : vector<8x128xf32>
    %323 = arith.mulf %321, %322 : vector<8x128xf32>
    %324 = arith.index_cast %c5_i32 : i32 to index
    %c0_130 = arith.constant 0 : index
    %c0_131 = arith.constant 0 : index
    %325 = vector.load %arg8[%324, %c0_130, %c0_131] : memref<8x8x128xf32, #tpu.memory_space<vmem>>, vector<1x8x128xf32>
    %326 = vector.shape_cast %325 : vector<1x8x128xf32> to vector<8x128xf32>
    %327 = vector.shape_cast %302 : vector<8x128xf32> to vector<1x8x128xf32>
    tpu.vector_store %arg8[%324, %c0_130, %c0_131], %327 {strides = array<i32>} : memref<8x8x128xf32, #tpu.memory_space<vmem>>, vector<1x8x128xf32>,
    %328 = arith.index_cast %281 : i32 to index
    %c0_132 = arith.constant 0 : index
    %c0_133 = arith.constant 0 : index
    %329 = vector.load %arg11[%328, %c0_132, %c0_133] : memref<8x8x128xf32, #tpu.memory_space<vmem>>, vector<1x8x128xf32>
    %330 = vector.shape_cast %329 : vector<1x8x128xf32> to vector<8x128xf32>
    %331 = vector.shape_cast %323 : vector<8x128xf32> to vector<1x8x128xf32>
    tpu.vector_store %arg11[%328, %c0_132, %c0_133], %331 {strides = array<i32>} : memref<8x8x128xf32, #tpu.memory_space<vmem>>, vector<1x8x128xf32>,
    %c6_i32 = arith.constant 6 : i32
    %c7_i32_134 = arith.constant 7 : i32
    %332 = arith.subi %c7_i32_134, %c6_i32 : i32
    %333 = arith.index_cast %c6_i32 : i32 to index
    %c0_135 = arith.constant 0 : index
    %c0_136 = arith.constant 0 : index
    %334 = vector.load %arg9[%333, %c0_135, %c0_136] : memref<8x8x128xf32, #tpu.memory_space<vmem>>, vector<1x8x128xf32>
    %335 = vector.shape_cast %334 : vector<1x8x128xf32> to vector<8x128xf32>
    %336 = arith.truncf %302 : vector<8x128xf32> to vector<8x128xbf16>
    %cst_137 = arith.constant dense<0.000000e+00> : vector<8x128xf32>
    %337 = tpu.matmul %336, %23, %cst_137 {dimension_numbers = #tpu.dot_dimension_numbers<[1], [0], [0], [1], [0, 0, 1, 1], [], []>} : vector<8x128xbf16>, vector<128x128xbf16>, vector<8x128xf32> -> vector<8x128xf32>
    %338 = arith.addf %335, %337 : vector<8x128xf32>
    %339 = math.tanh %338 : vector<8x128xf32>
    %340 = arith.negf %338 : vector<8x128xf32>
    %341 = math.exp %340 : vector<8x128xf32>
    %cst_138 = arith.constant 1.000000e+00 : f32
    %342 = vector.broadcast %cst_138 : f32 to vector<8x128xf32>
    %343 = arith.addf %342, %341 : vector<8x128xf32>
    %344 = arith.divf %342, %343 : vector<8x128xf32>
    %345 = arith.select %22, %339, %344 : vector<8x128xi1>, vector<8x128xf32>
    %c64_i32_139 = arith.constant 64 : i32
    %346 = tpu.dynamic_rotate %345 by %c64_i32_139 dim 1 : vector<8x128xf32>, i32 -> vector<8x128xf32>
    %347 = arith.mulf %345, %346 : vector<8x128xf32>
    %c96_i32_140 = arith.constant 96 : i32
    %348 = tpu.dynamic_rotate %345 by %c96_i32_140 dim 1 : vector<8x128xf32>, i32 -> vector<8x128xf32>
    %349 = arith.mulf %348, %299 : vector<8x128xf32>
    %350 = arith.addf %349, %347 : vector<8x128xf32>
    %c32_i32_141 = arith.constant 32 : i32
    %351 = tpu.dynamic_rotate %345 by %c32_i32_141 dim 1 : vector<8x128xf32>, i32 -> vector<8x128xf32>
    %352 = math.tanh %350 : vector<8x128xf32>
    %353 = arith.mulf %351, %352 : vector<8x128xf32>
    %354 = arith.index_cast %332 : i32 to index
    %c0_142 = arith.constant 0 : index
    %c0_143 = arith.constant 0 : index
    %355 = vector.load %arg10[%354, %c0_142, %c0_143] : memref<8x8x128xf32, #tpu.memory_space<vmem>>, vector<1x8x128xf32>
    %356 = vector.shape_cast %355 : vector<1x8x128xf32> to vector<8x128xf32>
    %357 = arith.truncf %323 : vector<8x128xf32> to vector<8x128xbf16>
    %cst_144 = arith.constant dense<0.000000e+00> : vector<8x128xf32>
    %358 = tpu.matmul %357, %24, %cst_144 {dimension_numbers = #tpu.dot_dimension_numbers<[1], [0], [0], [1], [0, 0, 1, 1], [], []>} : vector<8x128xbf16>, vector<128x128xbf16>, vector<8x128xf32> -> vector<8x128xf32>
    %359 = arith.addf %356, %358 : vector<8x128xf32>
    %360 = math.tanh %359 : vector<8x128xf32>
    %361 = arith.negf %359 : vector<8x128xf32>
    %362 = math.exp %361 : vector<8x128xf32>
    %cst_145 = arith.constant 1.000000e+00 : f32
    %363 = vector.broadcast %cst_145 : f32 to vector<8x128xf32>
    %364 = arith.addf %363, %362 : vector<8x128xf32>
    %365 = arith.divf %363, %364 : vector<8x128xf32>
    %366 = arith.select %22, %360, %365 : vector<8x128xi1>, vector<8x128xf32>
    %c64_i32_146 = arith.constant 64 : i32
    %367 = tpu.dynamic_rotate %366 by %c64_i32_146 dim 1 : vector<8x128xf32>, i32 -> vector<8x128xf32>
    %368 = arith.mulf %366, %367 : vector<8x128xf32>
    %c96_i32_147 = arith.constant 96 : i32
    %369 = tpu.dynamic_rotate %366 by %c96_i32_147 dim 1 : vector<8x128xf32>, i32 -> vector<8x128xf32>
    %370 = arith.mulf %369, %320 : vector<8x128xf32>
    %371 = arith.addf %370, %368 : vector<8x128xf32>
    %c32_i32_148 = arith.constant 32 : i32
    %372 = tpu.dynamic_rotate %366 by %c32_i32_148 dim 1 : vector<8x128xf32>, i32 -> vector<8x128xf32>
    %373 = math.tanh %371 : vector<8x128xf32>
    %374 = arith.mulf %372, %373 : vector<8x128xf32>
    %375 = arith.index_cast %c6_i32 : i32 to index
    %c0_149 = arith.constant 0 : index
    %c0_150 = arith.constant 0 : index
    %376 = vector.load %arg8[%375, %c0_149, %c0_150] : memref<8x8x128xf32, #tpu.memory_space<vmem>>, vector<1x8x128xf32>
    %377 = vector.shape_cast %376 : vector<1x8x128xf32> to vector<8x128xf32>
    %378 = vector.shape_cast %353 : vector<8x128xf32> to vector<1x8x128xf32>
    tpu.vector_store %arg8[%375, %c0_149, %c0_150], %378 {strides = array<i32>} : memref<8x8x128xf32, #tpu.memory_space<vmem>>, vector<1x8x128xf32>,
    %379 = arith.index_cast %332 : i32 to index
    %c0_151 = arith.constant 0 : index
    %c0_152 = arith.constant 0 : index
    %380 = vector.load %arg11[%379, %c0_151, %c0_152] : memref<8x8x128xf32, #tpu.memory_space<vmem>>, vector<1x8x128xf32>
    %381 = vector.shape_cast %380 : vector<1x8x128xf32> to vector<8x128xf32>
    %382 = vector.shape_cast %374 : vector<8x128xf32> to vector<1x8x128xf32>
    tpu.vector_store %arg11[%379, %c0_151, %c0_152], %382 {strides = array<i32>} : memref<8x8x128xf32, #tpu.memory_space<vmem>>, vector<1x8x128xf32>,
    %c7_i32_153 = arith.constant 7 : i32
    %c7_i32_154 = arith.constant 7 : i32
    %383 = arith.subi %c7_i32_154, %c7_i32_153 : i32
    %384 = arith.index_cast %c7_i32_153 : i32 to index
    %c0_155 = arith.constant 0 : index
    %c0_156 = arith.constant 0 : index
    %385 = vector.load %arg9[%384, %c0_155, %c0_156] : memref<8x8x128xf32, #tpu.memory_space<vmem>>, vector<1x8x128xf32>
    %386 = vector.shape_cast %385 : vector<1x8x128xf32> to vector<8x128xf32>
    %387 = arith.truncf %353 : vector<8x128xf32> to vector<8x128xbf16>
    %cst_157 = arith.constant dense<0.000000e+00> : vector<8x128xf32>
    %388 = tpu.matmul %387, %23, %cst_157 {dimension_numbers = #tpu.dot_dimension_numbers<[1], [0], [0], [1], [0, 0, 1, 1], [], []>} : vector<8x128xbf16>, vector<128x128xbf16>, vector<8x128xf32> -> vector<8x128xf32>
    %389 = arith.addf %386, %388 : vector<8x128xf32>
    %390 = math.tanh %389 : vector<8x128xf32>
    %391 = arith.negf %389 : vector<8x128xf32>
    %392 = math.exp %391 : vector<8x128xf32>
    %cst_158 = arith.constant 1.000000e+00 : f32
    %393 = vector.broadcast %cst_158 : f32 to vector<8x128xf32>
    %394 = arith.addf %393, %392 : vector<8x128xf32>
    %395 = arith.divf %393, %394 : vector<8x128xf32>
    %396 = arith.select %22, %390, %395 : vector<8x128xi1>, vector<8x128xf32>
    %c64_i32_159 = arith.constant 64 : i32
    %397 = tpu.dynamic_rotate %396 by %c64_i32_159 dim 1 : vector<8x128xf32>, i32 -> vector<8x128xf32>
    %398 = arith.mulf %396, %397 : vector<8x128xf32>
    %c96_i32_160 = arith.constant 96 : i32
    %399 = tpu.dynamic_rotate %396 by %c96_i32_160 dim 1 : vector<8x128xf32>, i32 -> vector<8x128xf32>
    %400 = arith.mulf %399, %350 : vector<8x128xf32>
    %401 = arith.addf %400, %398 : vector<8x128xf32>
    %c32_i32_161 = arith.constant 32 : i32
    %402 = tpu.dynamic_rotate %396 by %c32_i32_161 dim 1 : vector<8x128xf32>, i32 -> vector<8x128xf32>
    %403 = math.tanh %401 : vector<8x128xf32>
    %404 = arith.mulf %402, %403 : vector<8x128xf32>
    %405 = arith.index_cast %383 : i32 to index
    %c0_162 = arith.constant 0 : index
    %c0_163 = arith.constant 0 : index
    %406 = vector.load %arg10[%405, %c0_162, %c0_163] : memref<8x8x128xf32, #tpu.memory_space<vmem>>, vector<1x8x128xf32>
    %407 = vector.shape_cast %406 : vector<1x8x128xf32> to vector<8x128xf32>
    %408 = arith.truncf %374 : vector<8x128xf32> to vector<8x128xbf16>
    %cst_164 = arith.constant dense<0.000000e+00> : vector<8x128xf32>
    %409 = tpu.matmul %408, %24, %cst_164 {dimension_numbers = #tpu.dot_dimension_numbers<[1], [0], [0], [1], [0, 0, 1, 1], [], []>} : vector<8x128xbf16>, vector<128x128xbf16>, vector<8x128xf32> -> vector<8x128xf32>
    %410 = arith.addf %407, %409 : vector<8x128xf32>
    %411 = math.tanh %410 : vector<8x128xf32>
    %412 = arith.negf %410 : vector<8x128xf32>
    %413 = math.exp %412 : vector<8x128xf32>
    %cst_165 = arith.constant 1.000000e+00 : f32
    %414 = vector.broadcast %cst_165 : f32 to vector<8x128xf32>
    %415 = arith.addf %414, %413 : vector<8x128xf32>
    %416 = arith.divf %414, %415 : vector<8x128xf32>
    %417 = arith.select %22, %411, %416 : vector<8x128xi1>, vector<8x128xf32>
    %c64_i32_166 = arith.constant 64 : i32
    %418 = tpu.dynamic_rotate %417 by %c64_i32_166 dim 1 : vector<8x128xf32>, i32 -> vector<8x128xf32>
    %419 = arith.mulf %417, %418 : vector<8x128xf32>
    %c96_i32_167 = arith.constant 96 : i32
    %420 = tpu.dynamic_rotate %417 by %c96_i32_167 dim 1 : vector<8x128xf32>, i32 -> vector<8x128xf32>
    %421 = arith.mulf %420, %371 : vector<8x128xf32>
    %422 = arith.addf %421, %419 : vector<8x128xf32>
    %c32_i32_168 = arith.constant 32 : i32
    %423 = tpu.dynamic_rotate %417 by %c32_i32_168 dim 1 : vector<8x128xf32>, i32 -> vector<8x128xf32>
    %424 = math.tanh %422 : vector<8x128xf32>
    %425 = arith.mulf %423, %424 : vector<8x128xf32>
    %426 = arith.index_cast %c7_i32_153 : i32 to index
    %c0_169 = arith.constant 0 : index
    %c0_170 = arith.constant 0 : index
    %427 = vector.load %arg8[%426, %c0_169, %c0_170] : memref<8x8x128xf32, #tpu.memory_space<vmem>>, vector<1x8x128xf32>
    %428 = vector.shape_cast %427 : vector<1x8x128xf32> to vector<8x128xf32>
    %429 = vector.shape_cast %404 : vector<8x128xf32> to vector<1x8x128xf32>
    tpu.vector_store %arg8[%426, %c0_169, %c0_170], %429 {strides = array<i32>} : memref<8x8x128xf32, #tpu.memory_space<vmem>>, vector<1x8x128xf32>,
    %430 = arith.index_cast %383 : i32 to index
    %c0_171 = arith.constant 0 : index
    %c0_172 = arith.constant 0 : index
    %431 = vector.load %arg11[%430, %c0_171, %c0_172] : memref<8x8x128xf32, #tpu.memory_space<vmem>>, vector<1x8x128xf32>
    %432 = vector.shape_cast %431 : vector<1x8x128xf32> to vector<8x128xf32>
    %433 = vector.shape_cast %425 : vector<8x128xf32> to vector<1x8x128xf32>
    tpu.vector_store %arg11[%430, %c0_171, %c0_172], %433 {strides = array<i32>} : memref<8x8x128xf32, #tpu.memory_space<vmem>>, vector<1x8x128xf32>,
    %c8_i32 = arith.constant 8 : i32
    %434 = tpu.iota {dimensions = array<i32: 1>} : vector<64x128xi32>
    %c0_173 = arith.constant 0 : index
    %c0_174 = arith.constant 0 : index
    %c0_175 = arith.constant 0 : index
    %435 = vector.load %arg8[%c0_173, %c0_174, %c0_175] : memref<8x8x128xf32, #tpu.memory_space<vmem>>, vector<8x8x128xf32>
    %436 = vector.shape_cast %435 : vector<8x8x128xf32> to vector<64x128xf32>
    %c0_176 = arith.constant 0 : index
    %c0_177 = arith.constant 0 : index
    %c0_178 = arith.constant 0 : index
    %437 = vector.load %arg11[%c0_176, %c0_177, %c0_178] : memref<8x8x128xf32, #tpu.memory_space<vmem>>, vector<8x8x128xf32>
    %438 = vector.shape_cast %437 : vector<8x8x128xf32> to vector<64x128xf32>
    %c32_i32_179 = arith.constant 32 : i32
    %439 = tpu.dynamic_rotate %438 by %c32_i32_179 dim 1 : vector<64x128xf32>, i32 -> vector<64x128xf32>
    %c32_i32_180 = arith.constant 32 : i32
    %440 = vector.broadcast %c32_i32_180 : i32 to vector<64x128xi32>
    %441 = arith.cmpi slt, %434, %440 : vector<64x128xi32>
    %c64_i32_181 = arith.constant 64 : i32
    %442 = vector.broadcast %c64_i32_181 : i32 to vector<64x128xi32>
    %443 = arith.cmpi slt, %434, %442 : vector<64x128xi32>
    %cst_182 = arith.constant 0.000000e+00 : f32
    %444 = vector.broadcast %cst_182 : f32 to vector<64x128xf32>
    %445 = arith.select %443, %439, %444 : vector<64x128xi1>, vector<64x128xf32>
    %446 = arith.select %441, %436, %445 : vector<64x128xi1>, vector<64x128xf32>
    %447 = vector.shape_cast %446 : vector<64x128xf32> to vector<8x8x128xf32>
    %c0_183 = arith.constant 0 : index
    %c0_184 = arith.constant 0 : index
    %c0_185 = arith.constant 0 : index
    %448 = vector.load %arg8[%c0_183, %c0_184, %c0_185] : memref<8x8x128xf32, #tpu.memory_space<vmem>>, vector<8x8x128xf32>
    tpu.vector_store %arg8[%c0_183, %c0_184, %c0_185], %447 {strides = array<i32>} : memref<8x8x128xf32, #tpu.memory_space<vmem>>, vector<8x8x128xf32>,
    return
  }
  func.func @transform_0(%arg0: i32) -> (i32, i32, i32) {
    %c0_i32 = arith.constant 0 : i32
    %c0_i32_0 = arith.constant 0 : i32
    %c0_i32_1 = arith.constant 0 : i32
    %c0_i32_2 = arith.constant 0 : i32
    return %c0_i32, %c0_i32_0, %c0_i32_1 : i32, i32, i32
  }
  func.func @transform_1(%arg0: i32) -> (i32, i32) {
    %c0_i32 = arith.constant 0 : i32
    %c0_i32_0 = arith.constant 0 : i32
    %c0_i32_1 = arith.constant 0 : i32
    return %c0_i32, %c0_i32_0 : i32, i32
  }
  func.func @transform_2(%arg0: i32) -> (i32, i32) {
    %c0_i32 = arith.constant 0 : i32
    %c0_i32_0 = arith.constant 0 : i32
    %c0_i32_1 = arith.constant 0 : i32
    return %c0_i32, %c0_i32_0 : i32, i32
  }
  func.func @transform_3(%arg0: i32) -> (i32, i32) {
    %c0_i32 = arith.constant 0 : i32
    %c0_i32_0 = arith.constant 0 : i32
    %c0_i32_1 = arith.constant 0 : i32
    return %c0_i32, %c0_i32_0 : i32, i32
  }
  func.func @transform_4(%arg0: i32) -> (i32, i32) {
    %c0_i32 = arith.constant 0 : i32
    %c0_i32_0 = arith.constant 0 : i32
    %c0_i32_1 = arith.constant 0 : i32
    return %c0_i32, %c0_i32_0 : i32, i32
  }
  func.func @transform_5(%arg0: i32) -> (i32, i32) {
    %c0_i32 = arith.constant 0 : i32
    %c0_i32_0 = arith.constant 0 : i32
    %c0_i32_1 = arith.constant 0 : i32
    return %c0_i32, %c0_i32_0 : i32, i32
  }
  func.func @transform_6(%arg0: i32) -> (i32, i32) {
    %c0_i32 = arith.constant 0 : i32
    %c0_i32_0 = arith.constant 0 : i32
    %c0_i32_1 = arith.constant 0 : i32
    return %c0_i32, %c0_i32_0 : i32, i32
  }
  func.func @transform_7(%arg0: i32) -> (i32, i32, i32) {
    %c0_i32 = arith.constant 0 : i32
    %c0_i32_0 = arith.constant 0 : i32
    %c0_i32_1 = arith.constant 0 : i32
    %c0_i32_2 = arith.constant 0 : i32
    return %c0_i32, %c0_i32_0, %c0_i32_1 : i32, i32, i32
  }
}

</mosaic_0001>

<bundles_post_ra>
// kernel: word_lstm_forward.5
= control target key start
LH: loop header
LB: loop body
LE: loop exit
PB: predicated region body
PF: predicated region fallthrough
CT: control target
= control target key end

     0   :  { %10 = vsyncpa [#allocation3], 0  ;;  %s652_s0 = inlined_call_operand.vmem [shape: f32[64,128], index: 0, kind: input, shape index: {}]   ;;  %s653_s1 = inlined_call_operand.hbm [shape: bf16[128,128], index: 1, kind: input, shape index: {}]   ;;  %s654_s2 = inlined_call_operand.vmem [shape: f32[1,128], index: 2, kind: input, shape index: {}]   ;;  %s655_s3 = inlined_call_operand.hbm [shape: bf16[128,128], index: 3, kind: input, shape index: {}]   ;;  %s656_s4 = inlined_call_operand.vmem [shape: f32[1,128], index: 4, kind: input, shape index: {}]   ;;  %s657_s5 = inlined_call_operand.vmem [shape: f32[64,128], index: 5, kind: output, shape index: {}]  }
   0x1   :  { %s18_s20 = sshll.u32 %s653_s1, 4  ;;  %s19_s20 = int_to_ptr.hbm [resolvable:$true] %s18_s20 }
   0x2   :  { %11 = vsyncpa [#allocation5], 0  ;;  %s550_s21 = smov [#allocation2]   ;;  %s33_s25 = sshll.u32 %s655_s3, 4  ;;  %s34_s25 = int_to_ptr.hbm [resolvable:$true] %s33_s25 }
   0x3   :  { %s20_s22 = sshll.u32 %s550_s21, 4  ;;  %s551_s26 = smov 64   ;;  %s21_s22 = int_to_ptr.vmem [resolvable:$true] %s20_s22 }
   0x4   :  { %s552_s27 = smov 4   ;;  %s553_s28 = smov [#allocation4]  }
   0x5   :  { %26 = dma.hbm_to_vmem [thread:$0]  %s19_s20, 1024, %s21_s22, [#allocation3], %s551_s26, %s551_s26, %s552_s27  }
   0x6   :  { %s35_s29 = sshll.u32 %s553_s28, 4  ;;  %s36_s29 = int_to_ptr.vmem [resolvable:$true] %s35_s29 }
   0x7   :  { %41 = dma.hbm_to_vmem [thread:$0]  %s34_s25, 1024, %s36_s29, [#allocation5], %s551_s26, %s551_s26, %s552_s27  }
   0x8   :  { %546 = dma.done.wait [#allocation3], 1024  }
   0x9   :  { %547 = vsyncadd [#allocation3], 4294966272 }
   0xa   :  { %548 = dma.done.wait [#allocation5], 1024  }
   0xb   :  { %549 = vsyncadd [#allocation5], 4294966272  ;;  %v435_v0 = vld [vmem:[#allocation2 + $0x38] sm:$0xff]  ;;  %v434_v1 = vld [vmem:[#allocation2 + $0x30] sm:$0xff] }
   0xc   :  { %132 = vmatpush.bf16.msra.mxu0 %v435_v0  ;;  %444 = vmatpush.bf16.msra.mxu2 %v435_v0  ;;  %v433_v2 = vld [vmem:[#allocation2 + $0x28] sm:$0xff]  ;;  %v432_v3 = vld [vmem:[#allocation2 + $0x20] sm:$0xff]  ;;  %v431_v4 = vld [vmem:[#allocation2 + $0x18] sm:$0xff] }
   0xd   :  { %v443_v5 = vld [vmem:[#allocation4 + $0x38] sm:$0xff]  ;;  %v430_v6 = vld [vmem:[#allocation2 + $0x10] sm:$0xff]  ;;  %v429_v8 = vld [vmem:[#allocation2 + $0x8] sm:$0xff] }
   0xe   :  { %241 = vmatpush.bf16.msra.mxu1 %v443_v5  ;;  %v442_v7 = vld [vmem:[#allocation4 + $0x30] sm:$0xff]  ;;  %452 = vmatpush.bf16.msra.mxu3 %v443_v5  ;;  %v441_v9 = vld [vmem:[#allocation4 + $0x28] sm:$0xff]  ;;  %v428_v10 = vld [vmem:[#allocation2] sm:$0xff] }
   0xf   :  { %v52_v11 = vld [vmem:[%s652_s0] sm:$0xff]  ;;  %v53_v12 = vld [vmem:[%s652_s0 + $0x8] sm:$0xff]  ;;  %v54_v18 = vld [vmem:[%s652_s0 + $0x10] sm:$0xff] }
  0x10   :  { %133 = vmatpush.bf16.msra.mxu0 %v434_v1  ;;  %445 = vmatpush.bf16.msra.mxu2 %v434_v1  ;;  %v56_v13 = vld [vmem:[%s652_s0 + $0x20] sm:$0xff]  ;;  %v57_v14 = vld [vmem:[%s652_s0 + $0x28] sm:$0xff]  ;;  %v60_v16 = vpack.c.bf16 %v53_v12, %v52_v11  ;;  %v55_v19 = vld [vmem:[%s652_s0 + $0x18] sm:$0xff] }
  0x11   :  { %v440_v15 = vld [vmem:[#allocation4 + $0x20] sm:$0xff]  ;;  %v62_v17 = vpack.c.bf16 %v57_v14, %v56_v13  ;;  %v58_v20 = vld [vmem:[%s652_s0 + $0x30] sm:$0xff]  ;;  %v59_v21 = vld [vmem:[%s652_s0 + $0x38] sm:$0xff]  ;;  %v61_v22 = vpack.c.bf16 %v55_v19, %v54_v18 }
  0x12   :  { %242 = vmatpush.bf16.msra.mxu1 %v442_v7  ;;  %453 = vmatpush.bf16.msra.mxu3 %v442_v7  ;;  %v63_v23 = vpack.c.bf16 %v59_v21, %v58_v20  ;;  %v439_v24 = vld [vmem:[#allocation4 + $0x18] sm:$0xff]  ;;  %v438_v25 = vld [vmem:[#allocation4 + $0x10] sm:$0xff]  ;;  %v437_v26 = vld [vmem:[#allocation4 + $0x8] sm:$0xff] }
  0x13   :  { %v436_v27 = vld [vmem:[#allocation4] sm:$0xff] }
  0x14   :  { %134 = vmatpush.bf16.msra.mxu0 %v433_v2  ;;  %446 = vmatpush.bf16.msra.mxu2 %v433_v2  ;;  %v464_v29 = vld [vmem:[%s654_s2] ss:$0 sm:$0xff] }
  0x15   :  { %v465_v57 = vld [vmem:[%s656_s4] ss:$0 sm:$0xff] }
  0x16   :  { %243 = vmatpush.bf16.msra.mxu1 %v441_v9  ;;  %454 = vmatpush.bf16.msra.mxu3 %v441_v9 }
  0x18   :  { %135 = vmatpush.bf16.msra.mxu0 %v432_v3  ;;  %447 = vmatpush.bf16.msra.mxu2 %v432_v3 }
  0x1a   :  { %244 = vmatpush.bf16.msra.mxu1 %v440_v15  ;;  %455 = vmatpush.bf16.msra.mxu3 %v440_v15 }
  0x1c   :  { %136 = vmatpush.bf16.msra.mxu0 %v431_v4  ;;  %448 = vmatpush.bf16.msra.mxu2 %v431_v4 }
  0x1e   :  { %245 = vmatpush.bf16.msra.mxu1 %v439_v24  ;;  %456 = vmatpush.bf16.msra.mxu3 %v439_v24 }
  0x20   :  { %137 = vmatpush.bf16.msra.mxu0 %v430_v6  ;;  %449 = vmatpush.bf16.msra.mxu2 %v430_v6 }
  0x22   :  { %246 = vmatpush.bf16.msra.mxu1 %v438_v25  ;;  %457 = vmatpush.bf16.msra.mxu3 %v438_v25 }
  0x24   :  { %138 = vmatpush.bf16.msra.mxu0 %v429_v8  ;;  %450 = vmatpush.bf16.msra.mxu2 %v429_v8 }
  0x26   :  { %247 = vmatpush.bf16.msra.mxu1 %v437_v26  ;;  %458 = vmatpush.bf16.msra.mxu3 %v437_v26 }
  0x28   :  { %139 = vmatpush.bf16.msra.mxu0 %v428_v10  ;;  %451 = vmatpush.bf16.msra.mxu2 %v428_v10 }
  0x2a   :  { %248 = vmatpush.bf16.msra.mxu1 %v436_v27  ;;  %459 = vmatpush.bf16.msra.mxu3 %v436_v27 }
  0x2b   :  { %140 = vmatmul.bf16.vlgmr.msra.gmra.mxu0 %v60_v16  ;;  %150 = vmatmul.bf16.vlgmr.msra.gmra.mxu2 %v62_v17 }
  0x3b   :  { %145 = vmatmul.bf16.gmra.mxu0 %v61_v22  ;;  %155 = vmatmul.bf16.gmra.mxu2 %v63_v23 }
  0xa8   :  { %v141_v28 = vpop.f32.mrf.mxu0 }
  0xa9   :  { %v142_v31 = vadd.f32 %v464_v29, %v141_v28 }
  0xab   :  { %v161_v34 = vmax.f32 %v142_v31, 0.0 }
  0xae   :  { %v151_v30 = vpop.f32.mrf.mxu2 }
  0xaf   :  { %v152_v36 = vadd.f32 %v464_v29, %v151_v30 }
  0xb0   :  { %v143_v32 = vpop.f32.mrf.mxu0 }
  0xb1   :  { %v144_v33 = vadd.f32 %v464_v29, %v143_v32  ;;  %v165_v41 = vmax.f32 %v152_v36, 0.0 }
  0xb3   :  { %v162_v35 = vmax.f32 %v144_v33, 0.0 }
  0xb5   :  { %v169_v37 = vpack.c.bf16 %v162_v35, %v161_v34 }
  0xb6   :  { %v153_v38 = vpop.f32.mrf.mxu2 }
  0xb7   :  { %v154_v39 = vadd.f32 %v464_v29, %v153_v38  ;;  %249 = vmatmul.bf16.vlgmr.msra.gmra.mxu1 %v169_v37 }
  0xb8   :  { %v146_v40 = vpop.f32.mrf.mxu0 }
  0xb9   :  { %v166_v42 = vmax.f32 %v154_v39, 0.0  ;;  %v147_v45 = vadd.f32 %v464_v29, %v146_v40 }
  0xbb   :  { %v171_v43 = vpack.c.bf16 %v166_v42, %v165_v41  ;;  %v163_v48 = vmax.f32 %v147_v45, 0.0 }
  0xbd   :  { %259 = vmatmul.bf16.vlgmr.msra.gmra.mxu3 %v171_v43 }
  0xbe   :  { %v156_v44 = vpop.f32.mrf.mxu2 }
  0xbf   :  { %v157_v50 = vadd.f32 %v464_v29, %v156_v44 }
  0xc0   :  { %v148_v46 = vpop.f32.mrf.mxu0 }
  0xc1   :  { %v149_v47 = vadd.f32 %v464_v29, %v148_v46  ;;  %v167_v54 = vmax.f32 %v157_v50, 0.0 }
  0xc3   :  { %v164_v49 = vmax.f32 %v149_v47, 0.0 }
  0xc5   :  { %v170_v51 = vpack.c.bf16 %v164_v49, %v163_v48 }
  0xc6   :  { %v158_v52 = vpop.f32.mrf.mxu2 }
  0xc7   :  { %v159_v53 = vadd.f32 %v464_v29, %v158_v52  ;;  %254 = vmatmul.bf16.gmra.mxu1 %v170_v51 }
  0xc9   :  { %v168_v55 = vmax.f32 %v159_v53, 0.0 }
  0xcb   :  { %v172_v56 = vpack.c.bf16 %v168_v55, %v167_v54 }
  0xcd   :  { %264 = vmatmul.bf16.gmra.mxu3 %v172_v56 }
 0x134   :  { %v250_v58 = vpop.f32.mrf.mxu1 }
 0x135   :  { %v251_v59 = vadd.f32 %v465_v57, %v250_v58 }
 0x137   :  { %270 = vmax.xlane.f32.xlu0 %v251_v59 }
 0x13c   :  { %v252_v60 = vpop.f32.mrf.mxu1 }
 0x13d   :  { %v253_v61 = vadd.f32 %v465_v57, %v252_v60 }
 0x13f   :  { %272 = vmax.xlane.f32.xlu0 %v253_v61 }
 0x140   :  { %v260_v62 = vpop.f32.mrf.mxu3 }
 0x141   :  { %v261_v63 = vadd.f32 %v465_v57, %v260_v62 }
 0x143   :  { %278 = vmax.xlane.f32.xlu2 %v261_v63 }
 0x144   :  { %v255_v0 = vpop.f32.mrf.mxu1 }
 0x145   :  { %v256_v1 = vadd.f32 %v465_v57, %v255_v0 }
 0x147   :  { %274 = vmax.xlane.f32.xlu1 %v256_v1 }
 0x148   :  { %v262_v2 = vpop.f32.mrf.mxu3 }
 0x149   :  { %v263_v3 = vadd.f32 %v465_v57, %v262_v2 }
 0x14b   :  { %280 = vmax.xlane.f32.xlu2 %v263_v3 }
 0x14c   :  { %v257_v4 = vpop.f32.mrf.mxu1 }
 0x14d   :  { %v258_v5 = vadd.f32 %v465_v57, %v257_v4 }
 0x14f   :  { %276 = vmax.xlane.f32.xlu1 %v258_v5 }
 0x150   :  { %v265_v6 = vpop.f32.mrf.mxu3 }
 0x151   :  { %v266_v7 = vadd.f32 %v465_v57, %v265_v6 }
 0x153   :  { %282 = vmax.xlane.f32.xlu0 %v266_v7 }
 0x158   :  { %v267_v8 = vpop.f32.mrf.mxu3 }
 0x159   :  { %v268_v9 = vadd.f32 %v465_v57, %v267_v8 }
 0x15b   :  { %284 = vmax.xlane.f32.xlu1 %v268_v9 }
 0x1aa   :  { %v271_v10 = vpop.xlane.xlu0 %270 }
 0x1ab   :  { %v286_v11 = vsub.f32 %v251_v59, %v271_v10 }
 0x1ad   :  { %v294_v12 = vmul.f32 1.442695, %v286_v11 }
 0x1af   :  { %466 = vpow2.f32 %v294_v12 }
 0x1b2   :  { %v273_v13 = vpop.xlane.xlu0 %272 }
 0x1b3   :  { %v287_v14 = vsub.f32 %v253_v61, %v273_v13 }
 0x1b5   :  { %v467_v15 = vpop.eup %466  ;;  %v296_v16 = vmul.f32 1.442695, %v287_v14 }
 0x1b6   :  { %v279_v17 = vpop.xlane.xlu2 %278  ;;  %310 = vadd.xlane.f32.xlu2 %v467_v15 }
 0x1b7   :  { %468 = vpow2.f32 %v296_v16  ;;  %v620_v18 = vsub.f32 %v261_v63, %v279_v17 }
 0x1b9   :  { %v302_v19 = vmul.f32 1.442695, %v620_v18 }
 0x1ba   :  { %v275_v20 = vpop.xlane.xlu1 %274 }
 0x1bb   :  { %v288_v21 = vsub.f32 %v256_v1, %v275_v20  ;;  %470 = vpow2.f32 %v302_v19 }
 0x1bd   :  { %v469_v22 = vpop.eup %468  ;;  %v298_v23 = vmul.f32 1.442695, %v288_v21 }
 0x1be   :  { %v281_v24 = vpop.xlane.xlu2 %280  ;;  %312 = vadd.xlane.f32.xlu0 %v469_v22 }
 0x1bf   :  { %472 = vpow2.f32 %v298_v23  ;;  %v623_v25 = vsub.f32 %v263_v3, %v281_v24 }
 0x1c1   :  { %v304_v26 = vmul.f32 1.442695, %v623_v25  ;;  %v471_v29 = vpop.eup %470 }
 0x1c2   :  { %v277_v27 = vpop.xlane.xlu1 %276 }
 0x1c3   :  { %v289_v28 = vsub.f32 %v258_v5, %v277_v27  ;;  %474 = vpow2.f32 %v304_v26 }
 0x1c5   :  { %v473_v30 = vpop.eup %472  ;;  %v300_v31 = vmul.f32 1.442695, %v289_v28 }
 0x1c6   :  { %314 = vadd.xlane.f32.xlu1 %v473_v30  ;;  %318 = vadd.xlane.f32.xlu0 %v471_v29  ;;  %v283_v32 = vpop.xlane.xlu0 %282 }
 0x1c7   :  { %476 = vpow2.f32 %v300_v31  ;;  %v292_v33 = vsub.f32 %v266_v7, %v283_v32 }
 0x1c9   :  { %v306_v34 = vmul.f32 1.442695, %v292_v33  ;;  %v475_v35 = vpop.eup %474 }
 0x1cb   :  { %478 = vpow2.f32 %v306_v34 }
 0x1cd   :  { %v477_v36 = vpop.eup %476 }
 0x1ce   :  { %320 = vadd.xlane.f32.xlu1 %v475_v35  ;;  %v285_v37 = vpop.xlane.xlu1 %284  ;;  %316 = vadd.xlane.f32.xlu2 %v477_v36 }
 0x1cf   :  { %v293_v38 = vsub.f32 %v268_v9, %v285_v37 }
 0x1d1   :  { %v308_v39 = vmul.f32 1.442695, %v293_v38  ;;  %v479_v40 = vpop.eup %478 }
 0x1d3   :  { %480 = vpow2.f32 %v308_v39 }
 0x1d6   :  { %322 = vadd.xlane.f32.xlu2 %v479_v40 }
 0x1d9   :  { %v481_v41 = vpop.eup %480 }
 0x1da   :  { %324 = vadd.xlane.f32.xlu0 %v481_v41 }
 0x229   :  { %v311_v42 = vpop.xlane.xlu2 %310 }
 0x22a   :  { %482 = vlog2.f32 %v311_v42 }
 0x230   :  { %v483_v43 = vpop.eup %482 }
 0x231   :  { %v327_v44 = vmul.f32 0.6931472, %v483_v43  ;;  %v313_v45 = vpop.xlane.xlu0 %312 }
 0x232   :  { %484 = vlog2.f32 %v313_v45 }
 0x233   :  { %v342_v46 = vsub.f32 %v286_v11, %v327_v44 }
 0x235   :  { %350 = vst [vmem:[%s657_s5] sm:$0xff] %v342_v46 }
 0x238   :  { %v485_v47 = vpop.eup %484 }
 0x239   :  { %v329_v48 = vmul.f32 0.6931472, %v485_v47  ;;  %v315_v49 = vpop.xlane.xlu1 %314  ;;  %v319_v50 = vpop.xlane.xlu0 %318 }
 0x23a   :  { %486 = vlog2.f32 %v315_v49 }
 0x23b   :  { %v343_v51 = vsub.f32 %v287_v14, %v329_v48  ;;  %488 = vlog2.f32 %v319_v50 }
 0x23d   :  { %351 = vst [vmem:[%s657_s5 + $0x8] sm:$0xff] %v343_v51 }
 0x240   :  { %v487_v52 = vpop.eup %486 }
 0x241   :  { %v489_v53 = vpop.eup %488  ;;  %v331_v54 = vmul.f32 0.6931472, %v487_v52  ;;  %v321_v55 = vpop.xlane.xlu1 %320 }
 0x242   :  { %v317_v56 = vpop.xlane.xlu2 %316  ;;  %v335_v57 = vmul.f32 0.6931472, %v489_v53  ;;  %490 = vlog2.f32 %v321_v55 }
 0x243   :  { %v344_v58 = vsub.f32 %v288_v21, %v331_v54  ;;  %492 = vlog2.f32 %v317_v56 }
 0x244   :  { %v346_v59 = vsub.f32 %v620_v18, %v335_v57 }
 0x245   :  { %352 = vst [vmem:[%s657_s5 + $0x10] sm:$0xff] %v344_v58 }
 0x246   :  { %354 = vst [vmem:[%s657_s5 + $0x20] sm:$0xff] %v346_v59 }
 0x248   :  { %v491_v60 = vpop.eup %490 }
 0x249   :  { %v493_v61 = vpop.eup %492  ;;  %v337_v62 = vmul.f32 0.6931472, %v491_v60 }
 0x24a   :  { %v323_v63 = vpop.xlane.xlu2 %322  ;;  %v333_v0 = vmul.f32 0.6931472, %v493_v61 }
 0x24b   :  { %494 = vlog2.f32 %v323_v63  ;;  %v347_v1 = vsub.f32 %v623_v25, %v337_v62 }
 0x24c   :  { %v345_v2 = vsub.f32 %v289_v28, %v333_v0 }
 0x24d   :  { %355 = vst [vmem:[%s657_s5 + $0x28] sm:$0xff] %v347_v1  ;;  %v325_v3 = vpop.xlane.xlu0 %324 }
 0x24e   :  { %353 = vst [vmem:[%s657_s5 + $0x18] sm:$0xff] %v345_v2  ;;  %496 = vlog2.f32 %v325_v3 }
 0x251   :  { %v495_v4 = vpop.eup %494 }
 0x252   :  { %v339_v5 = vmul.f32 0.6931472, %v495_v4 }
 0x254   :  { %v348_v6 = vsub.f32 %v292_v33, %v339_v5  ;;  %v497_v7 = vpop.eup %496 }
 0x255   :  { %v341_v8 = vmul.f32 0.6931472, %v497_v7 }
 0x256   :  { %356 = vst [vmem:[%s657_s5 + $0x30] sm:$0xff] %v348_v6 }
 0x257   :  { %v349_v9 = vsub.f32 %v293_v38, %v341_v8 }
 0x259   :  { %357 = vst [vmem:[%s657_s5 + $0x38] sm:$0xff] %v349_v9 }
 0x25a   :  { %362 = vsyncpa [#allocation3], 1 }
 0x25b   :  { %363 = vsyncpa [#allocation5], 1 }

// kernel: word_lstm_forward.4
= control target key start
LH: loop header
LB: loop body
LE: loop exit
PB: predicated region body
PF: predicated region fallthrough
CT: control target
= control target key end

     0   :  { %12 = vsyncpa [#allocation6], 0  ;;  %s2341_s0 = inlined_call_operand.vmem [shape: f32[8,8,128], index: 0, kind: input, shape index: {}]   ;;  %s2342_s1 = inlined_call_operand.hbm [shape: bf16[128,128], index: 1, kind: input, shape index: {}]   ;;  %s2343_s2 = inlined_call_operand.hbm [shape: bf16[128,128], index: 2, kind: input, shape index: {}]   ;;  %s2344_s3 = inlined_call_operand.vmem [shape: f32[1,128], index: 3, kind: input, shape index: {}]   ;;  %s2345_s4 = inlined_call_operand.hbm [shape: bf16[128,128], index: 4, kind: input, shape index: {}]   ;;  %s2346_s5 = inlined_call_operand.hbm [shape: bf16[128,128], index: 5, kind: input, shape index: {}]   ;;  %s2347_s6 = inlined_call_operand.vmem [shape: f32[1,128], index: 6, kind: input, shape index: {}]   ;;  %s2348_s7 = inlined_call_operand.vmem [shape: f32[8,8,128], index: 7, kind: output, shape index: {}]  }
   0x1   :  { %13 = vsyncpa [#allocation8], 0 }
   0x2   :  { %14 = vsyncpa [#allocation11], 0  ;;  %s34_s26 = sshll.u32 %s2343_s2, 4  ;;  %s1745_s27 = smov [#allocation7]   ;;  %s35_s26 = int_to_ptr.hbm [resolvable:$true] %s34_s26 }
   0x3   :  { %s36_s28 = sshll.u32 %s1745_s27, 4  ;;  %s21_s8 = sshll.u32 %s2342_s1, 4  ;;  %s37_s28 = int_to_ptr.vmem [resolvable:$true] %s36_s28  ;;  %s22_s8 = int_to_ptr.hbm [resolvable:$true] %s21_s8 }
   0x4   :  { %s1746_s9 = smov 64   ;;  %s1747_s10 = smov 4  }
   0x5   :  { %42 = dma.hbm_to_vmem [thread:$0]  %s35_s26, 1024, %s37_s28, [#allocation8], %s1746_s9, %s1746_s9, %s1747_s10  }
   0x6   :  { %s1748_s11 = smov [#allocation5]   ;;  %s49_s2 = sshll.u32 %s2345_s4, 4  ;;  %s50_s2 = int_to_ptr.hbm [resolvable:$true] %s49_s2 }
   0x7   :  { %s23_s12 = sshll.u32 %s1748_s11, 4  ;;  %s62_s1 = sshll.u32 %s2346_s5, 4  ;;  %s24_s12 = int_to_ptr.vmem [resolvable:$true] %s23_s12  ;;  %s63_s1 = int_to_ptr.hbm [resolvable:$true] %s62_s1 }
   0x8   :  { %29 = dma.hbm_to_vmem [thread:$0]  %s22_s8, 1024, %s24_s12, [#allocation6], %s1746_s9, %s1746_s9, %s1747_s10  }
   0x9   :  { %s1749_s17 = smov [#allocation9]   ;;  %s1750_s19 = smov [#allocation10]  }
   0xa   :  { %s51_s18 = sshll.u32 %s1749_s17, 4  ;;  %s64_s20 = sshll.u32 %s1750_s19, 4  ;;  %s52_s18 = int_to_ptr.vmem [resolvable:$true] %s51_s18  ;;  %s65_s20 = int_to_ptr.vmem [resolvable:$true] %s64_s20 }
   0xb   :  { %57 = dma.hbm_to_vmem [thread:$0]  %s50_s2, 1024, %s52_s18, [#allocation8], %s1746_s9, %s1746_s9, %s1747_s10  }
   0xc   :  { %70 = dma.hbm_to_vmem [thread:$0]  %s63_s1, 1024, %s65_s20, [#allocation11], %s1746_s9, %s1746_s9, %s1747_s10  }
   0xd   :  { %1739 = dma.done.wait [#allocation6], 1024  }
   0xe   :  { %1740 = vsyncadd [#allocation6], 4294966272 }
   0xf   :  { %1741 = dma.done.wait [#allocation8], 2048  }
  0x10   :  { %1742 = vsyncadd [#allocation8], 4294965248 }
  0x11   :  { %1743 = dma.done.wait [#allocation11], 1024  }
  0x12   :  { %1744 = vsyncadd [#allocation11], 4294966272  ;;  %v1486_v0 = vld [vmem:[#allocation9 + $0x38] sm:$0xff]  ;;  %v1485_v1 = vld [vmem:[#allocation9 + $0x30] sm:$0xff]  ;;  %v1751_v31 = vmov 0   ;;  %s1753_s15 = smov 32  }
  0x13   :  { %275 = vmatpush.bf16.msra.mxu1 %v1486_v0  ;;  %v1814_v2 = vld [vmem:[#allocation10 + $0x38] sm:$0xff]  ;;  %v1484_v3 = vld [vmem:[#allocation9 + $0x28] sm:$0xff]  ;;  %v1483_v4 = vld [vmem:[#allocation9 + $0x20] sm:$0xff] }
  0x14   :  { %494 = vmatpush.bf16.msra.mxu3 %v1814_v2  ;;  %v1482_v5 = vld [vmem:[#allocation9 + $0x18] sm:$0xff]  ;;  %v1817_v6 = vld [vmem:[#allocation10 + $0x30] sm:$0xff]  ;;  %v1822_v9 = vld [vmem:[#allocation10 + $0x28] sm:$0xff] }
  0x15   :  { %v1819_v7 = vld [vmem:[#allocation7 + $0x38] sm:$0xff]  ;;  %v1481_v8 = vld [vmem:[#allocation9 + $0x10] sm:$0xff]  ;;  %v1480_v10 = vld [vmem:[#allocation9 + $0x8] sm:$0xff] }
  0x16   :  { %398 = vmatpush.bf16.msra.mxu2 %v1819_v7  ;;  %v1826_v11 = vld [vmem:[#allocation10 + $0x20] sm:$0xff]  ;;  %v91_v14 = vld [vmem:[%s2341_s0 + $0x8] sm:$0xff]  ;;  %v1835_v15 = vld [vmem:[#allocation10 + $0x18] sm:$0xff] }
  0x17   :  { %276 = vmatpush.bf16.msra.mxu1 %v1485_v1  ;;  %v1479_v12 = vld [vmem:[#allocation9] sm:$0xff]  ;;  %v1478_v17 = vld [vmem:[#allocation5 + $0x38] sm:$0xff]  ;;  %v1841_v18 = vld [vmem:[#allocation7 + $0x30] sm:$0xff] }
  0x18   :  { %495 = vmatpush.bf16.msra.mxu3 %v1817_v6  ;;  %v90_v13 = vld [vmem:[%s2341_s0] sm:$0xff]  ;;  %v1843_v19 = vld [vmem:[#allocation10 + $0x10] sm:$0xff]  ;;  %170 = vmatpush.bf16.msra.mxu0 %v1478_v17  ;;  %v1847_v21 = vld [vmem:[#allocation7 + $0x28] sm:$0xff] }
  0x19   :  { %v1837_v16 = vpack.c.bf16 %v91_v14, %v90_v13  ;;  %v1477_v20 = vld [vmem:[#allocation5 + $0x30] sm:$0xff]  ;;  %v1850_v22 = vld [vmem:[#allocation10 + $0x8] sm:$0xff]  ;;  %v1854_v24 = vld [vmem:[#allocation7 + $0x20] sm:$0xff] }
  0x1a   :  { %399 = vmatpush.bf16.msra.mxu2 %v1841_v18  ;;  %v1476_v23 = vld [vmem:[#allocation5 + $0x28] sm:$0xff]  ;;  %v1857_v25 = vld [vmem:[#allocation10] sm:$0xff]  ;;  %v92_v26 = vld [vmem:[%s2341_s0 + $0x10] sm:$0xff] }
  0x1b   :  { %277 = vmatpush.bf16.msra.mxu1 %v1484_v3  ;;  %v93_v27 = vld [vmem:[%s2341_s0 + $0x18] sm:$0xff]  ;;  %v1475_v28 = vld [vmem:[#allocation5 + $0x20] sm:$0xff]  ;;  %v1874_v33 = vld [vmem:[#allocation7 + $0x10] sm:$0xff] }
  0x1c   :  { %496 = vmatpush.bf16.msra.mxu3 %v1822_v9  ;;  %171 = vmatpush.bf16.msra.mxu0 %v1477_v20  ;;  %v1868_v29 = vld [vmem:[#allocation7 + $0x18] sm:$0xff]  ;;  %v99_v30 = vpack.c.bf16 %v93_v27, %v92_v26  ;;  %v1473_v34 = vld [vmem:[#allocation5 + $0x10] sm:$0xff]  ;;  %v1878_v35 = vld [vmem:[#allocation7 + $0x8] sm:$0xff] }
  0x1d   :  { %v1474_v32 = vld [vmem:[#allocation5 + $0x18] sm:$0xff]  ;;  %v1472_v36 = vld [vmem:[#allocation5 + $0x8] sm:$0xff]  ;;  %v1883_v37 = vld [vmem:[#allocation7] sm:$0xff] }
  0x1e   :  { %400 = vmatpush.bf16.msra.mxu2 %v1847_v21  ;;  %v94_v38 = vld [vmem:[%s2341_s0 + $0x20] sm:$0xff]  ;;  %v95_v39 = vld [vmem:[%s2341_s0 + $0x28] sm:$0xff]  ;;  %v96_v42 = vld [vmem:[%s2341_s0 + $0x30] sm:$0xff] }
  0x1f   :  { %278 = vmatpush.bf16.msra.mxu1 %v1483_v4  ;;  %v1471_v40 = vld [vmem:[#allocation5] sm:$0xff]  ;;  %v100_v41 = vpack.c.bf16 %v95_v39, %v94_v38  ;;  %v97_v43 = vld [vmem:[%s2341_s0 + $0x38] sm:$0xff] }
  0x20   :  { %497 = vmatpush.bf16.msra.mxu3 %v1826_v11  ;;  %172 = vmatpush.bf16.msra.mxu0 %v1476_v23  ;;  %v101_v44 = vpack.c.bf16 %v97_v43, %v96_v42  ;;  %v1512_v45 = vld [vmem:[%s2347_s6] ss:$0 sm:$0xff]  ;;  %s1752_s6 = smov 96  }
  0x21   :  { %v1968_v56 = vld [vmem:[%s2344_s3] ss:$0 sm:$0xff] }
  0x22   :  { %401 = vmatpush.bf16.msra.mxu2 %v1854_v24 }
  0x23   :  { %279 = vmatpush.bf16.msra.mxu1 %v1482_v5 }
  0x24   :  { %498 = vmatpush.bf16.msra.mxu3 %v1835_v15  ;;  %173 = vmatpush.bf16.msra.mxu0 %v1475_v28 }
  0x26   :  { %402 = vmatpush.bf16.msra.mxu2 %v1868_v29 }
  0x27   :  { %280 = vmatpush.bf16.msra.mxu1 %v1481_v8 }
  0x28   :  { %499 = vmatpush.bf16.msra.mxu3 %v1843_v19  ;;  %174 = vmatpush.bf16.msra.mxu0 %v1474_v32 }
  0x2a   :  { %403 = vmatpush.bf16.msra.mxu2 %v1874_v33 }
  0x2b   :  { %281 = vmatpush.bf16.msra.mxu1 %v1480_v10 }
  0x2c   :  { %500 = vmatpush.bf16.msra.mxu3 %v1850_v22  ;;  %175 = vmatpush.bf16.msra.mxu0 %v1473_v34 }
  0x2e   :  { %404 = vmatpush.bf16.msra.mxu2 %v1878_v35 }
  0x2f   :  { %282 = vmatpush.bf16.msra.mxu1 %v1479_v12  ;;  %v312_v12 = vlaneseq }
  0x30   :  { %501 = vmatpush.bf16.msra.mxu3 %v1857_v25  ;;  %176 = vmatpush.bf16.msra.mxu0 %v1472_v36 }
  0x31   :  { %v1977_v23 = vand.u32 127, %v312_v12 }
  0x32   :  { %283 = vmatmul.bf16.vlgmr.msra.gmra.mxu1 %v1837_v16  ;;  %405 = vmatpush.bf16.msra.mxu2 %v1883_v37 }
  0x33   :  { %697 = vmatpush.bf16.msrb.mxu1 %v1814_v2  ;;  %502 = vmatmul.bf16.vlgmr.msra.gmra.mxu3 %v1751_v31  ;;  %vm314_vm2 = vcmp.ge.s32.totalorder %v1977_v23, 64  ;;  %vm315_vm3 = vcmp.lt.s32.totalorder %v1977_v23, 96 }
  0x34   :  { %595 = vmatpush.bf16.msrb.mxu3 %v1814_v2  ;;  %177 = vmatpush.bf16.msra.mxu0 %v1471_v40  ;;  %vm1981_vm6 = vmand %vm314_vm2, %vm315_vm3 }
  0x35   :  { %406 = vmatmul.bf16.vlgmr.msra.gmra.mxu2 %v1751_v31 }
  0x36   :  { %546 = vmatpush.bf16.msrb.mxu2 %v1819_v7 }
  0x37   :  { %698 = vmatpush.bf16.msrb.mxu1 %v1817_v6  ;;  %178 = vmatmul.bf16.vlgmr.msra.gmra.mxu0 %v1837_v16 }
  0x38   :  { %596 = vmatpush.bf16.msrb.mxu3 %v1817_v6  ;;  %648 = vmatpush.bf16.msrb.mxu0 %v1819_v7 }
  0x3a   :  { %547 = vmatpush.bf16.msrb.mxu2 %v1841_v18 }
  0x3b   :  { %699 = vmatpush.bf16.msrb.mxu1 %v1822_v9 }
  0x3c   :  { %597 = vmatpush.bf16.msrb.mxu3 %v1822_v9  ;;  %649 = vmatpush.bf16.msrb.mxu0 %v1841_v18 }
  0x3e   :  { %548 = vmatpush.bf16.msrb.mxu2 %v1847_v21 }
  0x3f   :  { %700 = vmatpush.bf16.msrb.mxu1 %v1826_v11 }
  0x40   :  { %598 = vmatpush.bf16.msrb.mxu3 %v1826_v11  ;;  %650 = vmatpush.bf16.msrb.mxu0 %v1847_v21 }
  0x42   :  { %288 = vmatmul.bf16.gmra.mxu1 %v99_v30  ;;  %549 = vmatpush.bf16.msrb.mxu2 %v1854_v24 }
  0x43   :  { %701 = vmatpush.bf16.msrb.mxu1 %v1835_v15 }
  0x44   :  { %599 = vmatpush.bf16.msrb.mxu3 %v1835_v15  ;;  %651 = vmatpush.bf16.msrb.mxu0 %v1854_v24 }
  0x46   :  { %550 = vmatpush.bf16.msrb.mxu2 %v1868_v29 }
  0x47   :  { %702 = vmatpush.bf16.msrb.mxu1 %v1843_v19  ;;  %183 = vmatmul.bf16.gmra.mxu0 %v99_v30 }
  0x48   :  { %600 = vmatpush.bf16.msrb.mxu3 %v1843_v19  ;;  %652 = vmatpush.bf16.msrb.mxu0 %v1868_v29 }
  0x4a   :  { %551 = vmatpush.bf16.msrb.mxu2 %v1874_v33 }
  0x4b   :  { %703 = vmatpush.bf16.msrb.mxu1 %v1850_v22 }
  0x4c   :  { %601 = vmatpush.bf16.msrb.mxu3 %v1850_v22  ;;  %653 = vmatpush.bf16.msrb.mxu0 %v1874_v33 }
  0x4e   :  { %552 = vmatpush.bf16.msrb.mxu2 %v1878_v35 }
  0x4f   :  { %704 = vmatpush.bf16.msrb.mxu1 %v1857_v25 }
  0x50   :  { %602 = vmatpush.bf16.msrb.mxu3 %v1857_v25  ;;  %654 = vmatpush.bf16.msrb.mxu0 %v1878_v35 }
  0x52   :  { %293 = vmatmul.bf16.gmra.mxu1 %v100_v41  ;;  %553 = vmatpush.bf16.msrb.mxu2 %v1883_v37 }
  0x53   :  { %901 = vmatpush.bf16.msra.mxu1 %v1814_v2 }
  0x54   :  { %799 = vmatpush.bf16.msra.mxu3 %v1814_v2  ;;  %655 = vmatpush.bf16.msrb.mxu0 %v1883_v37 }
  0x56   :  { %750 = vmatpush.bf16.msra.mxu2 %v1819_v7 }
  0x57   :  { %902 = vmatpush.bf16.msra.mxu1 %v1817_v6  ;;  %188 = vmatmul.bf16.gmra.mxu0 %v100_v41 }
  0x58   :  { %800 = vmatpush.bf16.msra.mxu3 %v1817_v6  ;;  %852 = vmatpush.bf16.msra.mxu0 %v1819_v7 }
  0x5a   :  { %751 = vmatpush.bf16.msra.mxu2 %v1841_v18 }
  0x5b   :  { %903 = vmatpush.bf16.msra.mxu1 %v1822_v9 }
  0x5c   :  { %801 = vmatpush.bf16.msra.mxu3 %v1822_v9  ;;  %853 = vmatpush.bf16.msra.mxu0 %v1841_v18 }
  0x5e   :  { %752 = vmatpush.bf16.msra.mxu2 %v1847_v21 }
  0x5f   :  { %904 = vmatpush.bf16.msra.mxu1 %v1826_v11 }
  0x60   :  { %802 = vmatpush.bf16.msra.mxu3 %v1826_v11  ;;  %854 = vmatpush.bf16.msra.mxu0 %v1847_v21 }
  0x62   :  { %298 = vmatmul.bf16.gmra.mxu1 %v101_v44  ;;  %753 = vmatpush.bf16.msra.mxu2 %v1854_v24 }
  0x63   :  { %905 = vmatpush.bf16.msra.mxu1 %v1835_v15 }
  0x64   :  { %803 = vmatpush.bf16.msra.mxu3 %v1835_v15  ;;  %855 = vmatpush.bf16.msra.mxu0 %v1854_v24 }
  0x66   :  { %754 = vmatpush.bf16.msra.mxu2 %v1868_v29 }
  0x67   :  { %906 = vmatpush.bf16.msra.mxu1 %v1843_v19  ;;  %193 = vmatmul.bf16.gmra.mxu0 %v101_v44 }
  0x68   :  { %804 = vmatpush.bf16.msra.mxu3 %v1843_v19  ;;  %856 = vmatpush.bf16.msra.mxu0 %v1868_v29 }
  0x6a   :  { %755 = vmatpush.bf16.msra.mxu2 %v1874_v33 }
  0x6b   :  { %907 = vmatpush.bf16.msra.mxu1 %v1850_v22 }
  0x6c   :  { %805 = vmatpush.bf16.msra.mxu3 %v1850_v22  ;;  %857 = vmatpush.bf16.msra.mxu0 %v1874_v33 }
  0x6e   :  { %756 = vmatpush.bf16.msra.mxu2 %v1878_v35 }
  0x6f   :  { %908 = vmatpush.bf16.msra.mxu1 %v1857_v25 }
  0x70   :  { %806 = vmatpush.bf16.msra.mxu3 %v1857_v25  ;;  %858 = vmatpush.bf16.msra.mxu0 %v1878_v35 }
  0x72   :  { %757 = vmatpush.bf16.msra.mxu2 %v1883_v37 }
  0x74   :  { %859 = vmatpush.bf16.msra.mxu0 %v1883_v37 }
  0xaf   :  { %v284_v46 = vpop.f32.mrf.mxu1 }
  0xb0   :  { %v1957_v47 = vadd.f32 %v1512_v45, %v284_v46 }
  0xb4   :  { %v179_v58 = vpop.f32.mrf.mxu0 }
  0xb5   :  { %v180_v60 = vadd.f32 %v1968_v56, %v179_v58 }
  0xb6   :  { %v503_v52 = vpop.f32.mrf.mxu3 }
  0xb7   :  { %v286_v48 = vpop.f32.mrf.mxu1 }
  0xb8   :  { %v1959_v49 = vadd.f32 %v1512_v45, %v286_v48  ;;  %v407_v61 = vpop.f32.mrf.mxu2 }
  0xb9   :  { %v411_v62 = vadd.f32 %v407_v61, %v180_v60 }
  0xbb   :  { %v1416_v63 = vmul.f32 -1.442695, %v411_v62 }
  0xbd   :  { %1514 = vpow2.f32 %v1416_v63 }
  0xbe   :  { %v505_v55 = vpop.f32.mrf.mxu3 }
  0xbf   :  { %v289_v50 = vpop.f32.mrf.mxu1 }
  0xc0   :  { %v1961_v51 = vadd.f32 %v1512_v45, %v289_v50  ;;  %v409_v3 = vpop.f32.mrf.mxu2 }
  0xc3   :  { %v1515_v4 = vpop.eup %1514 }
  0xc4   :  { %v416_v8 = vadd.f32 1.0, %v1515_v4 }
  0xc6   :  { %1516 = vrcp.f32 %v416_v8  ;;  %v428_v27 = vand.u32 2147483648, %v416_v8  ;;  %vm422_vm0 = vweird.f32 %v416_v8  ;;  %v426_v31 = vand.u32 2147483647, %v416_v8 }
  0xc7   :  { %v291_v53 = vpop.f32.mrf.mxu1  ;;  %1518 = vtanh.f32 %v411_v62 }
  0xc8   :  { %v1963_v54 = vadd.f32 %v1512_v45, %v291_v53  ;;  %v429_v32 = vor.u32 1.1754944e-38, %v428_v27  ;;  %vm427_vm5 = vcmp.eq.f32.partialorder %v426_v31, 8.507059e+37 }
  0xcc   :  { %v1517_v13 = vpop.eup %1516 }
  0xcd   :  { %v418_v17 = vmul.f32 %v1517_v13, %v416_v8  ;;  %vm423_vm1 = vweird.f32 %v1517_v13  ;;  %v1519_v36 = vpop.eup %1518 }
  0xce   :  { %vm424_vm4 = vmor %vm422_vm0, %vm423_vm1 }
  0xcf   :  { %v294_v57 = vpop.f32.mrf.mxu1  ;;  %v419_v26 = vsub.f32 1.0, %v418_v17 }
  0xd0   :  { %v1970_v59 = vadd.f32 %v1512_v45, %v294_v57 }
  0xd1   :  { %v420_v30 = vmul.f32 %v1517_v13, %v419_v26 }
  0xd3   :  { %v421_v34 = vadd.f32 %v1517_v13, %v420_v30 }
  0xd5   :  { %v425_v38 = vsel %vm424_vm4, %v1517_v13, %v421_v34 }
  0xd6   :  { %v430_v40 = vsel %vm427_vm5, %v429_v32, %v425_v38  ;;  %v181_v32 = vpop.f32.mrf.mxu0 }
  0xd7   :  { %v296_v0 = vpop.f32.mrf.mxu1  ;;  %v432_v41 = vsel %vm1981_vm6, %v1519_v36, %v430_v40  ;;  %v182_v34 = vadd.f32 %v1968_v56, %v181_v32 }
  0xd8   :  { %v1973_v1 = vadd.f32 %v1512_v45, %v296_v0  ;;  %436 = vrot.lane.b32.xlu2 %v432_v41, %s1752_s6 }
  0xdf   :  { %v299_v5 = vpop.f32.mrf.mxu1 }
  0xe0   :  { %v1975_v10 = vadd.f32 %v1512_v45, %v299_v5  ;;  %440 = vrot.lane.b32.xlu2 %v432_v41, %s1753_s15 }
  0xe7   :  { %v301_v14 = vpop.f32.mrf.mxu1 }
  0xe8   :  { %v302_v16 = vadd.f32 %v1512_v45, %v301_v14 }
  0xea   :  { %v507_v20 = vadd.f32 %v503_v52, %v302_v16 }
  0xec   :  { %v1449_v28 = vmul.f32 -1.442695, %v507_v20 }
  0xee   :  { %1520 = vpow2.f32 %v1449_v28 }
  0xf4   :  { %v1521_v42 = vpop.eup %1520 }
  0xf5   :  { %v512_v43 = vadd.f32 1.0, %v1521_v42 }
  0xf7   :  { %1522 = vrcp.f32 %v512_v43  ;;  %v524_v48 = vand.u32 2147483648, %v512_v43  ;;  %v522_v52 = vand.u32 2147483647, %v512_v43  ;;  %vm518_vm8 = vweird.f32 %v512_v43 }
  0xf8   :  { %1524 = vtanh.f32 %v507_v20 }
  0xf9   :  { %v525_v55 = vor.u32 1.1754944e-38, %v524_v48  ;;  %vm523_vm10 = vcmp.eq.f32.partialorder %v522_v52, 8.507059e+37 }
  0xfd   :  { %v1523_v44 = vpop.eup %1522 }
  0xfe   :  { %v514_v45 = vmul.f32 %v1523_v44, %v512_v43  ;;  %vm519_vm7 = vweird.f32 %v1523_v44  ;;  %v1525_v58 = vpop.eup %1524 }
  0xff   :  { %vm520_vm9 = vmor %vm518_vm8, %vm519_vm7 }
 0x100   :  { %v515_v46 = vsub.f32 1.0, %v514_v45 }
 0x102   :  { %v516_v50 = vmul.f32 %v1523_v44, %v515_v46 }
 0x104   :  { %v517_v53 = vadd.f32 %v1523_v44, %v516_v50 }
 0x106   :  { %v521_v57 = vsel %vm520_vm9, %v1523_v44, %v517_v53 }
 0x107   :  { %v526_v60 = vsel %vm523_vm10, %v525_v55, %v521_v57 }
 0x108   :  { %v528_v61 = vsel %vm1981_vm6, %v1525_v58, %v526_v60 }
 0x109   :  { %536 = vrot.lane.b32.xlu1 %v528_v61, %s1753_s15  ;;  %529 = vrot.lane.b32.xlu0 %v528_v61, %s1746_s9 }
 0x111   :  { %532 = vrot.lane.b32.xlu0 %v528_v61, %s1752_s6  ;;  %433 = vrot.lane.b32.xlu1 %v432_v41, %s1746_s9 }
 0x132   :  { %v437_v0 = vpop.permute.xlu2 %436 }
 0x133   :  { %v438_v3 = vmul.f32 0.0, %v437_v0 }
 0x13a   :  { %v441_v17 = vpop.permute.xlu2 %440 }
 0x17b   :  { %v537_v62 = vpop.permute.xlu1 %536  ;;  %v530_v63 = vpop.permute.xlu0 %529 }
 0x17c   :  { %v531_v8 = vmul.f32 %v530_v63, %v528_v61 }
 0x183   :  { %v533_v4 = vpop.permute.xlu0 %532  ;;  %v434_v5 = vpop.permute.xlu1 %433 }
 0x184   :  { %v534_v12 = vmul.f32 0.0, %v533_v4  ;;  %v435_v13 = vmul.f32 %v434_v5, %v432_v41 }
 0x186   :  { %v1995_v14 = vadd.f32 %v534_v12, %v531_v8  ;;  %v1997_v16 = vadd.f32 %v438_v3, %v435_v13 }
 0x188   :  { %1526 = vtanh.f32 %v1995_v14 }
 0x189   :  { %1528 = vtanh.f32 %v1997_v16 }
 0x18e   :  { %v1527_v20 = vpop.eup %1526 }
 0x18f   :  { %v1529_v26 = vpop.eup %1528  ;;  %v2001_v27 = vmul.f32 %v1527_v20, %v537_v62 }
 0x190   :  { %v443_v28 = vmul.f32 %v1529_v26, %v441_v17 }
 0x191   :  { %v594_v30 = vpack.c.bf16 %v2001_v27, %v2001_v27 }
 0x192   :  { %540 = vst [vmem:[%s2348_s7] sm:$0xff] %v443_v28  ;;  %v545_v31 = vpack.c.bf16 %v443_v28, %v443_v28 }
 0x193   :  { %603 = vmatmul.bf16.vlgmr.msrb.gmra.mxu3 %v594_v30 }
 0x194   :  { %554 = vmatmul.bf16.vlgmr.msrb.gmra.mxu2 %v545_v31  ;;  %1003 = vmatpush.bf16.msrb.mxu3 %v1814_v2 }
 0x195   :  { %954 = vmatpush.bf16.msrb.mxu2 %v1819_v7 }
 0x198   :  { %1004 = vmatpush.bf16.msrb.mxu3 %v1817_v6 }
 0x199   :  { %955 = vmatpush.bf16.msrb.mxu2 %v1841_v18 }
 0x19c   :  { %1005 = vmatpush.bf16.msrb.mxu3 %v1822_v9 }
 0x19d   :  { %956 = vmatpush.bf16.msrb.mxu2 %v1847_v21 }
 0x1a0   :  { %1006 = vmatpush.bf16.msrb.mxu3 %v1826_v11 }
 0x1a1   :  { %957 = vmatpush.bf16.msrb.mxu2 %v1854_v24 }
 0x1a4   :  { %1007 = vmatpush.bf16.msrb.mxu3 %v1835_v15 }
 0x1a5   :  { %958 = vmatpush.bf16.msrb.mxu2 %v1868_v29 }
 0x1a8   :  { %1008 = vmatpush.bf16.msrb.mxu3 %v1843_v19 }
 0x1a9   :  { %959 = vmatpush.bf16.msrb.mxu2 %v1874_v33 }
 0x1ac   :  { %1009 = vmatpush.bf16.msrb.mxu3 %v1850_v22 }
 0x1ad   :  { %960 = vmatpush.bf16.msrb.mxu2 %v1878_v35 }
 0x1b0   :  { %1010 = vmatpush.bf16.msrb.mxu3 %v1857_v25 }
 0x1b1   :  { %961 = vmatpush.bf16.msrb.mxu2 %v1883_v37 }
 0x216   :  { %v604_v36 = vpop.f32.mrf.mxu3 }
 0x217   :  { %v555_v38 = vpop.f32.mrf.mxu2  ;;  %v608_v40 = vadd.f32 %v604_v36, %v1975_v10 }
 0x218   :  { %v559_v41 = vadd.f32 %v555_v38, %v182_v34 }
 0x219   :  { %v1451_v42 = vmul.f32 -1.442695, %v608_v40 }
 0x21a   :  { %v1450_v43 = vmul.f32 -1.442695, %v559_v41 }
 0x21b   :  { %1530 = vpow2.f32 %v1451_v42 }
 0x21c   :  { %1532 = vpow2.f32 %v1450_v43 }
 0x21e   :  { %v606_v44 = vpop.f32.mrf.mxu3 }
 0x21f   :  { %v557_v45 = vpop.f32.mrf.mxu2 }
 0x221   :  { %v1531_v46 = vpop.eup %1530 }
 0x222   :  { %v1533_v48 = vpop.eup %1532  ;;  %v613_v50 = vadd.f32 1.0, %v1531_v46 }
 0x223   :  { %v564_v52 = vadd.f32 1.0, %v1533_v48 }
 0x224   :  { %1534 = vrcp.f32 %v613_v50  ;;  %v625_v10 = vand.u32 2147483648, %v613_v50  ;;  %v623_v63 = vand.u32 2147483647, %v613_v50  ;;  %vm619_vm12 = vweird.f32 %v613_v50 }
 0x225   :  { %1536 = vrcp.f32 %v564_v52  ;;  %v576_v17 = vand.u32 2147483648, %v564_v52  ;;  %vm570_vm0 = vweird.f32 %v564_v52  ;;  %v574_v26 = vand.u32 2147483647, %v564_v52 }
 0x226   :  { %1538 = vtanh.f32 %v608_v40  ;;  %v626_v4 = vor.u32 1.1754944e-38, %v625_v10  ;;  %vm624_vm14 = vcmp.eq.f32.partialorder %v623_v63, 8.507059e+37 }
 0x227   :  { %1540 = vtanh.f32 %v559_v41  ;;  %v577_v30 = vor.u32 1.1754944e-38, %v576_v17  ;;  %vm575_vm2 = vcmp.eq.f32.partialorder %v574_v26, 8.507059e+37 }
 0x22a   :  { %v1535_v53 = vpop.eup %1534 }
 0x22b   :  { %v1537_v55 = vpop.eup %1536  ;;  %v615_v57 = vmul.f32 %v1535_v53, %v613_v50  ;;  %vm620_vm11 = vweird.f32 %v1535_v53 }
 0x22c   :  { %v566_v58 = vmul.f32 %v1537_v55, %v564_v52  ;;  %vm621_vm13 = vmor %vm619_vm12, %vm620_vm11  ;;  %vm571_vm15 = vweird.f32 %v1537_v55  ;;  %v1539_v12 = vpop.eup %1538 }
 0x22d   :  { %v616_v60 = vsub.f32 1.0, %v615_v57  ;;  %vm572_vm1 = vmor %vm570_vm0, %vm571_vm15  ;;  %v1541_v32 = vpop.eup %1540 }
 0x22e   :  { %v567_v61 = vsub.f32 1.0, %v566_v58 }
 0x22f   :  { %v617_v62 = vmul.f32 %v1535_v53, %v616_v60  ;;  %v184_v60 = vpop.f32.mrf.mxu0 }
 0x230   :  { %v568_v0 = vmul.f32 %v1537_v55, %v567_v61 }
 0x231   :  { %v618_v3 = vadd.f32 %v1535_v53, %v617_v62 }
 0x232   :  { %v569_v8 = vadd.f32 %v1537_v55, %v568_v0 }
 0x233   :  { %v622_v5 = vsel %vm621_vm13, %v1535_v53, %v618_v3 }
 0x234   :  { %v627_v13 = vsel %vm624_vm14, %v626_v4, %v622_v5  ;;  %v573_v28 = vsel %vm572_vm1, %v1537_v55, %v569_v8  ;;  %v185_v8 = vadd.f32 %v1968_v56, %v184_v60 }
 0x235   :  { %v629_v20 = vsel %vm1981_vm6, %v1539_v12, %v627_v13  ;;  %v578_v31 = vsel %vm575_vm2, %v577_v30, %v573_v28 }
 0x236   :  { %630 = vrot.lane.b32.xlu0 %v629_v20, %s1746_s9  ;;  %637 = vrot.lane.b32.xlu2 %v629_v20, %s1753_s15  ;;  %v580_v34 = vsel %vm1981_vm6, %v1541_v32, %v578_v31 }
 0x237   :  { %633 = vrot.lane.b32.xlu1 %v629_v20, %s1752_s6  ;;  %v2067_v10 = vpop.f32.mrf.mxu0 }
 0x23e   :  { %588 = vrot.lane.b32.xlu2 %v580_v34, %s1753_s15  ;;  %581 = vrot.lane.b32.xlu0 %v580_v34, %s1746_s9 }
 0x23f   :  { %584 = vrot.lane.b32.xlu1 %v580_v34, %s1752_s6  ;;  %v2069_v61 = vpop.f32.mrf.mxu0 }
 0x247   :  { %v2071_v62 = vpop.f32.mrf.mxu0 }
 0x24f   :  { %v2073_v63 = vpop.f32.mrf.mxu0 }
 0x257   :  { %v2075_v0 = vpop.f32.mrf.mxu0 }
 0x290   :  { %v638_v46 = vpop.permute.xlu2 %637 }
 0x298   :  { %v589_v57 = vpop.permute.xlu2 %588 }
 0x2a8   :  { %v631_v36 = vpop.permute.xlu0 %630 }
 0x2a9   :  { %v632_v38 = vmul.f32 %v631_v36, %v629_v20  ;;  %v634_v40 = vpop.permute.xlu1 %633 }
 0x2aa   :  { %v635_v41 = vmul.f32 %v634_v40, %v1995_v14 }
 0x2ac   :  { %v2037_v42 = vadd.f32 %v635_v41, %v632_v38 }
 0x2ae   :  { %1542 = vtanh.f32 %v2037_v42 }
 0x2b0   :  { %v582_v43 = vpop.permute.xlu0 %581 }
 0x2b1   :  { %v583_v44 = vmul.f32 %v582_v43, %v580_v34  ;;  %v585_v45 = vpop.permute.xlu1 %584 }
 0x2b2   :  { %v586_v48 = vmul.f32 %v585_v45, %v1997_v16 }
 0x2b4   :  { %v1543_v50 = vpop.eup %1542  ;;  %v2041_v52 = vadd.f32 %v586_v48, %v583_v44 }
 0x2b5   :  { %v2043_v53 = vmul.f32 %v1543_v50, %v638_v46 }
 0x2b6   :  { %1544 = vtanh.f32 %v2041_v52 }
 0x2b7   :  { %v696_v14 = vpack.c.bf16 %v2043_v53, %v2043_v53 }
 0x2b9   :  { %705 = vmatmul.bf16.vlgmr.msrb.gmra.mxu1 %v696_v14 }
 0x2ba   :  { %1105 = vmatpush.bf16.msrb.mxu1 %v1814_v2 }
 0x2bc   :  { %v1545_v55 = vpop.eup %1544 }
 0x2bd   :  { %v591_v58 = vmul.f32 %v1545_v55, %v589_v57 }
 0x2be   :  { %1106 = vmatpush.bf16.msrb.mxu1 %v1817_v6 }
 0x2bf   :  { %1452 = vst [vmem:[%s2348_s7 + $0x8] sm:$0xff] %v591_v58  ;;  %v647_v16 = vpack.c.bf16 %v591_v58, %v591_v58 }
 0x2c1   :  { %656 = vmatmul.bf16.vlgmr.msrb.gmra.mxu0 %v647_v16 }
 0x2c2   :  { %1056 = vmatpush.bf16.msrb.mxu0 %v1819_v7  ;;  %1107 = vmatpush.bf16.msrb.mxu1 %v1822_v9 }
 0x2c6   :  { %1057 = vmatpush.bf16.msrb.mxu0 %v1841_v18  ;;  %1108 = vmatpush.bf16.msrb.mxu1 %v1826_v11 }
 0x2ca   :  { %1058 = vmatpush.bf16.msrb.mxu0 %v1847_v21  ;;  %1109 = vmatpush.bf16.msrb.mxu1 %v1835_v15 }
 0x2ce   :  { %1059 = vmatpush.bf16.msrb.mxu0 %v1854_v24  ;;  %1110 = vmatpush.bf16.msrb.mxu1 %v1843_v19 }
 0x2d2   :  { %1060 = vmatpush.bf16.msrb.mxu0 %v1868_v29  ;;  %1111 = vmatpush.bf16.msrb.mxu1 %v1850_v22 }
 0x2d6   :  { %1061 = vmatpush.bf16.msrb.mxu0 %v1874_v33  ;;  %1112 = vmatpush.bf16.msrb.mxu1 %v1857_v25 }
 0x2da   :  { %1062 = vmatpush.bf16.msrb.mxu0 %v1878_v35 }
 0x2de   :  { %1063 = vmatpush.bf16.msrb.mxu0 %v1883_v37 }
 0x336   :  { %v706_v3 = vpop.f32.mrf.mxu1 }
 0x337   :  { %v710_v4 = vadd.f32 %v706_v3, %v1973_v1 }
 0x339   :  { %v1454_v5 = vmul.f32 -1.442695, %v710_v4 }
 0x33b   :  { %1546 = vpow2.f32 %v1454_v5 }
 0x33e   :  { %v657_v12 = vpop.f32.mrf.mxu0  ;;  %v708_v13 = vpop.f32.mrf.mxu1 }
 0x33f   :  { %v661_v17 = vadd.f32 %v657_v12, %v185_v8 }
 0x341   :  { %v1547_v20 = vpop.eup %1546  ;;  %v1453_v26 = vmul.f32 -1.442695, %v661_v17 }
 0x342   :  { %v715_v28 = vadd.f32 1.0, %v1547_v20 }
 0x343   :  { %1548 = vpow2.f32 %v1453_v26 }
 0x344   :  { %1550 = vrcp.f32 %v715_v28  ;;  %v727_v1 = vand.u32 2147483648, %v715_v28  ;;  %v725_v41 = vand.u32 2147483647, %v715_v28  ;;  %vm721_vm4 = vweird.f32 %v715_v28 }
 0x346   :  { %v659_v30 = vpop.f32.mrf.mxu0  ;;  %v728_v45 = vor.u32 1.1754944e-38, %v727_v1  ;;  %vm726_vm7 = vcmp.eq.f32.partialorder %v725_v41, 8.507059e+37 }
 0x349   :  { %v1549_v31 = vpop.eup %1548 }
 0x34a   :  { %v1551_v32 = vpop.eup %1550  ;;  %v666_v34 = vadd.f32 1.0, %v1549_v31 }
 0x34b   :  { %v717_v36 = vmul.f32 %v1551_v32, %v715_v28  ;;  %vm722_vm3 = vweird.f32 %v1551_v32 }
 0x34c   :  { %1552 = vrcp.f32 %v666_v34  ;;  %vm723_vm5 = vmor %vm721_vm4, %vm722_vm3  ;;  %v678_v58 = vand.u32 2147483648, %v666_v34  ;;  %v676_v60 = vand.u32 2147483647, %v666_v34  ;;  %vm672_vm9 = vweird.f32 %v666_v34 }
 0x34d   :  { %v718_v38 = vsub.f32 1.0, %v717_v36  ;;  %1554 = vtanh.f32 %v710_v4 }
 0x34e   :  { %1556 = vtanh.f32 %v661_v17  ;;  %v679_v4 = vor.u32 1.1754944e-38, %v678_v58  ;;  %vm677_vm11 = vcmp.eq.f32.partialorder %v676_v60, 8.507059e+37 }
 0x34f   :  { %v719_v40 = vmul.f32 %v1551_v32, %v718_v38 }
 0x351   :  { %v720_v43 = vadd.f32 %v1551_v32, %v719_v40 }
 0x352   :  { %v1553_v44 = vpop.eup %1552 }
 0x353   :  { %v724_v46 = vsel %vm723_vm5, %v1551_v32, %v720_v43  ;;  %v668_v48 = vmul.f32 %v1553_v44, %v666_v34  ;;  %v1555_v50 = vpop.eup %1554  ;;  %vm673_vm8 = vweird.f32 %v1553_v44 }
 0x354   :  { %v729_v14 = vsel %vm726_vm7, %v728_v45, %v724_v46  ;;  %vm674_vm10 = vmor %vm672_vm9, %vm673_vm8  ;;  %v1557_v8 = vpop.eup %1556 }
 0x355   :  { %v731_v55 = vsel %vm1981_vm6, %v1555_v50, %v729_v14  ;;  %v669_v57 = vsub.f32 1.0, %v668_v48 }
 0x356   :  { %739 = vrot.lane.b32.xlu2 %v731_v55, %s1753_s15  ;;  %735 = vrot.lane.b32.xlu1 %v731_v55, %s1752_s6 }
 0x357   :  { %732 = vrot.lane.b32.xlu0 %v731_v55, %s1746_s9  ;;  %v670_v16 = vmul.f32 %v1553_v44, %v669_v57 }
 0x359   :  { %v671_v3 = vadd.f32 %v1553_v44, %v670_v16 }
 0x35b   :  { %v675_v5 = vsel %vm674_vm10, %v1553_v44, %v671_v3 }
 0x35c   :  { %v680_v12 = vsel %vm677_vm11, %v679_v4, %v675_v5 }
 0x35d   :  { %v682_v13 = vsel %vm1981_vm6, %v1557_v8, %v680_v12 }
 0x35e   :  { %690 = vrot.lane.b32.xlu2 %v682_v13, %s1753_s15  ;;  %686 = vrot.lane.b32.xlu1 %v682_v13, %s1752_s6 }
 0x35f   :  { %683 = vrot.lane.b32.xlu0 %v682_v13, %s1746_s9 }
 0x3b0   :  { %v740_v36 = vpop.permute.xlu2 %739 }
 0x3b8   :  { %v691_v44 = vpop.permute.xlu2 %690 }
 0x3c8   :  { %v736_v17 = vpop.permute.xlu1 %735 }
 0x3c9   :  { %v733_v20 = vpop.permute.xlu0 %732  ;;  %v737_v26 = vmul.f32 %v736_v17, %v2037_v42 }
 0x3ca   :  { %v734_v28 = vmul.f32 %v733_v20, %v731_v55 }
 0x3cc   :  { %v2090_v30 = vadd.f32 %v737_v26, %v734_v28 }
 0x3ce   :  { %1558 = vtanh.f32 %v2090_v30 }
 0x3d0   :  { %v687_v31 = vpop.permute.xlu1 %686 }
 0x3d1   :  { %v684_v32 = vpop.permute.xlu0 %683  ;;  %v688_v34 = vmul.f32 %v687_v31, %v2041_v52 }
 0x3d2   :  { %v685_v38 = vmul.f32 %v684_v32, %v682_v13 }
 0x3d4   :  { %v1559_v1 = vpop.eup %1558  ;;  %v2094_v40 = vadd.f32 %v688_v34, %v685_v38 }
 0x3d5   :  { %v2096_v41 = vmul.f32 %v1559_v1, %v740_v36 }
 0x3d6   :  { %1560 = vtanh.f32 %v2094_v40 }
 0x3d7   :  { %v798_v42 = vpack.c.bf16 %v2096_v41, %v2096_v41 }
 0x3d9   :  { %807 = vmatmul.bf16.vlgmr.msra.gmra.mxu3 %v798_v42 }
 0x3da   :  { %1206 = vmatpush.bf16.msra.mxu3 %v1814_v2 }
 0x3dc   :  { %v1561_v43 = vpop.eup %1560 }
 0x3dd   :  { %v2102_v45 = vmul.f32 %v1561_v43, %v691_v44 }
 0x3de   :  { %1207 = vmatpush.bf16.msra.mxu3 %v1817_v6 }
 0x3df   :  { %v749_v52 = vpack.c.bf16 %v2102_v45, %v2102_v45 }
 0x3e1   :  { %758 = vmatmul.bf16.vlgmr.msra.gmra.mxu2 %v749_v52 }
 0x3e2   :  { %1158 = vmatpush.bf16.msra.mxu2 %v1819_v7  ;;  %1208 = vmatpush.bf16.msra.mxu3 %v1822_v9  ;;  %v187_v9 = vadd.f32 %v1968_v56, %v2067_v10 }
 0x3e6   :  { %1159 = vmatpush.bf16.msra.mxu2 %v1841_v18  ;;  %1209 = vmatpush.bf16.msra.mxu3 %v1826_v11 }
 0x3ea   :  { %1160 = vmatpush.bf16.msra.mxu2 %v1847_v21  ;;  %1210 = vmatpush.bf16.msra.mxu3 %v1835_v15 }
 0x3ee   :  { %1161 = vmatpush.bf16.msra.mxu2 %v1854_v24  ;;  %1211 = vmatpush.bf16.msra.mxu3 %v1843_v19 }
 0x3f2   :  { %1162 = vmatpush.bf16.msra.mxu2 %v1868_v29  ;;  %1212 = vmatpush.bf16.msra.mxu3 %v1850_v22 }
 0x3f6   :  { %1163 = vmatpush.bf16.msra.mxu2 %v1874_v33  ;;  %1213 = vmatpush.bf16.msra.mxu3 %v1857_v25 }
 0x3fa   :  { %1164 = vmatpush.bf16.msra.mxu2 %v1878_v35 }
 0x3fe   :  { %1165 = vmatpush.bf16.msra.mxu2 %v1883_v37 }
 0x45c   :  { %v808_v2 = vpop.f32.mrf.mxu3 }
 0x45d   :  { %v812_v6 = vadd.f32 %v808_v2, %v1970_v59 }
 0x45f   :  { %v1457_v7 = vmul.f32 -1.442695, %v812_v6 }
 0x461   :  { %1562 = vpow2.f32 %v1457_v7 }
 0x464   :  { %v759_v11 = vpop.f32.mrf.mxu2  ;;  %v810_v15 = vpop.f32.mrf.mxu3 }
 0x465   :  { %v763_v18 = vadd.f32 %v759_v11, %v187_v9 }
 0x467   :  { %v1563_v19 = vpop.eup %1562  ;;  %v1456_v21 = vmul.f32 -1.442695, %v763_v18 }
 0x468   :  { %v817_v22 = vadd.f32 1.0, %v1563_v19 }
 0x469   :  { %1564 = vpow2.f32 %v1456_v21 }
 0x46a   :  { %1566 = vrcp.f32 %v817_v22  ;;  %v829_v59 = vand.u32 2147483648, %v817_v22  ;;  %v827_v10 = vand.u32 2147483647, %v817_v22  ;;  %vm823_vm13 = vweird.f32 %v817_v22 }
 0x46c   :  { %v761_v24 = vpop.f32.mrf.mxu2  ;;  %v830_v14 = vor.u32 1.1754944e-38, %v829_v59  ;;  %vm828_vm15 = vcmp.eq.f32.partialorder %v827_v10, 8.507059e+37 }
 0x46f   :  { %v1565_v25 = vpop.eup %1564 }
 0x470   :  { %v1567_v29 = vpop.eup %1566  ;;  %v768_v33 = vadd.f32 1.0, %v1565_v25 }
 0x471   :  { %v819_v35 = vmul.f32 %v1567_v29, %v817_v22  ;;  %vm824_vm12 = vweird.f32 %v1567_v29  ;;  %v190_v22 = vadd.f32 %v1968_v56, %v2069_v61 }
 0x472   :  { %1568 = vrcp.f32 %v768_v33  ;;  %vm825_vm14 = vmor %vm823_vm13, %vm824_vm12  ;;  %v780_v4 = vand.u32 2147483648, %v768_v33  ;;  %v778_v8 = vand.u32 2147483647, %v768_v33  ;;  %vm774_vm1 = vweird.f32 %v768_v33 }
 0x473   :  { %v820_v37 = vsub.f32 1.0, %v819_v35  ;;  %1570 = vtanh.f32 %v812_v6 }
 0x474   :  { %1572 = vtanh.f32 %v763_v18  ;;  %v781_v13 = vor.u32 1.1754944e-38, %v780_v4  ;;  %vm779_vm3 = vcmp.eq.f32.partialorder %v778_v8, 8.507059e+37 }
 0x475   :  { %v821_v46 = vmul.f32 %v1567_v29, %v820_v37 }
 0x477   :  { %v822_v48 = vadd.f32 %v1567_v29, %v821_v46 }
 0x478   :  { %v1569_v50 = vpop.eup %1568 }
 0x479   :  { %v826_v55 = vsel %vm825_vm14, %v1567_v29, %v822_v48  ;;  %v770_v57 = vmul.f32 %v1569_v50, %v768_v33  ;;  %v1571_v58 = vpop.eup %1570  ;;  %vm775_vm0 = vweird.f32 %v1569_v50 }
 0x47a   :  { %v831_v16 = vsel %vm828_vm15, %v830_v14, %v826_v55  ;;  %vm776_vm2 = vmor %vm774_vm1, %vm775_vm0  ;;  %v1573_v20 = vpop.eup %1572 }
 0x47b   :  { %v833_v60 = vsel %vm1981_vm6, %v1571_v58, %v831_v16  ;;  %v771_v3 = vsub.f32 1.0, %v770_v57 }
 0x47c   :  { %841 = vrot.lane.b32.xlu2 %v833_v60, %s1753_s15  ;;  %837 = vrot.lane.b32.xlu1 %v833_v60, %s1752_s6 }
 0x47d   :  { %834 = vrot.lane.b32.xlu0 %v833_v60, %s1746_s9  ;;  %v772_v5 = vmul.f32 %v1569_v50, %v771_v3 }
 0x47f   :  { %v773_v12 = vadd.f32 %v1569_v50, %v772_v5 }
 0x481   :  { %v777_v17 = vsel %vm776_vm2, %v1569_v50, %v773_v12 }
 0x482   :  { %v782_v26 = vsel %vm779_vm3, %v781_v13, %v777_v17 }
 0x483   :  { %v784_v28 = vsel %vm1981_vm6, %v1573_v20, %v782_v26 }
 0x484   :  { %792 = vrot.lane.b32.xlu2 %v784_v28, %s1753_s15  ;;  %788 = vrot.lane.b32.xlu1 %v784_v28, %s1752_s6 }
 0x485   :  { %785 = vrot.lane.b32.xlu0 %v784_v28, %s1746_s9 }
 0x4d6   :  { %v842_v44 = vpop.permute.xlu2 %841 }
 0x4de   :  { %v793_v11 = vpop.permute.xlu2 %792 }
 0x4ee   :  { %v838_v31 = vpop.permute.xlu1 %837 }
 0x4ef   :  { %v835_v32 = vpop.permute.xlu0 %834  ;;  %v839_v34 = vmul.f32 %v838_v31, %v2090_v30 }
 0x4f0   :  { %v836_v36 = vmul.f32 %v835_v32, %v833_v60 }
 0x4f2   :  { %v2135_v38 = vadd.f32 %v839_v34, %v836_v36 }
 0x4f4   :  { %1574 = vtanh.f32 %v2135_v38 }
 0x4f6   :  { %v789_v1 = vpop.permute.xlu1 %788 }
 0x4f7   :  { %v786_v42 = vpop.permute.xlu0 %785  ;;  %v790_v43 = vmul.f32 %v789_v1, %v2094_v40 }
 0x4f8   :  { %v787_v52 = vmul.f32 %v786_v42, %v784_v28 }
 0x4fa   :  { %v1575_v2 = vpop.eup %1574  ;;  %v2139_v6 = vadd.f32 %v790_v43, %v787_v52 }
 0x4fb   :  { %v2141_v7 = vmul.f32 %v1575_v2, %v842_v44 }
 0x4fc   :  { %1576 = vtanh.f32 %v2139_v6 }
 0x4fd   :  { %v900_v30 = vpack.c.bf16 %v2141_v7, %v2141_v7 }
 0x4ff   :  { %909 = vmatmul.bf16.vlgmr.msra.gmra.mxu1 %v900_v30 }
 0x502   :  { %v1577_v9 = vpop.eup %1576 }
 0x503   :  { %v2146_v15 = vmul.f32 %v1577_v9, %v793_v11 }
 0x505   :  { %v851_v40 = vpack.c.bf16 %v2146_v15, %v2146_v15 }
 0x507   :  { %860 = vmatmul.bf16.vlgmr.msra.gmra.mxu0 %v851_v40 }
 0x57c   :  { %v910_v18 = vpop.f32.mrf.mxu1 }
 0x57d   :  { %v914_v19 = vadd.f32 %v910_v18, %v1963_v54 }
 0x57f   :  { %v1460_v21 = vmul.f32 -1.442695, %v914_v19 }
 0x581   :  { %1578 = vpow2.f32 %v1460_v21 }
 0x584   :  { %v861_v24 = vpop.f32.mrf.mxu0  ;;  %v912_v25 = vpop.f32.mrf.mxu1 }
 0x585   :  { %v865_v29 = vadd.f32 %v861_v24, %v190_v22 }
 0x587   :  { %v1579_v33 = vpop.eup %1578  ;;  %v1459_v35 = vmul.f32 -1.442695, %v865_v29 }
 0x588   :  { %v919_v37 = vadd.f32 1.0, %v1579_v33 }
 0x589   :  { %1580 = vpow2.f32 %v1459_v35 }
 0x58a   :  { %1582 = vrcp.f32 %v919_v37  ;;  %v931_v14 = vand.u32 2147483648, %v919_v37  ;;  %v929_v61 = vand.u32 2147483647, %v919_v37  ;;  %vm925_vm5 = vweird.f32 %v919_v37 }
 0x58c   :  { %v863_v59 = vpop.f32.mrf.mxu0  ;;  %v932_v16 = vor.u32 1.1754944e-38, %v931_v14  ;;  %vm930_vm8 = vcmp.eq.f32.partialorder %v929_v61, 8.507059e+37 }
 0x58f   :  { %v1581_v46 = vpop.eup %1580 }
 0x590   :  { %v1583_v10 = vpop.eup %1582  ;;  %v870_v48 = vadd.f32 1.0, %v1581_v46 }
 0x591   :  { %v921_v50 = vmul.f32 %v1583_v10, %v919_v37  ;;  %vm926_vm4 = vweird.f32 %v1583_v10  ;;  %v192_v37 = vadd.f32 %v1968_v56, %v2071_v62 }
 0x592   :  { %1584 = vrcp.f32 %v870_v48  ;;  %vm927_vm7 = vmor %vm925_vm5, %vm926_vm4  ;;  %v882_v13 = vand.u32 2147483648, %v870_v48  ;;  %v880_v20 = vand.u32 2147483647, %v870_v48  ;;  %vm876_vm10 = vweird.f32 %v870_v48 }
 0x593   :  { %v922_v54 = vsub.f32 1.0, %v921_v50  ;;  %1586 = vtanh.f32 %v914_v19 }
 0x594   :  { %1588 = vtanh.f32 %v865_v29  ;;  %v883_v28 = vor.u32 1.1754944e-38, %v882_v13  ;;  %vm881_vm12 = vcmp.eq.f32.partialorder %v880_v20, 8.507059e+37 }
 0x595   :  { %v923_v55 = vmul.f32 %v1583_v10, %v922_v54 }
 0x597   :  { %v924_v57 = vadd.f32 %v1583_v10, %v923_v55 }
 0x598   :  { %v1585_v58 = vpop.eup %1584 }
 0x599   :  { %v928_v60 = vsel %vm927_vm7, %v1583_v10, %v924_v57  ;;  %v872_v3 = vmul.f32 %v1585_v58, %v870_v48  ;;  %v1587_v4 = vpop.eup %1586  ;;  %vm877_vm9 = vweird.f32 %v1585_v58 }
 0x59a   :  { %v933_v5 = vsel %vm930_vm8, %v932_v16, %v928_v60  ;;  %vm878_vm11 = vmor %vm876_vm10, %vm877_vm9  ;;  %v1589_v32 = vpop.eup %1588 }
 0x59b   :  { %v935_v8 = vsel %vm1981_vm6, %v1587_v4, %v933_v5  ;;  %v873_v12 = vsub.f32 1.0, %v872_v3 }
 0x59c   :  { %943 = vrot.lane.b32.xlu2 %v935_v8, %s1753_s15  ;;  %939 = vrot.lane.b32.xlu1 %v935_v8, %s1752_s6 }
 0x59d   :  { %936 = vrot.lane.b32.xlu0 %v935_v8, %s1746_s9  ;;  %v874_v17 = vmul.f32 %v1585_v58, %v873_v12 }
 0x59f   :  { %v875_v26 = vadd.f32 %v1585_v58, %v874_v17 }
 0x5a1   :  { %v879_v31 = vsel %vm878_vm11, %v1585_v58, %v875_v26 }
 0x5a2   :  { %v884_v34 = vsel %vm881_vm12, %v883_v28, %v879_v31 }
 0x5a3   :  { %v886_v36 = vsel %vm1981_vm6, %v1589_v32, %v884_v34 }
 0x5a4   :  { %894 = vrot.lane.b32.xlu2 %v886_v36, %s1753_s15  ;;  %890 = vrot.lane.b32.xlu1 %v886_v36, %s1752_s6 }
 0x5a5   :  { %887 = vrot.lane.b32.xlu0 %v886_v36, %s1746_s9 }
 0x5f6   :  { %v944_v11 = vpop.permute.xlu2 %943 }
 0x5fe   :  { %v895_v24 = vpop.permute.xlu2 %894 }
 0x60e   :  { %v940_v1 = vpop.permute.xlu1 %939 }
 0x60f   :  { %v937_v42 = vpop.permute.xlu0 %936  ;;  %v941_v43 = vmul.f32 %v940_v1, %v2135_v38 }
 0x610   :  { %v938_v44 = vmul.f32 %v937_v42, %v935_v8 }
 0x612   :  { %v2164_v52 = vadd.f32 %v941_v43, %v938_v44 }
 0x614   :  { %1590 = vtanh.f32 %v2164_v52 }
 0x616   :  { %v891_v2 = vpop.permute.xlu1 %890 }
 0x617   :  { %v888_v30 = vpop.permute.xlu0 %887  ;;  %v892_v9 = vmul.f32 %v891_v2, %v2139_v6 }
 0x618   :  { %v889_v40 = vmul.f32 %v888_v30, %v886_v36 }
 0x61a   :  { %v1591_v18 = vpop.eup %1590  ;;  %v2168_v19 = vadd.f32 %v892_v9, %v889_v40 }
 0x61b   :  { %v2170_v21 = vmul.f32 %v1591_v18, %v944_v11 }
 0x61c   :  { %1592 = vtanh.f32 %v2168_v19 }
 0x61d   :  { %v1002_v38 = vpack.c.bf16 %v2170_v21, %v2170_v21 }
 0x61f   :  { %1011 = vmatmul.bf16.vlgmr.msrb.gmra.mxu3 %v1002_v38 }
 0x622   :  { %v1593_v22 = vpop.eup %1592 }
 0x623   :  { %v2175_v25 = vmul.f32 %v1593_v22, %v895_v24 }
 0x625   :  { %v953_v6 = vpack.c.bf16 %v2175_v25, %v2175_v25 }
 0x627   :  { %962 = vmatmul.bf16.vlgmr.msrb.gmra.mxu2 %v953_v6 }
 0x6a2   :  { %v1012_v29 = vpop.f32.mrf.mxu3 }
 0x6a3   :  { %v1016_v33 = vadd.f32 %v1012_v29, %v1961_v51 }
 0x6a5   :  { %v1463_v35 = vmul.f32 -1.442695, %v1016_v33 }
 0x6a7   :  { %1594 = vpow2.f32 %v1463_v35 }
 0x6aa   :  { %v963_v59 = vpop.f32.mrf.mxu2  ;;  %v1014_v46 = vpop.f32.mrf.mxu3 }
 0x6ab   :  { %v967_v10 = vadd.f32 %v963_v59, %v192_v37 }
 0x6ad   :  { %v1595_v48 = vpop.eup %1594  ;;  %v1462_v50 = vmul.f32 -1.442695, %v967_v10 }
 0x6ae   :  { %v1021_v54 = vadd.f32 1.0, %v1595_v48 }
 0x6af   :  { %1596 = vpow2.f32 %v1462_v50  ;;  %v2212_v50 = vld [vmem:[%s2344_s3] ss:$0 sm:$0xff] }
 0x6b0   :  { %1598 = vrcp.f32 %v1021_v54  ;;  %v1033_v16 = vand.u32 2147483648, %v1021_v54  ;;  %v1031_v56 = vand.u32 2147483647, %v1021_v54  ;;  %vm1027_vm14 = vweird.f32 %v1021_v54 }
 0x6b2   :  { %v965_v14 = vpop.f32.mrf.mxu2  ;;  %v1034_v4 = vor.u32 1.1754944e-38, %v1033_v16  ;;  %vm1032_vm0 = vcmp.eq.f32.partialorder %v1031_v56, 8.507059e+37 }
 0x6b5   :  { %v1597_v55 = vpop.eup %1596 }
 0x6b6   :  { %v1599_v61 = vpop.eup %1598  ;;  %v972_v57 = vadd.f32 1.0, %v1597_v55 }
 0x6b7   :  { %v1023_v58 = vmul.f32 %v1599_v61, %v1021_v54  ;;  %vm1028_vm13 = vweird.f32 %v1599_v61  ;;  %v195_v54 = vadd.f32 %v2212_v50, %v2073_v63 }
 0x6b8   :  { %1600 = vrcp.f32 %v972_v57  ;;  %vm1029_vm15 = vmor %vm1027_vm14, %vm1028_vm13  ;;  %v984_v26 = vand.u32 2147483648, %v972_v57  ;;  %v982_v31 = vand.u32 2147483647, %v972_v57  ;;  %vm978_vm2 = vweird.f32 %v972_v57 }
 0x6b9   :  { %v1024_v51 = vsub.f32 1.0, %v1023_v58  ;;  %1602 = vtanh.f32 %v1016_v33 }
 0x6ba   :  { %1604 = vtanh.f32 %v967_v10  ;;  %v985_v34 = vor.u32 1.1754944e-38, %v984_v26  ;;  %vm983_vm4 = vcmp.eq.f32.partialorder %v982_v31, 8.507059e+37 }
 0x6bb   :  { %v1025_v60 = vmul.f32 %v1599_v61, %v1024_v51 }
 0x6bd   :  { %v1026_v62 = vadd.f32 %v1599_v61, %v1025_v60 }
 0x6be   :  { %v1601_v3 = vpop.eup %1600 }
 0x6bf   :  { %v1030_v5 = vsel %vm1029_vm15, %v1599_v61, %v1026_v62  ;;  %v974_v8 = vmul.f32 %v1601_v3, %v972_v57  ;;  %v1603_v12 = vpop.eup %1602  ;;  %vm979_vm1 = vweird.f32 %v1601_v3 }
 0x6c0   :  { %v1035_v13 = vsel %vm1032_vm0, %v1034_v4, %v1030_v5  ;;  %vm980_vm3 = vmor %vm978_vm2, %vm979_vm1  ;;  %v1605_v1 = vpop.eup %1604 }
 0x6c1   :  { %v1037_v17 = vsel %vm1981_vm6, %v1603_v12, %v1035_v13  ;;  %v975_v20 = vsub.f32 1.0, %v974_v8 }
 0x6c2   :  { %1045 = vrot.lane.b32.xlu2 %v1037_v17, %s1753_s15  ;;  %1041 = vrot.lane.b32.xlu1 %v1037_v17, %s1752_s6 }
 0x6c3   :  { %1038 = vrot.lane.b32.xlu0 %v1037_v17, %s1746_s9  ;;  %v976_v28 = vmul.f32 %v1601_v3, %v975_v20 }
 0x6c5   :  { %v977_v32 = vadd.f32 %v1601_v3, %v976_v28 }
 0x6c7   :  { %v981_v36 = vsel %vm980_vm3, %v1601_v3, %v977_v32 }
 0x6c8   :  { %v986_v42 = vsel %vm983_vm4, %v985_v34, %v981_v36 }
 0x6c9   :  { %v988_v43 = vsel %vm1981_vm6, %v1605_v1, %v986_v42 }
 0x6ca   :  { %996 = vrot.lane.b32.xlu2 %v988_v43, %s1753_s15  ;;  %992 = vrot.lane.b32.xlu1 %v988_v43, %s1752_s6 }
 0x6cb   :  { %989 = vrot.lane.b32.xlu0 %v988_v43, %s1746_s9 }
 0x71c   :  { %v1046_v22 = vpop.permute.xlu2 %1045 }
 0x724   :  { %v997_v37 = vpop.permute.xlu2 %996 }
 0x734   :  { %v1042_v44 = vpop.permute.xlu1 %1041 }
 0x735   :  { %v1039_v2 = vpop.permute.xlu0 %1038  ;;  %v1043_v30 = vmul.f32 %v1042_v44, %v2164_v52 }
 0x736   :  { %v1040_v9 = vmul.f32 %v1039_v2, %v1037_v17 }
 0x738   :  { %v2193_v11 = vadd.f32 %v1043_v30, %v1040_v9 }
 0x73a   :  { %1606 = vtanh.f32 %v2193_v11 }
 0x73c   :  { %v993_v40 = vpop.permute.xlu1 %992 }
 0x73d   :  { %v990_v18 = vpop.permute.xlu0 %989  ;;  %v994_v38 = vmul.f32 %v993_v40, %v2168_v19 }
 0x73e   :  { %v991_v24 = vmul.f32 %v990_v18, %v988_v43 }
 0x740   :  { %v1607_v6 = vpop.eup %1606  ;;  %v2197_v29 = vadd.f32 %v994_v38, %v991_v24 }
 0x741   :  { %v2199_v33 = vmul.f32 %v1607_v6, %v1046_v22 }
 0x742   :  { %1608 = vtanh.f32 %v2197_v29 }
 0x743   :  { %v1104_v52 = vpack.c.bf16 %v2199_v33, %v2199_v33 }
 0x745   :  { %1113 = vmatmul.bf16.vlgmr.msrb.gmra.mxu1 %v1104_v52 }
 0x748   :  { %v1609_v35 = vpop.eup %1608 }
 0x749   :  { %v2204_v59 = vmul.f32 %v1609_v35, %v997_v37 }
 0x74b   :  { %v1055_v19 = vpack.c.bf16 %v2204_v59, %v2204_v59 }
 0x74d   :  { %1064 = vmatmul.bf16.vlgmr.msrb.gmra.mxu0 %v1055_v19 }
 0x7c2   :  { %v1114_v46 = vpop.f32.mrf.mxu1 }
 0x7c3   :  { %v1118_v10 = vadd.f32 %v1114_v46, %v1959_v49 }
 0x7c5   :  { %v1466_v48 = vmul.f32 -1.442695, %v1118_v10 }
 0x7c7   :  { %1610 = vpow2.f32 %v1466_v48 }
 0x7ca   :  { %v1065_v14 = vpop.f32.mrf.mxu0  ;;  %v1116_v55 = vpop.f32.mrf.mxu1 }
 0x7cb   :  { %v1069_v61 = vadd.f32 %v1065_v14, %v195_v54 }
 0x7cd   :  { %v1611_v57 = vpop.eup %1610  ;;  %v1465_v58 = vmul.f32 -1.442695, %v1069_v61 }
 0x7ce   :  { %v1123_v51 = vadd.f32 1.0, %v1611_v57 }
 0x7cf   :  { %1612 = vpow2.f32 %v1465_v58 }
 0x7d0   :  { %1614 = vrcp.f32 %v1123_v51  ;;  %v1135_v4 = vand.u32 2147483648, %v1123_v51  ;;  %v1133_v63 = vand.u32 2147483647, %v1123_v51  ;;  %vm1129_vm7 = vweird.f32 %v1123_v51 }
 0x7d2   :  { %v1067_v16 = vpop.f32.mrf.mxu0  ;;  %v1136_v13 = vor.u32 1.1754944e-38, %v1135_v4  ;;  %vm1134_vm9 = vcmp.eq.f32.partialorder %v1133_v63, 8.507059e+37 }
 0x7d5   :  { %v1613_v49 = vpop.eup %1612 }
 0x7d6   :  { %v1615_v60 = vpop.eup %1614  ;;  %v1074_v56 = vadd.f32 1.0, %v1613_v49 }
 0x7d7   :  { %v1125_v62 = vmul.f32 %v1615_v60, %v1123_v51  ;;  %vm1130_vm5 = vweird.f32 %v1615_v60  ;;  %v197_v51 = vadd.f32 %v2212_v50, %v2075_v0 }
 0x7d8   :  { %1616 = vrcp.f32 %v1074_v56  ;;  %vm1131_vm8 = vmor %vm1129_vm7, %vm1130_vm5  ;;  %v1086_v34 = vand.u32 2147483648, %v1074_v56  ;;  %v1084_v1 = vand.u32 2147483647, %v1074_v56  ;;  %vm1080_vm11 = vweird.f32 %v1074_v56 }
 0x7d9   :  { %v1126_v3 = vsub.f32 1.0, %v1125_v62  ;;  %1618 = vtanh.f32 %v1118_v10  ;;  %vm1287_vm7 = vcmp.lt.s32.totalorder %v1977_v23, 32 }
 0x7da   :  { %1620 = vtanh.f32 %v1069_v61  ;;  %v1087_v43 = vor.u32 1.1754944e-38, %v1086_v34  ;;  %vm1085_vm13 = vcmp.eq.f32.partialorder %v1084_v1, 8.507059e+37 }
 0x7db   :  { %v1127_v5 = vmul.f32 %v1615_v60, %v1126_v3 }
 0x7dd   :  { %v1128_v8 = vadd.f32 %v1615_v60, %v1127_v5 }
 0x7de   :  { %v1617_v12 = vpop.eup %1616 }
 0x7df   :  { %v1132_v17 = vsel %vm1131_vm8, %v1615_v60, %v1128_v8  ;;  %v1076_v20 = vmul.f32 %v1617_v12, %v1074_v56  ;;  %v1619_v26 = vpop.eup %1618  ;;  %vm1081_vm10 = vweird.f32 %v1617_v12 }
 0x7e0   :  { %v1137_v28 = vsel %vm1134_vm9, %v1136_v13, %v1132_v17  ;;  %vm1082_vm12 = vmor %vm1080_vm11, %vm1081_vm10  ;;  %v1621_v2 = vpop.eup %1620 }
 0x7e1   :  { %v1139_v31 = vsel %vm1981_vm6, %v1619_v26, %v1137_v28  ;;  %v1077_v32 = vsub.f32 1.0, %v1076_v20 }
 0x7e2   :  { %1147 = vrot.lane.b32.xlu2 %v1139_v31, %s1753_s15  ;;  %1143 = vrot.lane.b32.xlu1 %v1139_v31, %s1752_s6 }
 0x7e3   :  { %1140 = vrot.lane.b32.xlu0 %v1139_v31, %s1746_s9  ;;  %v1078_v36 = vmul.f32 %v1617_v12, %v1077_v32 }
 0x7e5   :  { %v1079_v42 = vadd.f32 %v1617_v12, %v1078_v36 }
 0x7e7   :  { %v1083_v44 = vsel %vm1082_vm12, %v1617_v12, %v1079_v42 }
 0x7e8   :  { %v1088_v30 = vsel %vm1085_vm13, %v1087_v43, %v1083_v44 }
 0x7e9   :  { %v1090_v9 = vsel %vm1981_vm6, %v1621_v2, %v1088_v30 }
 0x7ea   :  { %1098 = vrot.lane.b32.xlu2 %v1090_v9, %s1753_s15  ;;  %1094 = vrot.lane.b32.xlu1 %v1090_v9, %s1752_s6 }
 0x7eb   :  { %1091 = vrot.lane.b32.xlu0 %v1090_v9, %s1746_s9 }
 0x83c   :  { %v1148_v37 = vpop.permute.xlu2 %1147 }
 0x844   :  { %v1099_v14 = vpop.permute.xlu2 %1098 }
 0x854   :  { %v1144_v40 = vpop.permute.xlu1 %1143 }
 0x855   :  { %v1141_v18 = vpop.permute.xlu0 %1140  ;;  %v1145_v38 = vmul.f32 %v1144_v40, %v2193_v11 }
 0x856   :  { %v1142_v22 = vmul.f32 %v1141_v18, %v1139_v31 }
 0x858   :  { %v2227_v24 = vadd.f32 %v1145_v38, %v1142_v22 }
 0x85a   :  { %1622 = vtanh.f32 %v2227_v24 }
 0x85c   :  { %v1095_v6 = vpop.permute.xlu1 %1094 }
 0x85d   :  { %v1092_v52 = vpop.permute.xlu0 %1091  ;;  %v1096_v35 = vmul.f32 %v1095_v6, %v2197_v29 }
 0x85e   :  { %v1093_v19 = vmul.f32 %v1092_v52, %v1090_v9 }
 0x860   :  { %v1623_v46 = vpop.eup %1622  ;;  %v2231_v10 = vadd.f32 %v1096_v35, %v1093_v19 }
 0x861   :  { %v2233_v48 = vmul.f32 %v1623_v46, %v1148_v37 }
 0x862   :  { %1624 = vtanh.f32 %v2231_v10 }
 0x863   :  { %v1205_v11 = vpack.c.bf16 %v2233_v48, %v2233_v48 }
 0x865   :  { %1214 = vmatmul.bf16.vlgmr.msra.gmra.mxu3 %v1205_v11 }
 0x868   :  { %v1625_v54 = vpop.eup %1624 }
 0x869   :  { %v2238_v55 = vmul.f32 %v1625_v54, %v1099_v14 }
 0x86b   :  { %v1157_v29 = vpack.c.bf16 %v2238_v55, %v2238_v55 }
 0x86d   :  { %1166 = vmatmul.bf16.vlgmr.msra.gmra.mxu2 %v1157_v29 }
 0x8e8   :  { %v1215_v61 = vpop.f32.mrf.mxu3 }
 0x8e9   :  { %v1219_v57 = vadd.f32 %v1215_v61, %v1957_v47 }
 0x8eb   :  { %v1469_v58 = vmul.f32 -1.442695, %v1219_v57 }
 0x8ed   :  { %1626 = vpow2.f32 %v1469_v58 }
 0x8f0   :  { %v1167_v16 = vpop.f32.mrf.mxu2  ;;  %v1217_v49 = vpop.f32.mrf.mxu3 }
 0x8f1   :  { %v1171_v60 = vadd.f32 %v1167_v16, %v197_v51 }
 0x8f3   :  { %v1627_v56 = vpop.eup %1626  ;;  %v1468_v62 = vmul.f32 -1.442695, %v1171_v60 }
 0x8f4   :  { %v1224_v3 = vadd.f32 1.0, %v1627_v56 }
 0x8f5   :  { %1628 = vpow2.f32 %v1468_v62 }
 0x8f6   :  { %1630 = vrcp.f32 %v1224_v3  ;;  %v1236_v13 = vand.u32 2147483648, %v1224_v3  ;;  %v1234_v0 = vand.u32 2147483647, %v1224_v3  ;;  %vm1230_vm15 = vweird.f32 %v1224_v3 }
 0x8f8   :  { %v1169_v4 = vpop.f32.mrf.mxu2  ;;  %v1237_v26 = vor.u32 1.1754944e-38, %v1236_v13  ;;  %vm1235_vm1 = vcmp.eq.f32.partialorder %v1234_v0, 8.507059e+37 }
 0x8fb   :  { %v1629_v5 = vpop.eup %1628 }
 0x8fc   :  { %v1631_v63 = vpop.eup %1630  ;;  %v1176_v8 = vadd.f32 1.0, %v1629_v5 }
 0x8fd   :  { %v1226_v12 = vmul.f32 %v1631_v63, %v1224_v3  ;;  %vm1231_vm14 = vweird.f32 %v1631_v63 }
 0x8fe   :  { %1632 = vrcp.f32 %v1176_v8  ;;  %vm1232_vm0 = vmor %vm1230_vm15, %vm1231_vm14  ;;  %v1188_v42 = vand.u32 2147483648, %v1176_v8  ;;  %v1186_v44 = vand.u32 2147483647, %v1176_v8  ;;  %vm1182_vm3 = vweird.f32 %v1176_v8 }
 0x8ff   :  { %v1227_v47 = vsub.f32 1.0, %v1226_v12  ;;  %1634 = vtanh.f32 %v1219_v57 }
 0x900   :  { %1636 = vtanh.f32 %v1171_v60  ;;  %v1189_v30 = vor.u32 1.1754944e-38, %v1188_v42  ;;  %vm1187_vm5 = vcmp.eq.f32.partialorder %v1186_v44, 8.507059e+37 }
 0x901   :  { %v1228_v17 = vmul.f32 %v1631_v63, %v1227_v47 }
 0x903   :  { %v1229_v50 = vadd.f32 %v1631_v63, %v1228_v17 }
 0x904   :  { %v1633_v20 = vpop.eup %1632 }
 0x905   :  { %v1233_v28 = vsel %vm1232_vm0, %v1631_v63, %v1229_v50  ;;  %v1178_v31 = vmul.f32 %v1633_v20, %v1176_v8  ;;  %v1635_v32 = vpop.eup %1634  ;;  %vm1183_vm2 = vweird.f32 %v1633_v20 }
 0x906   :  { %v1238_v34 = vsel %vm1235_vm1, %v1237_v26, %v1233_v28  ;;  %vm1184_vm4 = vmor %vm1182_vm3, %vm1183_vm2  ;;  %v1637_v40 = vpop.eup %1636 }
 0x907   :  { %v1240_v36 = vsel %vm1981_vm6, %v1635_v32, %v1238_v34  ;;  %v1179_v1 = vsub.f32 1.0, %v1178_v31 }
 0x908   :  { %1248 = vrot.lane.b32.xlu2 %v1240_v36, %s1753_s15  ;;  %1244 = vrot.lane.b32.xlu1 %v1240_v36, %s1752_s6 }
 0x909   :  { %1241 = vrot.lane.b32.xlu0 %v1240_v36, %s1746_s9  ;;  %v1180_v43 = vmul.f32 %v1633_v20, %v1179_v1 }
 0x90b   :  { %v1181_v2 = vadd.f32 %v1633_v20, %v1180_v43 }
 0x90d   :  { %v1185_v9 = vsel %vm1184_vm4, %v1633_v20, %v1181_v2 }
 0x90e   :  { %v1190_v18 = vsel %vm1187_vm5, %v1189_v30, %v1185_v9 }
 0x90f   :  { %v1192_v38 = vsel %vm1981_vm6, %v1637_v40, %v1190_v18  ;;  %vm1288_vm6 = vcmp.lt.s32.totalorder %v1977_v23, 64 }
 0x910   :  { %1200 = vrot.lane.b32.xlu2 %v1192_v38, %s1753_s15  ;;  %1196 = vrot.lane.b32.xlu1 %v1192_v38, %s1752_s6 }
 0x911   :  { %1193 = vrot.lane.b32.xlu0 %v1192_v38, %s1746_s9 }
 0x918   :  { %1275 = vrot.lane.b32.xlu2 %v2199_v33, %s1753_s15  ;;  %1273 = vrot.lane.b32.xlu1 %v2233_v48, %s1753_s15 }
 0x919   :  { %1277 = vrot.lane.b32.xlu0 %v2170_v21, %s1753_s15 }
 0x920   :  { %1281 = vrot.lane.b32.xlu2 %v2096_v41, %s1753_s15  ;;  %1279 = vrot.lane.b32.xlu1 %v2141_v7, %s1753_s15 }
 0x928   :  { %1285 = vrot.lane.b32.xlu1 %v2001_v27, %s1753_s15 }
 0x962   :  { %v1249_v39 = vpop.permute.xlu2 %1248 }
 0x96a   :  { %v1201_v22 = vpop.permute.xlu2 %1200 }
 0x972   :  { %v1276_v33 = vpop.permute.xlu2 %1275 }
 0x973   :  { %v1291_v6 = vsel %vm1288_vm6, %v1276_v33, 0.0 }
 0x974   :  { %v1299_v41 = vsel %vm1287_vm7, %v2102_v45, %v1291_v6 }
 0x975   :  { %1307 = vst [vmem:[%s2348_s7 + $0x10] sm:$0xff] %v1299_v41 }
 0x97a   :  { %v1282_v7 = vpop.permute.xlu2 %1281  ;;  %v1245_v27 = vpop.permute.xlu1 %1244 }
 0x97b   :  { %v1242_v21 = vpop.permute.xlu0 %1241  ;;  %v1294_v52 = vsel %vm1288_vm6, %v1282_v7, 0.0  ;;  %v1246_v35 = vmul.f32 %v1245_v27, %v2227_v24 }
 0x97c   :  { %v1243_v37 = vmul.f32 %v1242_v21, %v1240_v36  ;;  %v1302_v19 = vsel %vm1287_vm7, %v2204_v59, %v1294_v52  ;;  %v1256_v59 = vld [vmem:[%s2348_s7 + $0x8] sm:$0xff] }
 0x97d   :  { %1310 = vst [vmem:[%s2348_s7 + $0x28] sm:$0xff] %v1302_v19 }
 0x97e   :  { %v1247_v45 = vadd.f32 %v1246_v35, %v1243_v37 }
 0x980   :  { %1638 = vtanh.f32 %v1247_v45 }
 0x982   :  { %v1197_v46 = vpop.permute.xlu1 %1196 }
 0x983   :  { %v1194_v48 = vpop.permute.xlu0 %1193  ;;  %v1198_v29 = vmul.f32 %v1197_v46, %v2231_v10 }
 0x984   :  { %v1195_v14 = vmul.f32 %v1194_v48, %v1192_v38 }
 0x986   :  { %v1639_v11 = vpop.eup %1638  ;;  %v1199_v16 = vadd.f32 %v1198_v29, %v1195_v14 }
 0x987   :  { %v1251_v54 = vmul.f32 %v1639_v11, %v1249_v39 }
 0x988   :  { %1640 = vtanh.f32 %v1199_v16 }
 0x989   :  { %1271 = vrot.lane.b32.xlu0 %v1251_v54, %s1753_s15 }
 0x98a   :  { %v1274_v24 = vpop.permute.xlu1 %1273 }
 0x98b   :  { %v1278_v61 = vpop.permute.xlu0 %1277  ;;  %v1290_v57 = vsel %vm1288_vm6, %v1274_v24, 0.0 }
 0x98c   :  { %v1292_v58 = vsel %vm1288_vm6, %v1278_v61, 0.0  ;;  %v1298_v51 = vsel %vm1287_vm7, %v1256_v59, %v1290_v57 }
 0x98d   :  { %v1300_v10 = vsel %vm1287_vm7, %v2146_v15, %v1292_v58  ;;  %1306 = vst [vmem:[%s2348_s7 + $0x8] sm:$0xff] %v1298_v51 }
 0x98e   :  { %1308 = vst [vmem:[%s2348_s7 + $0x18] sm:$0xff] %v1300_v10  ;;  %v1641_v56 = vpop.eup %1640 }
 0x98f   :  { %v1203_v62 = vmul.f32 %v1641_v56, %v1201_v22 }
 0x991   :  { %1283 = vrot.lane.b32.xlu0 %v2043_v53, %s1753_s15 }
 0x992   :  { %v1280_v49 = vpop.permute.xlu1 %1279 }
 0x993   :  { %v1293_v60 = vsel %vm1288_vm6, %v1280_v49, 0.0 }
 0x994   :  { %v1301_v15 = vsel %vm1287_vm7, %v2175_v25, %v1293_v60  ;;  %v1255_v25 = vld [vmem:[%s2348_s7] sm:$0xff] }
 0x995   :  { %1309 = vst [vmem:[%s2348_s7 + $0x20] sm:$0xff] %v1301_v15 }
 0x99a   :  { %v1286_v3 = vpop.permute.xlu1 %1285 }
 0x99b   :  { %v1296_v4 = vsel %vm1288_vm6, %v1286_v3, 0.0 }
 0x99c   :  { %v1304_v53 = vsel %vm1287_vm7, %v1203_v62, %v1296_v4 }
 0x99d   :  { %1312 = vst [vmem:[%s2348_s7 + $0x38] sm:$0xff] %v1304_v53 }
 0x9fb   :  { %v1272_v5 = vpop.permute.xlu0 %1271 }
 0x9fc   :  { %v1289_v63 = vsel %vm1288_vm6, %v1272_v5, 0.0 }
 0x9fd   :  { %v1297_v8 = vsel %vm1287_vm7, %v1255_v25, %v1289_v63 }
 0x9fe   :  { %1305 = vst [vmem:[%s2348_s7] sm:$0xff] %v1297_v8 }
 0xa03   :  { %v1284_v12 = vpop.permute.xlu0 %1283 }
 0xa04   :  { %v1295_v47 = vsel %vm1288_vm6, %v1284_v12, 0.0 }
 0xa05   :  { %v1303_v13 = vsel %vm1287_vm7, %v2238_v55, %v1295_v47 }
 0xa06   :  { %1311 = vst [vmem:[%s2348_s7 + $0x30] sm:$0xff] %v1303_v13 }
 0xa07   :  { %1317 = vsyncpa [#allocation6], 1 }
 0xa08   :  { %1318 = vsyncpa [#allocation8], 1 }
 0xa09   :  { %1319 = vsyncpa [#allocation11], 1 }

// kernel: word_lstm_forward.3
= control target key start
LH: loop header
LB: loop body
LE: loop exit
PB: predicated region body
PF: predicated region fallthrough
CT: control target
= control target key end

     0   :  { %v1572_v31 = vmov 0   ;;  %s2239_s4 = inlined_call_operand.vmem [shape: bf16[128,128], index: 4, kind: input, shape index: {}]   ;;  %s2240_s5 = inlined_call_operand.vmem [shape: bf16[128,128], index: 5, kind: input, shape index: {}]   ;;  %s2241_s6 = inlined_call_operand.vmem [shape: f32[1,128], index: 6, kind: input, shape index: {}]   ;;  %s2242_s2 = inlined_call_operand.vmem [shape: bf16[128,128], index: 2, kind: input, shape index: {}]   ;;  %s2243_s0 = inlined_call_operand.vmem [shape: f32[8,8,128], index: 0, kind: input, shape index: {}]   ;;  %s2244_s1 = inlined_call_operand.vmem [shape: bf16[128,128], index: 1, kind: input, shape index: {}]   ;;  %s2245_s3 = inlined_call_operand.vmem [shape: f32[1,128], index: 3, kind: input, shape index: {}]   ;;  %s2246_s7 = inlined_call_operand.vmem [shape: f32[8,8,128], index: 7, kind: output, shape index: {}]  }
   0x1   :  { %v1420_v0 = vld [vmem:[%s2239_s4 + $0x38] sm:$0xff]  ;;  %v1419_v1 = vld [vmem:[%s2239_s4 + $0x30] sm:$0xff]  ;;  %v1418_v3 = vld [vmem:[%s2239_s4 + $0x28] sm:$0xff] }
   0x2   :  { %212 = vmatpush.bf16.msra.mxu1 %v1420_v0  ;;  %v1625_v2 = vld [vmem:[%s2240_s5 + $0x38] sm:$0xff]  ;;  %v1417_v4 = vld [vmem:[%s2239_s4 + $0x20] sm:$0xff]  ;;  %v1640_v6 = vld [vmem:[%s2240_s5 + $0x30] sm:$0xff] }
   0x3   :  { %431 = vmatpush.bf16.msra.mxu3 %v1625_v2  ;;  %v1416_v5 = vld [vmem:[%s2239_s4 + $0x18] sm:$0xff]  ;;  %v1415_v8 = vld [vmem:[%s2239_s4 + $0x10] sm:$0xff]  ;;  %v1654_v9 = vld [vmem:[%s2240_s5 + $0x28] sm:$0xff] }
   0x4   :  { %v1645_v7 = vld [vmem:[%s2242_s2 + $0x38] sm:$0xff]  ;;  %v1414_v10 = vld [vmem:[%s2239_s4 + $0x8] sm:$0xff]  ;;  %v1664_v11 = vld [vmem:[%s2240_s5 + $0x20] sm:$0xff] }
   0x5   :  { %335 = vmatpush.bf16.msra.mxu2 %v1645_v7  ;;  %v1413_v12 = vld [vmem:[%s2239_s4] sm:$0xff]  ;;  %v28_v14 = vld [vmem:[%s2243_s0 + $0x8] sm:$0xff]  ;;  %v1679_v15 = vld [vmem:[%s2240_s5 + $0x18] sm:$0xff]  ;;  %s1575_s4 = smov 64  }
   0x6   :  { %213 = vmatpush.bf16.msra.mxu1 %v1419_v1  ;;  %v27_v13 = vld [vmem:[%s2243_s0] sm:$0xff]  ;;  %v1412_v17 = vld [vmem:[%s2244_s1 + $0x38] sm:$0xff]  ;;  %v1691_v18 = vld [vmem:[%s2242_s2 + $0x30] sm:$0xff] }
   0x7   :  { %432 = vmatpush.bf16.msra.mxu3 %v1640_v6  ;;  %v1681_v16 = vpack.c.bf16 %v28_v14, %v27_v13  ;;  %v1696_v19 = vld [vmem:[%s2240_s5 + $0x10] sm:$0xff]  ;;  %107 = vmatpush.bf16.msra.mxu0 %v1412_v17  ;;  %v1706_v21 = vld [vmem:[%s2242_s2 + $0x28] sm:$0xff]  ;;  %v1722_v24 = vld [vmem:[%s2242_s2 + $0x20] sm:$0xff] }
   0x8   :  { %v1411_v20 = vld [vmem:[%s2244_s1 + $0x30] sm:$0xff]  ;;  %v1712_v22 = vld [vmem:[%s2240_s5 + $0x8] sm:$0xff]  ;;  %v1728_v25 = vld [vmem:[%s2240_s5] sm:$0xff]  ;;  %s1574_s5 = smov 32  }
   0x9   :  { %336 = vmatpush.bf16.msra.mxu2 %v1691_v18  ;;  %v1410_v23 = vld [vmem:[%s2244_s1 + $0x28] sm:$0xff]  ;;  %v29_v26 = vld [vmem:[%s2243_s0 + $0x10] sm:$0xff]  ;;  %v30_v27 = vld [vmem:[%s2243_s0 + $0x18] sm:$0xff] }
   0xa   :  { %214 = vmatpush.bf16.msra.mxu1 %v1418_v3  ;;  %v1409_v28 = vld [vmem:[%s2244_s1 + $0x20] sm:$0xff]  ;;  %v1745_v29 = vld [vmem:[%s2242_s2 + $0x18] sm:$0xff]  ;;  %v36_v30 = vpack.c.bf16 %v30_v27, %v29_v26  ;;  %v1757_v33 = vld [vmem:[%s2242_s2 + $0x10] sm:$0xff] }
   0xb   :  { %433 = vmatpush.bf16.msra.mxu3 %v1654_v9  ;;  %108 = vmatpush.bf16.msra.mxu0 %v1411_v20  ;;  %v1408_v32 = vld [vmem:[%s2244_s1 + $0x18] sm:$0xff]  ;;  %v1407_v34 = vld [vmem:[%s2244_s1 + $0x10] sm:$0xff]  ;;  %v1767_v35 = vld [vmem:[%s2242_s2 + $0x8] sm:$0xff] }
   0xc   :  { %v1406_v36 = vld [vmem:[%s2244_s1 + $0x8] sm:$0xff]  ;;  %v1778_v37 = vld [vmem:[%s2242_s2] sm:$0xff]  ;;  %v33_v42 = vld [vmem:[%s2243_s0 + $0x30] sm:$0xff] }
   0xd   :  { %337 = vmatpush.bf16.msra.mxu2 %v1706_v21  ;;  %v31_v38 = vld [vmem:[%s2243_s0 + $0x20] sm:$0xff]  ;;  %v32_v39 = vld [vmem:[%s2243_s0 + $0x28] sm:$0xff]  ;;  %v34_v43 = vld [vmem:[%s2243_s0 + $0x38] sm:$0xff] }
   0xe   :  { %215 = vmatpush.bf16.msra.mxu1 %v1417_v4  ;;  %v1405_v40 = vld [vmem:[%s2244_s1] sm:$0xff]  ;;  %v37_v41 = vpack.c.bf16 %v32_v39, %v31_v38  ;;  %v38_v44 = vpack.c.bf16 %v34_v43, %v33_v42 }
   0xf   :  { %434 = vmatpush.bf16.msra.mxu3 %v1664_v11  ;;  %109 = vmatpush.bf16.msra.mxu0 %v1410_v23  ;;  %v1441_v45 = vld [vmem:[%s2241_s6] ss:$0 sm:$0xff]  ;;  %s1573_s6 = smov 96  }
  0x10   :  { %v1866_v56 = vld [vmem:[%s2245_s3] ss:$0 sm:$0xff] }
  0x11   :  { %338 = vmatpush.bf16.msra.mxu2 %v1722_v24 }
  0x12   :  { %216 = vmatpush.bf16.msra.mxu1 %v1416_v5 }
  0x13   :  { %435 = vmatpush.bf16.msra.mxu3 %v1679_v15  ;;  %110 = vmatpush.bf16.msra.mxu0 %v1409_v28 }
  0x15   :  { %339 = vmatpush.bf16.msra.mxu2 %v1745_v29 }
  0x16   :  { %217 = vmatpush.bf16.msra.mxu1 %v1415_v8 }
  0x17   :  { %436 = vmatpush.bf16.msra.mxu3 %v1696_v19  ;;  %111 = vmatpush.bf16.msra.mxu0 %v1408_v32 }
  0x19   :  { %340 = vmatpush.bf16.msra.mxu2 %v1757_v33 }
  0x1a   :  { %218 = vmatpush.bf16.msra.mxu1 %v1414_v10 }
  0x1b   :  { %437 = vmatpush.bf16.msra.mxu3 %v1712_v22  ;;  %112 = vmatpush.bf16.msra.mxu0 %v1407_v34 }
  0x1d   :  { %341 = vmatpush.bf16.msra.mxu2 %v1767_v35 }
  0x1e   :  { %219 = vmatpush.bf16.msra.mxu1 %v1413_v12  ;;  %v249_v12 = vlaneseq }
  0x1f   :  { %438 = vmatpush.bf16.msra.mxu3 %v1728_v25  ;;  %113 = vmatpush.bf16.msra.mxu0 %v1406_v36 }
  0x20   :  { %v1875_v23 = vand.u32 127, %v249_v12 }
  0x21   :  { %220 = vmatmul.bf16.vlgmr.msra.gmra.mxu1 %v1681_v16  ;;  %342 = vmatpush.bf16.msra.mxu2 %v1778_v37 }
  0x22   :  { %634 = vmatpush.bf16.msrb.mxu1 %v1625_v2  ;;  %439 = vmatmul.bf16.vlgmr.msra.gmra.mxu3 %v1572_v31  ;;  %vm251_vm2 = vcmp.ge.s32.totalorder %v1875_v23, 64  ;;  %vm252_vm3 = vcmp.lt.s32.totalorder %v1875_v23, 96 }
  0x23   :  { %532 = vmatpush.bf16.msrb.mxu3 %v1625_v2  ;;  %114 = vmatpush.bf16.msra.mxu0 %v1405_v40  ;;  %vm1879_vm6 = vmand %vm251_vm2, %vm252_vm3 }
  0x24   :  { %343 = vmatmul.bf16.vlgmr.msra.gmra.mxu2 %v1572_v31 }
  0x25   :  { %483 = vmatpush.bf16.msrb.mxu2 %v1645_v7 }
  0x26   :  { %635 = vmatpush.bf16.msrb.mxu1 %v1640_v6  ;;  %115 = vmatmul.bf16.vlgmr.msra.gmra.mxu0 %v1681_v16 }
  0x27   :  { %533 = vmatpush.bf16.msrb.mxu3 %v1640_v6  ;;  %585 = vmatpush.bf16.msrb.mxu0 %v1645_v7 }
  0x29   :  { %484 = vmatpush.bf16.msrb.mxu2 %v1691_v18 }
  0x2a   :  { %636 = vmatpush.bf16.msrb.mxu1 %v1654_v9 }
  0x2b   :  { %534 = vmatpush.bf16.msrb.mxu3 %v1654_v9  ;;  %586 = vmatpush.bf16.msrb.mxu0 %v1691_v18 }
  0x2d   :  { %485 = vmatpush.bf16.msrb.mxu2 %v1706_v21 }
  0x2e   :  { %637 = vmatpush.bf16.msrb.mxu1 %v1664_v11 }
  0x2f   :  { %535 = vmatpush.bf16.msrb.mxu3 %v1664_v11  ;;  %587 = vmatpush.bf16.msrb.mxu0 %v1706_v21 }
  0x31   :  { %225 = vmatmul.bf16.gmra.mxu1 %v36_v30  ;;  %486 = vmatpush.bf16.msrb.mxu2 %v1722_v24 }
  0x32   :  { %638 = vmatpush.bf16.msrb.mxu1 %v1679_v15 }
  0x33   :  { %536 = vmatpush.bf16.msrb.mxu3 %v1679_v15  ;;  %588 = vmatpush.bf16.msrb.mxu0 %v1722_v24 }
  0x35   :  { %487 = vmatpush.bf16.msrb.mxu2 %v1745_v29 }
  0x36   :  { %639 = vmatpush.bf16.msrb.mxu1 %v1696_v19  ;;  %120 = vmatmul.bf16.gmra.mxu0 %v36_v30 }
  0x37   :  { %537 = vmatpush.bf16.msrb.mxu3 %v1696_v19  ;;  %589 = vmatpush.bf16.msrb.mxu0 %v1745_v29 }
  0x39   :  { %488 = vmatpush.bf16.msrb.mxu2 %v1757_v33 }
  0x3a   :  { %640 = vmatpush.bf16.msrb.mxu1 %v1712_v22 }
  0x3b   :  { %538 = vmatpush.bf16.msrb.mxu3 %v1712_v22  ;;  %590 = vmatpush.bf16.msrb.mxu0 %v1757_v33 }
  0x3d   :  { %489 = vmatpush.bf16.msrb.mxu2 %v1767_v35 }
  0x3e   :  { %641 = vmatpush.bf16.msrb.mxu1 %v1728_v25 }
  0x3f   :  { %539 = vmatpush.bf16.msrb.mxu3 %v1728_v25  ;;  %591 = vmatpush.bf16.msrb.mxu0 %v1767_v35 }
  0x41   :  { %230 = vmatmul.bf16.gmra.mxu1 %v37_v41  ;;  %490 = vmatpush.bf16.msrb.mxu2 %v1778_v37 }
  0x42   :  { %838 = vmatpush.bf16.msra.mxu1 %v1625_v2 }
  0x43   :  { %736 = vmatpush.bf16.msra.mxu3 %v1625_v2  ;;  %592 = vmatpush.bf16.msrb.mxu0 %v1778_v37 }
  0x45   :  { %687 = vmatpush.bf16.msra.mxu2 %v1645_v7 }
  0x46   :  { %839 = vmatpush.bf16.msra.mxu1 %v1640_v6  ;;  %125 = vmatmul.bf16.gmra.mxu0 %v37_v41 }
  0x47   :  { %737 = vmatpush.bf16.msra.mxu3 %v1640_v6  ;;  %789 = vmatpush.bf16.msra.mxu0 %v1645_v7 }
  0x49   :  { %688 = vmatpush.bf16.msra.mxu2 %v1691_v18 }
  0x4a   :  { %840 = vmatpush.bf16.msra.mxu1 %v1654_v9 }
  0x4b   :  { %738 = vmatpush.bf16.msra.mxu3 %v1654_v9  ;;  %790 = vmatpush.bf16.msra.mxu0 %v1691_v18 }
  0x4d   :  { %689 = vmatpush.bf16.msra.mxu2 %v1706_v21 }
  0x4e   :  { %841 = vmatpush.bf16.msra.mxu1 %v1664_v11 }
  0x4f   :  { %739 = vmatpush.bf16.msra.mxu3 %v1664_v11  ;;  %791 = vmatpush.bf16.msra.mxu0 %v1706_v21 }
  0x51   :  { %235 = vmatmul.bf16.gmra.mxu1 %v38_v44  ;;  %690 = vmatpush.bf16.msra.mxu2 %v1722_v24 }
  0x52   :  { %842 = vmatpush.bf16.msra.mxu1 %v1679_v15 }
  0x53   :  { %740 = vmatpush.bf16.msra.mxu3 %v1679_v15  ;;  %792 = vmatpush.bf16.msra.mxu0 %v1722_v24 }
  0x55   :  { %691 = vmatpush.bf16.msra.mxu2 %v1745_v29 }
  0x56   :  { %843 = vmatpush.bf16.msra.mxu1 %v1696_v19  ;;  %130 = vmatmul.bf16.gmra.mxu0 %v38_v44 }
  0x57   :  { %741 = vmatpush.bf16.msra.mxu3 %v1696_v19  ;;  %793 = vmatpush.bf16.msra.mxu0 %v1745_v29 }
  0x59   :  { %692 = vmatpush.bf16.msra.mxu2 %v1757_v33 }
  0x5a   :  { %844 = vmatpush.bf16.msra.mxu1 %v1712_v22 }
  0x5b   :  { %742 = vmatpush.bf16.msra.mxu3 %v1712_v22  ;;  %794 = vmatpush.bf16.msra.mxu0 %v1757_v33 }
  0x5d   :  { %693 = vmatpush.bf16.msra.mxu2 %v1767_v35 }
  0x5e   :  { %845 = vmatpush.bf16.msra.mxu1 %v1728_v25 }
  0x5f   :  { %743 = vmatpush.bf16.msra.mxu3 %v1728_v25  ;;  %795 = vmatpush.bf16.msra.mxu0 %v1767_v35 }
  0x61   :  { %694 = vmatpush.bf16.msra.mxu2 %v1778_v37 }
  0x63   :  { %796 = vmatpush.bf16.msra.mxu0 %v1778_v37 }
  0x9e   :  { %v221_v46 = vpop.f32.mrf.mxu1 }
  0x9f   :  { %v1855_v47 = vadd.f32 %v1441_v45, %v221_v46 }
  0xa3   :  { %v116_v58 = vpop.f32.mrf.mxu0 }
  0xa4   :  { %v117_v60 = vadd.f32 %v1866_v56, %v116_v58 }
  0xa5   :  { %v440_v52 = vpop.f32.mrf.mxu3 }
  0xa6   :  { %v223_v48 = vpop.f32.mrf.mxu1 }
  0xa7   :  { %v1857_v49 = vadd.f32 %v1441_v45, %v223_v48  ;;  %v344_v61 = vpop.f32.mrf.mxu2 }
  0xa8   :  { %v348_v62 = vadd.f32 %v344_v61, %v117_v60 }
  0xaa   :  { %v1350_v63 = vmul.f32 -1.442695, %v348_v62 }
  0xac   :  { %1443 = vpow2.f32 %v1350_v63 }
  0xad   :  { %v442_v55 = vpop.f32.mrf.mxu3 }
  0xae   :  { %v226_v50 = vpop.f32.mrf.mxu1 }
  0xaf   :  { %v1859_v51 = vadd.f32 %v1441_v45, %v226_v50  ;;  %v346_v3 = vpop.f32.mrf.mxu2 }
  0xb2   :  { %v1444_v4 = vpop.eup %1443 }
  0xb3   :  { %v353_v8 = vadd.f32 1.0, %v1444_v4 }
  0xb5   :  { %1445 = vrcp.f32 %v353_v8  ;;  %v365_v27 = vand.u32 2147483648, %v353_v8  ;;  %vm359_vm0 = vweird.f32 %v353_v8  ;;  %v363_v31 = vand.u32 2147483647, %v353_v8 }
  0xb6   :  { %v228_v53 = vpop.f32.mrf.mxu1  ;;  %1447 = vtanh.f32 %v348_v62 }
  0xb7   :  { %v1861_v54 = vadd.f32 %v1441_v45, %v228_v53  ;;  %v366_v32 = vor.u32 1.1754944e-38, %v365_v27  ;;  %vm364_vm5 = vcmp.eq.f32.partialorder %v363_v31, 8.507059e+37 }
  0xbb   :  { %v1446_v13 = vpop.eup %1445 }
  0xbc   :  { %v355_v17 = vmul.f32 %v1446_v13, %v353_v8  ;;  %vm360_vm1 = vweird.f32 %v1446_v13  ;;  %v1448_v36 = vpop.eup %1447 }
  0xbd   :  { %vm361_vm4 = vmor %vm359_vm0, %vm360_vm1 }
  0xbe   :  { %v231_v57 = vpop.f32.mrf.mxu1  ;;  %v356_v26 = vsub.f32 1.0, %v355_v17 }
  0xbf   :  { %v1868_v59 = vadd.f32 %v1441_v45, %v231_v57 }
  0xc0   :  { %v357_v30 = vmul.f32 %v1446_v13, %v356_v26 }
  0xc2   :  { %v358_v34 = vadd.f32 %v1446_v13, %v357_v30 }
  0xc4   :  { %v362_v38 = vsel %vm361_vm4, %v1446_v13, %v358_v34 }
  0xc5   :  { %v367_v40 = vsel %vm364_vm5, %v366_v32, %v362_v38  ;;  %v118_v32 = vpop.f32.mrf.mxu0 }
  0xc6   :  { %v233_v0 = vpop.f32.mrf.mxu1  ;;  %v369_v41 = vsel %vm1879_vm6, %v1448_v36, %v367_v40  ;;  %v119_v34 = vadd.f32 %v1866_v56, %v118_v32 }
  0xc7   :  { %v1871_v1 = vadd.f32 %v1441_v45, %v233_v0  ;;  %373 = vrot.lane.b32.xlu2 %v369_v41, %s1573_s6 }
  0xce   :  { %v236_v5 = vpop.f32.mrf.mxu1 }
  0xcf   :  { %v1873_v10 = vadd.f32 %v1441_v45, %v236_v5  ;;  %377 = vrot.lane.b32.xlu2 %v369_v41, %s1574_s5 }
  0xd6   :  { %v238_v14 = vpop.f32.mrf.mxu1 }
  0xd7   :  { %v239_v16 = vadd.f32 %v1441_v45, %v238_v14 }
  0xd9   :  { %v444_v20 = vadd.f32 %v440_v52, %v239_v16 }
  0xdb   :  { %v1383_v28 = vmul.f32 -1.442695, %v444_v20 }
  0xdd   :  { %1449 = vpow2.f32 %v1383_v28 }
  0xe3   :  { %v1450_v42 = vpop.eup %1449 }
  0xe4   :  { %v449_v43 = vadd.f32 1.0, %v1450_v42 }
  0xe6   :  { %1451 = vrcp.f32 %v449_v43  ;;  %v461_v48 = vand.u32 2147483648, %v449_v43  ;;  %v459_v52 = vand.u32 2147483647, %v449_v43  ;;  %vm455_vm8 = vweird.f32 %v449_v43 }
  0xe7   :  { %1453 = vtanh.f32 %v444_v20 }
  0xe8   :  { %v462_v55 = vor.u32 1.1754944e-38, %v461_v48  ;;  %vm460_vm10 = vcmp.eq.f32.partialorder %v459_v52, 8.507059e+37 }
  0xec   :  { %v1452_v44 = vpop.eup %1451 }
  0xed   :  { %v451_v45 = vmul.f32 %v1452_v44, %v449_v43  ;;  %vm456_vm7 = vweird.f32 %v1452_v44  ;;  %v1454_v58 = vpop.eup %1453 }
  0xee   :  { %vm457_vm9 = vmor %vm455_vm8, %vm456_vm7 }
  0xef   :  { %v452_v46 = vsub.f32 1.0, %v451_v45 }
  0xf1   :  { %v453_v50 = vmul.f32 %v1452_v44, %v452_v46 }
  0xf3   :  { %v454_v53 = vadd.f32 %v1452_v44, %v453_v50 }
  0xf5   :  { %v458_v57 = vsel %vm457_vm9, %v1452_v44, %v454_v53 }
  0xf6   :  { %v463_v60 = vsel %vm460_vm10, %v462_v55, %v458_v57 }
  0xf7   :  { %v465_v61 = vsel %vm1879_vm6, %v1454_v58, %v463_v60 }
  0xf8   :  { %473 = vrot.lane.b32.xlu1 %v465_v61, %s1574_s5  ;;  %466 = vrot.lane.b32.xlu0 %v465_v61, %s1575_s4 }
 0x100   :  { %469 = vrot.lane.b32.xlu0 %v465_v61, %s1573_s6  ;;  %370 = vrot.lane.b32.xlu1 %v369_v41, %s1575_s4 }
 0x121   :  { %v374_v0 = vpop.permute.xlu2 %373 }
 0x122   :  { %v375_v3 = vmul.f32 0.0, %v374_v0 }
 0x129   :  { %v378_v17 = vpop.permute.xlu2 %377 }
 0x16a   :  { %v474_v62 = vpop.permute.xlu1 %473  ;;  %v467_v63 = vpop.permute.xlu0 %466 }
 0x16b   :  { %v468_v8 = vmul.f32 %v467_v63, %v465_v61 }
 0x172   :  { %v470_v4 = vpop.permute.xlu0 %469  ;;  %v371_v5 = vpop.permute.xlu1 %370 }
 0x173   :  { %v471_v12 = vmul.f32 0.0, %v470_v4  ;;  %v372_v13 = vmul.f32 %v371_v5, %v369_v41 }
 0x175   :  { %v1893_v14 = vadd.f32 %v471_v12, %v468_v8  ;;  %v1895_v16 = vadd.f32 %v375_v3, %v372_v13 }
 0x177   :  { %1455 = vtanh.f32 %v1893_v14 }
 0x178   :  { %1457 = vtanh.f32 %v1895_v16 }
 0x17d   :  { %v1456_v20 = vpop.eup %1455 }
 0x17e   :  { %v1458_v26 = vpop.eup %1457  ;;  %v1899_v27 = vmul.f32 %v1456_v20, %v474_v62 }
 0x17f   :  { %v380_v28 = vmul.f32 %v1458_v26, %v378_v17 }
 0x180   :  { %v531_v30 = vpack.c.bf16 %v1899_v27, %v1899_v27 }
 0x181   :  { %477 = vst [vmem:[%s2246_s7] sm:$0xff] %v380_v28  ;;  %v482_v31 = vpack.c.bf16 %v380_v28, %v380_v28 }
 0x182   :  { %540 = vmatmul.bf16.vlgmr.msrb.gmra.mxu3 %v531_v30 }
 0x183   :  { %491 = vmatmul.bf16.vlgmr.msrb.gmra.mxu2 %v482_v31  ;;  %940 = vmatpush.bf16.msrb.mxu3 %v1625_v2 }
 0x184   :  { %891 = vmatpush.bf16.msrb.mxu2 %v1645_v7 }
 0x187   :  { %941 = vmatpush.bf16.msrb.mxu3 %v1640_v6 }
 0x188   :  { %892 = vmatpush.bf16.msrb.mxu2 %v1691_v18 }
 0x18b   :  { %942 = vmatpush.bf16.msrb.mxu3 %v1654_v9 }
 0x18c   :  { %893 = vmatpush.bf16.msrb.mxu2 %v1706_v21 }
 0x18f   :  { %943 = vmatpush.bf16.msrb.mxu3 %v1664_v11 }
 0x190   :  { %894 = vmatpush.bf16.msrb.mxu2 %v1722_v24 }
 0x193   :  { %944 = vmatpush.bf16.msrb.mxu3 %v1679_v15 }
 0x194   :  { %895 = vmatpush.bf16.msrb.mxu2 %v1745_v29 }
 0x197   :  { %945 = vmatpush.bf16.msrb.mxu3 %v1696_v19 }
 0x198   :  { %896 = vmatpush.bf16.msrb.mxu2 %v1757_v33 }
 0x19b   :  { %946 = vmatpush.bf16.msrb.mxu3 %v1712_v22 }
 0x19c   :  { %897 = vmatpush.bf16.msrb.mxu2 %v1767_v35 }
 0x19f   :  { %947 = vmatpush.bf16.msrb.mxu3 %v1728_v25 }
 0x1a0   :  { %898 = vmatpush.bf16.msrb.mxu2 %v1778_v37 }
 0x205   :  { %v541_v36 = vpop.f32.mrf.mxu3 }
 0x206   :  { %v492_v38 = vpop.f32.mrf.mxu2  ;;  %v545_v40 = vadd.f32 %v541_v36, %v1873_v10 }
 0x207   :  { %v496_v41 = vadd.f32 %v492_v38, %v119_v34 }
 0x208   :  { %v1385_v42 = vmul.f32 -1.442695, %v545_v40 }
 0x209   :  { %v1384_v43 = vmul.f32 -1.442695, %v496_v41 }
 0x20a   :  { %1459 = vpow2.f32 %v1385_v42 }
 0x20b   :  { %1461 = vpow2.f32 %v1384_v43 }
 0x20d   :  { %v543_v44 = vpop.f32.mrf.mxu3 }
 0x20e   :  { %v494_v45 = vpop.f32.mrf.mxu2 }
 0x210   :  { %v1460_v46 = vpop.eup %1459 }
 0x211   :  { %v1462_v48 = vpop.eup %1461  ;;  %v550_v50 = vadd.f32 1.0, %v1460_v46 }
 0x212   :  { %v501_v52 = vadd.f32 1.0, %v1462_v48 }
 0x213   :  { %1463 = vrcp.f32 %v550_v50  ;;  %v562_v10 = vand.u32 2147483648, %v550_v50  ;;  %v560_v63 = vand.u32 2147483647, %v550_v50  ;;  %vm556_vm12 = vweird.f32 %v550_v50 }
 0x214   :  { %1465 = vrcp.f32 %v501_v52  ;;  %v513_v17 = vand.u32 2147483648, %v501_v52  ;;  %vm507_vm0 = vweird.f32 %v501_v52  ;;  %v511_v26 = vand.u32 2147483647, %v501_v52 }
 0x215   :  { %1467 = vtanh.f32 %v545_v40  ;;  %v563_v4 = vor.u32 1.1754944e-38, %v562_v10  ;;  %vm561_vm14 = vcmp.eq.f32.partialorder %v560_v63, 8.507059e+37 }
 0x216   :  { %1469 = vtanh.f32 %v496_v41  ;;  %v514_v30 = vor.u32 1.1754944e-38, %v513_v17  ;;  %vm512_vm2 = vcmp.eq.f32.partialorder %v511_v26, 8.507059e+37 }
 0x219   :  { %v1464_v53 = vpop.eup %1463 }
 0x21a   :  { %v1466_v55 = vpop.eup %1465  ;;  %v552_v57 = vmul.f32 %v1464_v53, %v550_v50  ;;  %vm557_vm11 = vweird.f32 %v1464_v53 }
 0x21b   :  { %v503_v58 = vmul.f32 %v1466_v55, %v501_v52  ;;  %vm558_vm13 = vmor %vm556_vm12, %vm557_vm11  ;;  %vm508_vm15 = vweird.f32 %v1466_v55  ;;  %v1468_v12 = vpop.eup %1467 }
 0x21c   :  { %v553_v60 = vsub.f32 1.0, %v552_v57  ;;  %vm509_vm1 = vmor %vm507_vm0, %vm508_vm15  ;;  %v1470_v32 = vpop.eup %1469 }
 0x21d   :  { %v504_v61 = vsub.f32 1.0, %v503_v58 }
 0x21e   :  { %v554_v62 = vmul.f32 %v1464_v53, %v553_v60  ;;  %v121_v60 = vpop.f32.mrf.mxu0 }
 0x21f   :  { %v505_v0 = vmul.f32 %v1466_v55, %v504_v61 }
 0x220   :  { %v555_v3 = vadd.f32 %v1464_v53, %v554_v62 }
 0x221   :  { %v506_v8 = vadd.f32 %v1466_v55, %v505_v0 }
 0x222   :  { %v559_v5 = vsel %vm558_vm13, %v1464_v53, %v555_v3 }
 0x223   :  { %v564_v13 = vsel %vm561_vm14, %v563_v4, %v559_v5  ;;  %v510_v28 = vsel %vm509_vm1, %v1466_v55, %v506_v8  ;;  %v122_v8 = vadd.f32 %v1866_v56, %v121_v60 }
 0x224   :  { %v566_v20 = vsel %vm1879_vm6, %v1468_v12, %v564_v13  ;;  %v515_v31 = vsel %vm512_vm2, %v514_v30, %v510_v28 }
 0x225   :  { %567 = vrot.lane.b32.xlu0 %v566_v20, %s1575_s4  ;;  %574 = vrot.lane.b32.xlu2 %v566_v20, %s1574_s5  ;;  %v517_v34 = vsel %vm1879_vm6, %v1470_v32, %v515_v31 }
 0x226   :  { %570 = vrot.lane.b32.xlu1 %v566_v20, %s1573_s6  ;;  %v1965_v10 = vpop.f32.mrf.mxu0 }
 0x22d   :  { %525 = vrot.lane.b32.xlu2 %v517_v34, %s1574_s5  ;;  %518 = vrot.lane.b32.xlu0 %v517_v34, %s1575_s4 }
 0x22e   :  { %521 = vrot.lane.b32.xlu1 %v517_v34, %s1573_s6  ;;  %v1967_v61 = vpop.f32.mrf.mxu0 }
 0x236   :  { %v1969_v62 = vpop.f32.mrf.mxu0 }
 0x23e   :  { %v1971_v63 = vpop.f32.mrf.mxu0 }
 0x246   :  { %v1973_v0 = vpop.f32.mrf.mxu0 }
 0x27f   :  { %v575_v46 = vpop.permute.xlu2 %574 }
 0x287   :  { %v526_v57 = vpop.permute.xlu2 %525 }
 0x297   :  { %v568_v36 = vpop.permute.xlu0 %567 }
 0x298   :  { %v569_v38 = vmul.f32 %v568_v36, %v566_v20  ;;  %v571_v40 = vpop.permute.xlu1 %570 }
 0x299   :  { %v572_v41 = vmul.f32 %v571_v40, %v1893_v14 }
 0x29b   :  { %v1935_v42 = vadd.f32 %v572_v41, %v569_v38 }
 0x29d   :  { %1471 = vtanh.f32 %v1935_v42 }
 0x29f   :  { %v519_v43 = vpop.permute.xlu0 %518 }
 0x2a0   :  { %v520_v44 = vmul.f32 %v519_v43, %v517_v34  ;;  %v522_v45 = vpop.permute.xlu1 %521 }
 0x2a1   :  { %v523_v48 = vmul.f32 %v522_v45, %v1895_v16 }
 0x2a3   :  { %v1472_v50 = vpop.eup %1471  ;;  %v1939_v52 = vadd.f32 %v523_v48, %v520_v44 }
 0x2a4   :  { %v1941_v53 = vmul.f32 %v1472_v50, %v575_v46 }
 0x2a5   :  { %1473 = vtanh.f32 %v1939_v52 }
 0x2a6   :  { %v633_v14 = vpack.c.bf16 %v1941_v53, %v1941_v53 }
 0x2a8   :  { %642 = vmatmul.bf16.vlgmr.msrb.gmra.mxu1 %v633_v14 }
 0x2a9   :  { %1042 = vmatpush.bf16.msrb.mxu1 %v1625_v2 }
 0x2ab   :  { %v1474_v55 = vpop.eup %1473 }
 0x2ac   :  { %v528_v58 = vmul.f32 %v1474_v55, %v526_v57 }
 0x2ad   :  { %1043 = vmatpush.bf16.msrb.mxu1 %v1640_v6 }
 0x2ae   :  { %1386 = vst [vmem:[%s2246_s7 + $0x8] sm:$0xff] %v528_v58  ;;  %v584_v16 = vpack.c.bf16 %v528_v58, %v528_v58 }
 0x2b0   :  { %593 = vmatmul.bf16.vlgmr.msrb.gmra.mxu0 %v584_v16 }
 0x2b1   :  { %993 = vmatpush.bf16.msrb.mxu0 %v1645_v7  ;;  %1044 = vmatpush.bf16.msrb.mxu1 %v1654_v9 }
 0x2b5   :  { %994 = vmatpush.bf16.msrb.mxu0 %v1691_v18  ;;  %1045 = vmatpush.bf16.msrb.mxu1 %v1664_v11 }
 0x2b9   :  { %995 = vmatpush.bf16.msrb.mxu0 %v1706_v21  ;;  %1046 = vmatpush.bf16.msrb.mxu1 %v1679_v15 }
 0x2bd   :  { %996 = vmatpush.bf16.msrb.mxu0 %v1722_v24  ;;  %1047 = vmatpush.bf16.msrb.mxu1 %v1696_v19 }
 0x2c1   :  { %997 = vmatpush.bf16.msrb.mxu0 %v1745_v29  ;;  %1048 = vmatpush.bf16.msrb.mxu1 %v1712_v22 }
 0x2c5   :  { %998 = vmatpush.bf16.msrb.mxu0 %v1757_v33  ;;  %1049 = vmatpush.bf16.msrb.mxu1 %v1728_v25 }
 0x2c9   :  { %999 = vmatpush.bf16.msrb.mxu0 %v1767_v35 }
 0x2cd   :  { %1000 = vmatpush.bf16.msrb.mxu0 %v1778_v37 }
 0x325   :  { %v643_v3 = vpop.f32.mrf.mxu1 }
 0x326   :  { %v647_v4 = vadd.f32 %v643_v3, %v1871_v1 }
 0x328   :  { %v1388_v5 = vmul.f32 -1.442695, %v647_v4 }
 0x32a   :  { %1475 = vpow2.f32 %v1388_v5 }
 0x32d   :  { %v594_v12 = vpop.f32.mrf.mxu0  ;;  %v645_v13 = vpop.f32.mrf.mxu1 }
 0x32e   :  { %v598_v17 = vadd.f32 %v594_v12, %v122_v8 }
 0x330   :  { %v1476_v20 = vpop.eup %1475  ;;  %v1387_v26 = vmul.f32 -1.442695, %v598_v17 }
 0x331   :  { %v652_v28 = vadd.f32 1.0, %v1476_v20 }
 0x332   :  { %1477 = vpow2.f32 %v1387_v26 }
 0x333   :  { %1479 = vrcp.f32 %v652_v28  ;;  %v664_v1 = vand.u32 2147483648, %v652_v28  ;;  %v662_v41 = vand.u32 2147483647, %v652_v28  ;;  %vm658_vm4 = vweird.f32 %v652_v28 }
 0x335   :  { %v596_v30 = vpop.f32.mrf.mxu0  ;;  %v665_v45 = vor.u32 1.1754944e-38, %v664_v1  ;;  %vm663_vm7 = vcmp.eq.f32.partialorder %v662_v41, 8.507059e+37 }
 0x338   :  { %v1478_v31 = vpop.eup %1477 }
 0x339   :  { %v1480_v32 = vpop.eup %1479  ;;  %v603_v34 = vadd.f32 1.0, %v1478_v31 }
 0x33a   :  { %v654_v36 = vmul.f32 %v1480_v32, %v652_v28  ;;  %vm659_vm3 = vweird.f32 %v1480_v32 }
 0x33b   :  { %1481 = vrcp.f32 %v603_v34  ;;  %vm660_vm5 = vmor %vm658_vm4, %vm659_vm3  ;;  %v615_v58 = vand.u32 2147483648, %v603_v34  ;;  %v613_v60 = vand.u32 2147483647, %v603_v34  ;;  %vm609_vm9 = vweird.f32 %v603_v34 }
 0x33c   :  { %v655_v38 = vsub.f32 1.0, %v654_v36  ;;  %1483 = vtanh.f32 %v647_v4 }
 0x33d   :  { %1485 = vtanh.f32 %v598_v17  ;;  %v616_v4 = vor.u32 1.1754944e-38, %v615_v58  ;;  %vm614_vm11 = vcmp.eq.f32.partialorder %v613_v60, 8.507059e+37 }
 0x33e   :  { %v656_v40 = vmul.f32 %v1480_v32, %v655_v38 }
 0x340   :  { %v657_v43 = vadd.f32 %v1480_v32, %v656_v40 }
 0x341   :  { %v1482_v44 = vpop.eup %1481 }
 0x342   :  { %v661_v46 = vsel %vm660_vm5, %v1480_v32, %v657_v43  ;;  %v605_v48 = vmul.f32 %v1482_v44, %v603_v34  ;;  %v1484_v50 = vpop.eup %1483  ;;  %vm610_vm8 = vweird.f32 %v1482_v44 }
 0x343   :  { %v666_v14 = vsel %vm663_vm7, %v665_v45, %v661_v46  ;;  %vm611_vm10 = vmor %vm609_vm9, %vm610_vm8  ;;  %v1486_v8 = vpop.eup %1485 }
 0x344   :  { %v668_v55 = vsel %vm1879_vm6, %v1484_v50, %v666_v14  ;;  %v606_v57 = vsub.f32 1.0, %v605_v48 }
 0x345   :  { %676 = vrot.lane.b32.xlu2 %v668_v55, %s1574_s5  ;;  %672 = vrot.lane.b32.xlu1 %v668_v55, %s1573_s6 }
 0x346   :  { %669 = vrot.lane.b32.xlu0 %v668_v55, %s1575_s4  ;;  %v607_v16 = vmul.f32 %v1482_v44, %v606_v57 }
 0x348   :  { %v608_v3 = vadd.f32 %v1482_v44, %v607_v16 }
 0x34a   :  { %v612_v5 = vsel %vm611_vm10, %v1482_v44, %v608_v3 }
 0x34b   :  { %v617_v12 = vsel %vm614_vm11, %v616_v4, %v612_v5 }
 0x34c   :  { %v619_v13 = vsel %vm1879_vm6, %v1486_v8, %v617_v12 }
 0x34d   :  { %627 = vrot.lane.b32.xlu2 %v619_v13, %s1574_s5  ;;  %623 = vrot.lane.b32.xlu1 %v619_v13, %s1573_s6 }
 0x34e   :  { %620 = vrot.lane.b32.xlu0 %v619_v13, %s1575_s4 }
 0x39f   :  { %v677_v36 = vpop.permute.xlu2 %676 }
 0x3a7   :  { %v628_v44 = vpop.permute.xlu2 %627 }
 0x3b7   :  { %v673_v17 = vpop.permute.xlu1 %672 }
 0x3b8   :  { %v670_v20 = vpop.permute.xlu0 %669  ;;  %v674_v26 = vmul.f32 %v673_v17, %v1935_v42 }
 0x3b9   :  { %v671_v28 = vmul.f32 %v670_v20, %v668_v55 }
 0x3bb   :  { %v1988_v30 = vadd.f32 %v674_v26, %v671_v28 }
 0x3bd   :  { %1487 = vtanh.f32 %v1988_v30 }
 0x3bf   :  { %v624_v31 = vpop.permute.xlu1 %623 }
 0x3c0   :  { %v621_v32 = vpop.permute.xlu0 %620  ;;  %v625_v34 = vmul.f32 %v624_v31, %v1939_v52 }
 0x3c1   :  { %v622_v38 = vmul.f32 %v621_v32, %v619_v13 }
 0x3c3   :  { %v1488_v1 = vpop.eup %1487  ;;  %v1992_v40 = vadd.f32 %v625_v34, %v622_v38 }
 0x3c4   :  { %v1994_v41 = vmul.f32 %v1488_v1, %v677_v36 }
 0x3c5   :  { %1489 = vtanh.f32 %v1992_v40 }
 0x3c6   :  { %v735_v42 = vpack.c.bf16 %v1994_v41, %v1994_v41 }
 0x3c8   :  { %744 = vmatmul.bf16.vlgmr.msra.gmra.mxu3 %v735_v42 }
 0x3c9   :  { %1143 = vmatpush.bf16.msra.mxu3 %v1625_v2 }
 0x3cb   :  { %v1490_v43 = vpop.eup %1489 }
 0x3cc   :  { %v2000_v45 = vmul.f32 %v1490_v43, %v628_v44 }
 0x3cd   :  { %1144 = vmatpush.bf16.msra.mxu3 %v1640_v6 }
 0x3ce   :  { %v686_v52 = vpack.c.bf16 %v2000_v45, %v2000_v45 }
 0x3d0   :  { %695 = vmatmul.bf16.vlgmr.msra.gmra.mxu2 %v686_v52 }
 0x3d1   :  { %1095 = vmatpush.bf16.msra.mxu2 %v1645_v7  ;;  %1145 = vmatpush.bf16.msra.mxu3 %v1654_v9  ;;  %v124_v9 = vadd.f32 %v1866_v56, %v1965_v10 }
 0x3d5   :  { %1096 = vmatpush.bf16.msra.mxu2 %v1691_v18  ;;  %1146 = vmatpush.bf16.msra.mxu3 %v1664_v11 }
 0x3d9   :  { %1097 = vmatpush.bf16.msra.mxu2 %v1706_v21  ;;  %1147 = vmatpush.bf16.msra.mxu3 %v1679_v15 }
 0x3dd   :  { %1098 = vmatpush.bf16.msra.mxu2 %v1722_v24  ;;  %1148 = vmatpush.bf16.msra.mxu3 %v1696_v19 }
 0x3e1   :  { %1099 = vmatpush.bf16.msra.mxu2 %v1745_v29  ;;  %1149 = vmatpush.bf16.msra.mxu3 %v1712_v22 }
 0x3e5   :  { %1100 = vmatpush.bf16.msra.mxu2 %v1757_v33  ;;  %1150 = vmatpush.bf16.msra.mxu3 %v1728_v25 }
 0x3e9   :  { %1101 = vmatpush.bf16.msra.mxu2 %v1767_v35 }
 0x3ed   :  { %1102 = vmatpush.bf16.msra.mxu2 %v1778_v37 }
 0x44b   :  { %v745_v2 = vpop.f32.mrf.mxu3 }
 0x44c   :  { %v749_v6 = vadd.f32 %v745_v2, %v1868_v59 }
 0x44e   :  { %v1391_v7 = vmul.f32 -1.442695, %v749_v6 }
 0x450   :  { %1491 = vpow2.f32 %v1391_v7 }
 0x453   :  { %v696_v11 = vpop.f32.mrf.mxu2  ;;  %v747_v15 = vpop.f32.mrf.mxu3 }
 0x454   :  { %v700_v18 = vadd.f32 %v696_v11, %v124_v9 }
 0x456   :  { %v1492_v19 = vpop.eup %1491  ;;  %v1390_v21 = vmul.f32 -1.442695, %v700_v18 }
 0x457   :  { %v754_v22 = vadd.f32 1.0, %v1492_v19 }
 0x458   :  { %1493 = vpow2.f32 %v1390_v21 }
 0x459   :  { %1495 = vrcp.f32 %v754_v22  ;;  %v766_v59 = vand.u32 2147483648, %v754_v22  ;;  %v764_v10 = vand.u32 2147483647, %v754_v22  ;;  %vm760_vm13 = vweird.f32 %v754_v22 }
 0x45b   :  { %v698_v24 = vpop.f32.mrf.mxu2  ;;  %v767_v14 = vor.u32 1.1754944e-38, %v766_v59  ;;  %vm765_vm15 = vcmp.eq.f32.partialorder %v764_v10, 8.507059e+37 }
 0x45e   :  { %v1494_v25 = vpop.eup %1493 }
 0x45f   :  { %v1496_v29 = vpop.eup %1495  ;;  %v705_v33 = vadd.f32 1.0, %v1494_v25 }
 0x460   :  { %v756_v35 = vmul.f32 %v1496_v29, %v754_v22  ;;  %vm761_vm12 = vweird.f32 %v1496_v29  ;;  %v127_v22 = vadd.f32 %v1866_v56, %v1967_v61 }
 0x461   :  { %1497 = vrcp.f32 %v705_v33  ;;  %vm762_vm14 = vmor %vm760_vm13, %vm761_vm12  ;;  %v717_v4 = vand.u32 2147483648, %v705_v33  ;;  %v715_v8 = vand.u32 2147483647, %v705_v33  ;;  %vm711_vm1 = vweird.f32 %v705_v33 }
 0x462   :  { %v757_v37 = vsub.f32 1.0, %v756_v35  ;;  %1499 = vtanh.f32 %v749_v6 }
 0x463   :  { %1501 = vtanh.f32 %v700_v18  ;;  %v718_v13 = vor.u32 1.1754944e-38, %v717_v4  ;;  %vm716_vm3 = vcmp.eq.f32.partialorder %v715_v8, 8.507059e+37 }
 0x464   :  { %v758_v46 = vmul.f32 %v1496_v29, %v757_v37 }
 0x466   :  { %v759_v48 = vadd.f32 %v1496_v29, %v758_v46 }
 0x467   :  { %v1498_v50 = vpop.eup %1497 }
 0x468   :  { %v763_v55 = vsel %vm762_vm14, %v1496_v29, %v759_v48  ;;  %v707_v57 = vmul.f32 %v1498_v50, %v705_v33  ;;  %v1500_v58 = vpop.eup %1499  ;;  %vm712_vm0 = vweird.f32 %v1498_v50 }
 0x469   :  { %v768_v16 = vsel %vm765_vm15, %v767_v14, %v763_v55  ;;  %vm713_vm2 = vmor %vm711_vm1, %vm712_vm0  ;;  %v1502_v20 = vpop.eup %1501 }
 0x46a   :  { %v770_v60 = vsel %vm1879_vm6, %v1500_v58, %v768_v16  ;;  %v708_v3 = vsub.f32 1.0, %v707_v57 }
 0x46b   :  { %778 = vrot.lane.b32.xlu2 %v770_v60, %s1574_s5  ;;  %774 = vrot.lane.b32.xlu1 %v770_v60, %s1573_s6 }
 0x46c   :  { %771 = vrot.lane.b32.xlu0 %v770_v60, %s1575_s4  ;;  %v709_v5 = vmul.f32 %v1498_v50, %v708_v3 }
 0x46e   :  { %v710_v12 = vadd.f32 %v1498_v50, %v709_v5 }
 0x470   :  { %v714_v17 = vsel %vm713_vm2, %v1498_v50, %v710_v12 }
 0x471   :  { %v719_v26 = vsel %vm716_vm3, %v718_v13, %v714_v17 }
 0x472   :  { %v721_v28 = vsel %vm1879_vm6, %v1502_v20, %v719_v26 }
 0x473   :  { %729 = vrot.lane.b32.xlu2 %v721_v28, %s1574_s5  ;;  %725 = vrot.lane.b32.xlu1 %v721_v28, %s1573_s6 }
 0x474   :  { %722 = vrot.lane.b32.xlu0 %v721_v28, %s1575_s4 }
 0x4c5   :  { %v779_v44 = vpop.permute.xlu2 %778 }
 0x4cd   :  { %v730_v11 = vpop.permute.xlu2 %729 }
 0x4dd   :  { %v775_v31 = vpop.permute.xlu1 %774 }
 0x4de   :  { %v772_v32 = vpop.permute.xlu0 %771  ;;  %v776_v34 = vmul.f32 %v775_v31, %v1988_v30 }
 0x4df   :  { %v773_v36 = vmul.f32 %v772_v32, %v770_v60 }
 0x4e1   :  { %v2033_v38 = vadd.f32 %v776_v34, %v773_v36 }
 0x4e3   :  { %1503 = vtanh.f32 %v2033_v38 }
 0x4e5   :  { %v726_v1 = vpop.permute.xlu1 %725 }
 0x4e6   :  { %v723_v42 = vpop.permute.xlu0 %722  ;;  %v727_v43 = vmul.f32 %v726_v1, %v1992_v40 }
 0x4e7   :  { %v724_v52 = vmul.f32 %v723_v42, %v721_v28 }
 0x4e9   :  { %v1504_v2 = vpop.eup %1503  ;;  %v2037_v6 = vadd.f32 %v727_v43, %v724_v52 }
 0x4ea   :  { %v2039_v7 = vmul.f32 %v1504_v2, %v779_v44 }
 0x4eb   :  { %1505 = vtanh.f32 %v2037_v6 }
 0x4ec   :  { %v837_v30 = vpack.c.bf16 %v2039_v7, %v2039_v7 }
 0x4ee   :  { %846 = vmatmul.bf16.vlgmr.msra.gmra.mxu1 %v837_v30 }
 0x4f1   :  { %v1506_v9 = vpop.eup %1505 }
 0x4f2   :  { %v2044_v15 = vmul.f32 %v1506_v9, %v730_v11 }
 0x4f4   :  { %v788_v40 = vpack.c.bf16 %v2044_v15, %v2044_v15 }
 0x4f6   :  { %797 = vmatmul.bf16.vlgmr.msra.gmra.mxu0 %v788_v40 }
 0x56b   :  { %v847_v18 = vpop.f32.mrf.mxu1 }
 0x56c   :  { %v851_v19 = vadd.f32 %v847_v18, %v1861_v54 }
 0x56e   :  { %v1394_v21 = vmul.f32 -1.442695, %v851_v19 }
 0x570   :  { %1507 = vpow2.f32 %v1394_v21 }
 0x573   :  { %v798_v24 = vpop.f32.mrf.mxu0  ;;  %v849_v25 = vpop.f32.mrf.mxu1 }
 0x574   :  { %v802_v29 = vadd.f32 %v798_v24, %v127_v22 }
 0x576   :  { %v1508_v33 = vpop.eup %1507  ;;  %v1393_v35 = vmul.f32 -1.442695, %v802_v29 }
 0x577   :  { %v856_v37 = vadd.f32 1.0, %v1508_v33 }
 0x578   :  { %1509 = vpow2.f32 %v1393_v35 }
 0x579   :  { %1511 = vrcp.f32 %v856_v37  ;;  %v868_v14 = vand.u32 2147483648, %v856_v37  ;;  %v866_v61 = vand.u32 2147483647, %v856_v37  ;;  %vm862_vm5 = vweird.f32 %v856_v37 }
 0x57b   :  { %v800_v59 = vpop.f32.mrf.mxu0  ;;  %v869_v16 = vor.u32 1.1754944e-38, %v868_v14  ;;  %vm867_vm8 = vcmp.eq.f32.partialorder %v866_v61, 8.507059e+37 }
 0x57e   :  { %v1510_v46 = vpop.eup %1509 }
 0x57f   :  { %v1512_v10 = vpop.eup %1511  ;;  %v807_v48 = vadd.f32 1.0, %v1510_v46 }
 0x580   :  { %v858_v50 = vmul.f32 %v1512_v10, %v856_v37  ;;  %vm863_vm4 = vweird.f32 %v1512_v10  ;;  %v129_v37 = vadd.f32 %v1866_v56, %v1969_v62 }
 0x581   :  { %1513 = vrcp.f32 %v807_v48  ;;  %vm864_vm7 = vmor %vm862_vm5, %vm863_vm4  ;;  %v819_v13 = vand.u32 2147483648, %v807_v48  ;;  %v817_v20 = vand.u32 2147483647, %v807_v48  ;;  %vm813_vm10 = vweird.f32 %v807_v48 }
 0x582   :  { %v859_v54 = vsub.f32 1.0, %v858_v50  ;;  %1515 = vtanh.f32 %v851_v19 }
 0x583   :  { %1517 = vtanh.f32 %v802_v29  ;;  %v820_v28 = vor.u32 1.1754944e-38, %v819_v13  ;;  %vm818_vm12 = vcmp.eq.f32.partialorder %v817_v20, 8.507059e+37 }
 0x584   :  { %v860_v55 = vmul.f32 %v1512_v10, %v859_v54 }
 0x586   :  { %v861_v57 = vadd.f32 %v1512_v10, %v860_v55 }
 0x587   :  { %v1514_v58 = vpop.eup %1513 }
 0x588   :  { %v865_v60 = vsel %vm864_vm7, %v1512_v10, %v861_v57  ;;  %v809_v3 = vmul.f32 %v1514_v58, %v807_v48  ;;  %v1516_v4 = vpop.eup %1515  ;;  %vm814_vm9 = vweird.f32 %v1514_v58 }
 0x589   :  { %v870_v5 = vsel %vm867_vm8, %v869_v16, %v865_v60  ;;  %vm815_vm11 = vmor %vm813_vm10, %vm814_vm9  ;;  %v1518_v32 = vpop.eup %1517 }
 0x58a   :  { %v872_v8 = vsel %vm1879_vm6, %v1516_v4, %v870_v5  ;;  %v810_v12 = vsub.f32 1.0, %v809_v3 }
 0x58b   :  { %880 = vrot.lane.b32.xlu2 %v872_v8, %s1574_s5  ;;  %876 = vrot.lane.b32.xlu1 %v872_v8, %s1573_s6 }
 0x58c   :  { %873 = vrot.lane.b32.xlu0 %v872_v8, %s1575_s4  ;;  %v811_v17 = vmul.f32 %v1514_v58, %v810_v12 }
 0x58e   :  { %v812_v26 = vadd.f32 %v1514_v58, %v811_v17 }
 0x590   :  { %v816_v31 = vsel %vm815_vm11, %v1514_v58, %v812_v26 }
 0x591   :  { %v821_v34 = vsel %vm818_vm12, %v820_v28, %v816_v31 }
 0x592   :  { %v823_v36 = vsel %vm1879_vm6, %v1518_v32, %v821_v34 }
 0x593   :  { %831 = vrot.lane.b32.xlu2 %v823_v36, %s1574_s5  ;;  %827 = vrot.lane.b32.xlu1 %v823_v36, %s1573_s6 }
 0x594   :  { %824 = vrot.lane.b32.xlu0 %v823_v36, %s1575_s4 }
 0x5e5   :  { %v881_v11 = vpop.permute.xlu2 %880 }
 0x5ed   :  { %v832_v24 = vpop.permute.xlu2 %831 }
 0x5fd   :  { %v877_v1 = vpop.permute.xlu1 %876 }
 0x5fe   :  { %v874_v42 = vpop.permute.xlu0 %873  ;;  %v878_v43 = vmul.f32 %v877_v1, %v2033_v38 }
 0x5ff   :  { %v875_v44 = vmul.f32 %v874_v42, %v872_v8 }
 0x601   :  { %v2062_v52 = vadd.f32 %v878_v43, %v875_v44 }
 0x603   :  { %1519 = vtanh.f32 %v2062_v52 }
 0x605   :  { %v828_v2 = vpop.permute.xlu1 %827 }
 0x606   :  { %v825_v30 = vpop.permute.xlu0 %824  ;;  %v829_v9 = vmul.f32 %v828_v2, %v2037_v6 }
 0x607   :  { %v826_v40 = vmul.f32 %v825_v30, %v823_v36 }
 0x609   :  { %v1520_v18 = vpop.eup %1519  ;;  %v2066_v19 = vadd.f32 %v829_v9, %v826_v40 }
 0x60a   :  { %v2068_v21 = vmul.f32 %v1520_v18, %v881_v11 }
 0x60b   :  { %1521 = vtanh.f32 %v2066_v19 }
 0x60c   :  { %v939_v38 = vpack.c.bf16 %v2068_v21, %v2068_v21 }
 0x60e   :  { %948 = vmatmul.bf16.vlgmr.msrb.gmra.mxu3 %v939_v38 }
 0x611   :  { %v1522_v22 = vpop.eup %1521 }
 0x612   :  { %v2073_v25 = vmul.f32 %v1522_v22, %v832_v24 }
 0x614   :  { %v890_v6 = vpack.c.bf16 %v2073_v25, %v2073_v25 }
 0x616   :  { %899 = vmatmul.bf16.vlgmr.msrb.gmra.mxu2 %v890_v6 }
 0x691   :  { %v949_v29 = vpop.f32.mrf.mxu3 }
 0x692   :  { %v953_v33 = vadd.f32 %v949_v29, %v1859_v51 }
 0x694   :  { %v1397_v35 = vmul.f32 -1.442695, %v953_v33 }
 0x696   :  { %1523 = vpow2.f32 %v1397_v35 }
 0x699   :  { %v900_v59 = vpop.f32.mrf.mxu2  ;;  %v951_v46 = vpop.f32.mrf.mxu3 }
 0x69a   :  { %v904_v10 = vadd.f32 %v900_v59, %v129_v37 }
 0x69c   :  { %v1524_v48 = vpop.eup %1523  ;;  %v1396_v50 = vmul.f32 -1.442695, %v904_v10 }
 0x69d   :  { %v958_v54 = vadd.f32 1.0, %v1524_v48 }
 0x69e   :  { %1525 = vpow2.f32 %v1396_v50  ;;  %v2110_v50 = vld [vmem:[%s2245_s3] ss:$0 sm:$0xff] }
 0x69f   :  { %1527 = vrcp.f32 %v958_v54  ;;  %v970_v16 = vand.u32 2147483648, %v958_v54  ;;  %v968_v56 = vand.u32 2147483647, %v958_v54  ;;  %vm964_vm14 = vweird.f32 %v958_v54 }
 0x6a1   :  { %v902_v14 = vpop.f32.mrf.mxu2  ;;  %v971_v4 = vor.u32 1.1754944e-38, %v970_v16  ;;  %vm969_vm0 = vcmp.eq.f32.partialorder %v968_v56, 8.507059e+37 }
 0x6a4   :  { %v1526_v55 = vpop.eup %1525 }
 0x6a5   :  { %v1528_v61 = vpop.eup %1527  ;;  %v909_v57 = vadd.f32 1.0, %v1526_v55 }
 0x6a6   :  { %v960_v58 = vmul.f32 %v1528_v61, %v958_v54  ;;  %vm965_vm13 = vweird.f32 %v1528_v61  ;;  %v132_v54 = vadd.f32 %v2110_v50, %v1971_v63 }
 0x6a7   :  { %1529 = vrcp.f32 %v909_v57  ;;  %vm966_vm15 = vmor %vm964_vm14, %vm965_vm13  ;;  %v921_v26 = vand.u32 2147483648, %v909_v57  ;;  %v919_v31 = vand.u32 2147483647, %v909_v57  ;;  %vm915_vm2 = vweird.f32 %v909_v57 }
 0x6a8   :  { %v961_v51 = vsub.f32 1.0, %v960_v58  ;;  %1531 = vtanh.f32 %v953_v33 }
 0x6a9   :  { %1533 = vtanh.f32 %v904_v10  ;;  %v922_v34 = vor.u32 1.1754944e-38, %v921_v26  ;;  %vm920_vm4 = vcmp.eq.f32.partialorder %v919_v31, 8.507059e+37 }
 0x6aa   :  { %v962_v60 = vmul.f32 %v1528_v61, %v961_v51 }
 0x6ac   :  { %v963_v62 = vadd.f32 %v1528_v61, %v962_v60 }
 0x6ad   :  { %v1530_v3 = vpop.eup %1529 }
 0x6ae   :  { %v967_v5 = vsel %vm966_vm15, %v1528_v61, %v963_v62  ;;  %v911_v8 = vmul.f32 %v1530_v3, %v909_v57  ;;  %v1532_v12 = vpop.eup %1531  ;;  %vm916_vm1 = vweird.f32 %v1530_v3 }
 0x6af   :  { %v972_v13 = vsel %vm969_vm0, %v971_v4, %v967_v5  ;;  %vm917_vm3 = vmor %vm915_vm2, %vm916_vm1  ;;  %v1534_v1 = vpop.eup %1533 }
 0x6b0   :  { %v974_v17 = vsel %vm1879_vm6, %v1532_v12, %v972_v13  ;;  %v912_v20 = vsub.f32 1.0, %v911_v8 }
 0x6b1   :  { %982 = vrot.lane.b32.xlu2 %v974_v17, %s1574_s5  ;;  %978 = vrot.lane.b32.xlu1 %v974_v17, %s1573_s6 }
 0x6b2   :  { %975 = vrot.lane.b32.xlu0 %v974_v17, %s1575_s4  ;;  %v913_v28 = vmul.f32 %v1530_v3, %v912_v20 }
 0x6b4   :  { %v914_v32 = vadd.f32 %v1530_v3, %v913_v28 }
 0x6b6   :  { %v918_v36 = vsel %vm917_vm3, %v1530_v3, %v914_v32 }
 0x6b7   :  { %v923_v42 = vsel %vm920_vm4, %v922_v34, %v918_v36 }
 0x6b8   :  { %v925_v43 = vsel %vm1879_vm6, %v1534_v1, %v923_v42 }
 0x6b9   :  { %933 = vrot.lane.b32.xlu2 %v925_v43, %s1574_s5  ;;  %929 = vrot.lane.b32.xlu1 %v925_v43, %s1573_s6 }
 0x6ba   :  { %926 = vrot.lane.b32.xlu0 %v925_v43, %s1575_s4 }
 0x70b   :  { %v983_v22 = vpop.permute.xlu2 %982 }
 0x713   :  { %v934_v37 = vpop.permute.xlu2 %933 }
 0x723   :  { %v979_v44 = vpop.permute.xlu1 %978 }
 0x724   :  { %v976_v2 = vpop.permute.xlu0 %975  ;;  %v980_v30 = vmul.f32 %v979_v44, %v2062_v52 }
 0x725   :  { %v977_v9 = vmul.f32 %v976_v2, %v974_v17 }
 0x727   :  { %v2091_v11 = vadd.f32 %v980_v30, %v977_v9 }
 0x729   :  { %1535 = vtanh.f32 %v2091_v11 }
 0x72b   :  { %v930_v40 = vpop.permute.xlu1 %929 }
 0x72c   :  { %v927_v18 = vpop.permute.xlu0 %926  ;;  %v931_v38 = vmul.f32 %v930_v40, %v2066_v19 }
 0x72d   :  { %v928_v24 = vmul.f32 %v927_v18, %v925_v43 }
 0x72f   :  { %v1536_v6 = vpop.eup %1535  ;;  %v2095_v29 = vadd.f32 %v931_v38, %v928_v24 }
 0x730   :  { %v2097_v33 = vmul.f32 %v1536_v6, %v983_v22 }
 0x731   :  { %1537 = vtanh.f32 %v2095_v29 }
 0x732   :  { %v1041_v52 = vpack.c.bf16 %v2097_v33, %v2097_v33 }
 0x734   :  { %1050 = vmatmul.bf16.vlgmr.msrb.gmra.mxu1 %v1041_v52 }
 0x737   :  { %v1538_v35 = vpop.eup %1537 }
 0x738   :  { %v2102_v59 = vmul.f32 %v1538_v35, %v934_v37 }
 0x73a   :  { %v992_v19 = vpack.c.bf16 %v2102_v59, %v2102_v59 }
 0x73c   :  { %1001 = vmatmul.bf16.vlgmr.msrb.gmra.mxu0 %v992_v19 }
 0x7b1   :  { %v1051_v46 = vpop.f32.mrf.mxu1 }
 0x7b2   :  { %v1055_v10 = vadd.f32 %v1051_v46, %v1857_v49 }
 0x7b4   :  { %v1400_v48 = vmul.f32 -1.442695, %v1055_v10 }
 0x7b6   :  { %1539 = vpow2.f32 %v1400_v48 }
 0x7b9   :  { %v1002_v14 = vpop.f32.mrf.mxu0  ;;  %v1053_v55 = vpop.f32.mrf.mxu1 }
 0x7ba   :  { %v1006_v61 = vadd.f32 %v1002_v14, %v132_v54 }
 0x7bc   :  { %v1540_v57 = vpop.eup %1539  ;;  %v1399_v58 = vmul.f32 -1.442695, %v1006_v61 }
 0x7bd   :  { %v1060_v51 = vadd.f32 1.0, %v1540_v57 }
 0x7be   :  { %1541 = vpow2.f32 %v1399_v58 }
 0x7bf   :  { %1543 = vrcp.f32 %v1060_v51  ;;  %v1072_v4 = vand.u32 2147483648, %v1060_v51  ;;  %v1070_v63 = vand.u32 2147483647, %v1060_v51  ;;  %vm1066_vm7 = vweird.f32 %v1060_v51 }
 0x7c1   :  { %v1004_v16 = vpop.f32.mrf.mxu0  ;;  %v1073_v13 = vor.u32 1.1754944e-38, %v1072_v4  ;;  %vm1071_vm9 = vcmp.eq.f32.partialorder %v1070_v63, 8.507059e+37 }
 0x7c4   :  { %v1542_v49 = vpop.eup %1541 }
 0x7c5   :  { %v1544_v60 = vpop.eup %1543  ;;  %v1011_v56 = vadd.f32 1.0, %v1542_v49 }
 0x7c6   :  { %v1062_v62 = vmul.f32 %v1544_v60, %v1060_v51  ;;  %vm1067_vm5 = vweird.f32 %v1544_v60  ;;  %v134_v51 = vadd.f32 %v2110_v50, %v1973_v0 }
 0x7c7   :  { %1545 = vrcp.f32 %v1011_v56  ;;  %vm1068_vm8 = vmor %vm1066_vm7, %vm1067_vm5  ;;  %v1023_v34 = vand.u32 2147483648, %v1011_v56  ;;  %v1021_v1 = vand.u32 2147483647, %v1011_v56  ;;  %vm1017_vm11 = vweird.f32 %v1011_v56 }
 0x7c8   :  { %v1063_v3 = vsub.f32 1.0, %v1062_v62  ;;  %1547 = vtanh.f32 %v1055_v10  ;;  %vm1224_vm7 = vcmp.lt.s32.totalorder %v1875_v23, 32 }
 0x7c9   :  { %1549 = vtanh.f32 %v1006_v61  ;;  %v1024_v43 = vor.u32 1.1754944e-38, %v1023_v34  ;;  %vm1022_vm13 = vcmp.eq.f32.partialorder %v1021_v1, 8.507059e+37 }
 0x7ca   :  { %v1064_v5 = vmul.f32 %v1544_v60, %v1063_v3 }
 0x7cc   :  { %v1065_v8 = vadd.f32 %v1544_v60, %v1064_v5 }
 0x7cd   :  { %v1546_v12 = vpop.eup %1545 }
 0x7ce   :  { %v1069_v17 = vsel %vm1068_vm8, %v1544_v60, %v1065_v8  ;;  %v1013_v20 = vmul.f32 %v1546_v12, %v1011_v56  ;;  %v1548_v26 = vpop.eup %1547  ;;  %vm1018_vm10 = vweird.f32 %v1546_v12 }
 0x7cf   :  { %v1074_v28 = vsel %vm1071_vm9, %v1073_v13, %v1069_v17  ;;  %vm1019_vm12 = vmor %vm1017_vm11, %vm1018_vm10  ;;  %v1550_v2 = vpop.eup %1549 }
 0x7d0   :  { %v1076_v31 = vsel %vm1879_vm6, %v1548_v26, %v1074_v28  ;;  %v1014_v32 = vsub.f32 1.0, %v1013_v20 }
 0x7d1   :  { %1084 = vrot.lane.b32.xlu2 %v1076_v31, %s1574_s5  ;;  %1080 = vrot.lane.b32.xlu1 %v1076_v31, %s1573_s6 }
 0x7d2   :  { %1077 = vrot.lane.b32.xlu0 %v1076_v31, %s1575_s4  ;;  %v1015_v36 = vmul.f32 %v1546_v12, %v1014_v32 }
 0x7d4   :  { %v1016_v42 = vadd.f32 %v1546_v12, %v1015_v36 }
 0x7d6   :  { %v1020_v44 = vsel %vm1019_vm12, %v1546_v12, %v1016_v42 }
 0x7d7   :  { %v1025_v30 = vsel %vm1022_vm13, %v1024_v43, %v1020_v44 }
 0x7d8   :  { %v1027_v9 = vsel %vm1879_vm6, %v1550_v2, %v1025_v30 }
 0x7d9   :  { %1035 = vrot.lane.b32.xlu2 %v1027_v9, %s1574_s5  ;;  %1031 = vrot.lane.b32.xlu1 %v1027_v9, %s1573_s6 }
 0x7da   :  { %1028 = vrot.lane.b32.xlu0 %v1027_v9, %s1575_s4 }
 0x82b   :  { %v1085_v37 = vpop.permute.xlu2 %1084 }
 0x833   :  { %v1036_v14 = vpop.permute.xlu2 %1035 }
 0x843   :  { %v1081_v40 = vpop.permute.xlu1 %1080 }
 0x844   :  { %v1078_v18 = vpop.permute.xlu0 %1077  ;;  %v1082_v38 = vmul.f32 %v1081_v40, %v2091_v11 }
 0x845   :  { %v1079_v22 = vmul.f32 %v1078_v18, %v1076_v31 }
 0x847   :  { %v2125_v24 = vadd.f32 %v1082_v38, %v1079_v22 }
 0x849   :  { %1551 = vtanh.f32 %v2125_v24 }
 0x84b   :  { %v1032_v6 = vpop.permute.xlu1 %1031 }
 0x84c   :  { %v1029_v52 = vpop.permute.xlu0 %1028  ;;  %v1033_v35 = vmul.f32 %v1032_v6, %v2095_v29 }
 0x84d   :  { %v1030_v19 = vmul.f32 %v1029_v52, %v1027_v9 }
 0x84f   :  { %v1552_v46 = vpop.eup %1551  ;;  %v2129_v10 = vadd.f32 %v1033_v35, %v1030_v19 }
 0x850   :  { %v2131_v48 = vmul.f32 %v1552_v46, %v1085_v37 }
 0x851   :  { %1553 = vtanh.f32 %v2129_v10 }
 0x852   :  { %v1142_v11 = vpack.c.bf16 %v2131_v48, %v2131_v48 }
 0x854   :  { %1151 = vmatmul.bf16.vlgmr.msra.gmra.mxu3 %v1142_v11 }
 0x857   :  { %v1554_v54 = vpop.eup %1553 }
 0x858   :  { %v2136_v55 = vmul.f32 %v1554_v54, %v1036_v14 }
 0x85a   :  { %v1094_v29 = vpack.c.bf16 %v2136_v55, %v2136_v55 }
 0x85c   :  { %1103 = vmatmul.bf16.vlgmr.msra.gmra.mxu2 %v1094_v29 }
 0x8d7   :  { %v1152_v61 = vpop.f32.mrf.mxu3 }
 0x8d8   :  { %v1156_v57 = vadd.f32 %v1152_v61, %v1855_v47 }
 0x8da   :  { %v1403_v58 = vmul.f32 -1.442695, %v1156_v57 }
 0x8dc   :  { %1555 = vpow2.f32 %v1403_v58 }
 0x8df   :  { %v1104_v16 = vpop.f32.mrf.mxu2  ;;  %v1154_v49 = vpop.f32.mrf.mxu3 }
 0x8e0   :  { %v1108_v60 = vadd.f32 %v1104_v16, %v134_v51 }
 0x8e2   :  { %v1556_v56 = vpop.eup %1555  ;;  %v1402_v62 = vmul.f32 -1.442695, %v1108_v60 }
 0x8e3   :  { %v1161_v3 = vadd.f32 1.0, %v1556_v56 }
 0x8e4   :  { %1557 = vpow2.f32 %v1402_v62 }
 0x8e5   :  { %1559 = vrcp.f32 %v1161_v3  ;;  %v1173_v13 = vand.u32 2147483648, %v1161_v3  ;;  %v1171_v0 = vand.u32 2147483647, %v1161_v3  ;;  %vm1167_vm15 = vweird.f32 %v1161_v3 }
 0x8e7   :  { %v1106_v4 = vpop.f32.mrf.mxu2  ;;  %v1174_v26 = vor.u32 1.1754944e-38, %v1173_v13  ;;  %vm1172_vm1 = vcmp.eq.f32.partialorder %v1171_v0, 8.507059e+37 }
 0x8ea   :  { %v1558_v5 = vpop.eup %1557 }
 0x8eb   :  { %v1560_v63 = vpop.eup %1559  ;;  %v1113_v8 = vadd.f32 1.0, %v1558_v5 }
 0x8ec   :  { %v1163_v12 = vmul.f32 %v1560_v63, %v1161_v3  ;;  %vm1168_vm14 = vweird.f32 %v1560_v63 }
 0x8ed   :  { %1561 = vrcp.f32 %v1113_v8  ;;  %vm1169_vm0 = vmor %vm1167_vm15, %vm1168_vm14  ;;  %v1125_v42 = vand.u32 2147483648, %v1113_v8  ;;  %v1123_v44 = vand.u32 2147483647, %v1113_v8  ;;  %vm1119_vm3 = vweird.f32 %v1113_v8 }
 0x8ee   :  { %v1164_v47 = vsub.f32 1.0, %v1163_v12  ;;  %1563 = vtanh.f32 %v1156_v57 }
 0x8ef   :  { %1565 = vtanh.f32 %v1108_v60  ;;  %v1126_v30 = vor.u32 1.1754944e-38, %v1125_v42  ;;  %vm1124_vm5 = vcmp.eq.f32.partialorder %v1123_v44, 8.507059e+37 }
 0x8f0   :  { %v1165_v17 = vmul.f32 %v1560_v63, %v1164_v47 }
 0x8f2   :  { %v1166_v50 = vadd.f32 %v1560_v63, %v1165_v17 }
 0x8f3   :  { %v1562_v20 = vpop.eup %1561 }
 0x8f4   :  { %v1170_v28 = vsel %vm1169_vm0, %v1560_v63, %v1166_v50  ;;  %v1115_v31 = vmul.f32 %v1562_v20, %v1113_v8  ;;  %v1564_v32 = vpop.eup %1563  ;;  %vm1120_vm2 = vweird.f32 %v1562_v20 }
 0x8f5   :  { %v1175_v34 = vsel %vm1172_vm1, %v1174_v26, %v1170_v28  ;;  %vm1121_vm4 = vmor %vm1119_vm3, %vm1120_vm2  ;;  %v1566_v40 = vpop.eup %1565 }
 0x8f6   :  { %v1177_v36 = vsel %vm1879_vm6, %v1564_v32, %v1175_v34  ;;  %v1116_v1 = vsub.f32 1.0, %v1115_v31 }
 0x8f7   :  { %1185 = vrot.lane.b32.xlu2 %v1177_v36, %s1574_s5  ;;  %1181 = vrot.lane.b32.xlu1 %v1177_v36, %s1573_s6 }
 0x8f8   :  { %1178 = vrot.lane.b32.xlu0 %v1177_v36, %s1575_s4  ;;  %v1117_v43 = vmul.f32 %v1562_v20, %v1116_v1 }
 0x8fa   :  { %v1118_v2 = vadd.f32 %v1562_v20, %v1117_v43 }
 0x8fc   :  { %v1122_v9 = vsel %vm1121_vm4, %v1562_v20, %v1118_v2 }
 0x8fd   :  { %v1127_v18 = vsel %vm1124_vm5, %v1126_v30, %v1122_v9 }
 0x8fe   :  { %v1129_v38 = vsel %vm1879_vm6, %v1566_v40, %v1127_v18  ;;  %vm1225_vm6 = vcmp.lt.s32.totalorder %v1875_v23, 64 }
 0x8ff   :  { %1137 = vrot.lane.b32.xlu2 %v1129_v38, %s1574_s5  ;;  %1133 = vrot.lane.b32.xlu1 %v1129_v38, %s1573_s6 }
 0x900   :  { %1130 = vrot.lane.b32.xlu0 %v1129_v38, %s1575_s4 }
 0x907   :  { %1212 = vrot.lane.b32.xlu2 %v2097_v33, %s1574_s5  ;;  %1210 = vrot.lane.b32.xlu1 %v2131_v48, %s1574_s5 }
 0x908   :  { %1214 = vrot.lane.b32.xlu0 %v2068_v21, %s1574_s5 }
 0x90f   :  { %1218 = vrot.lane.b32.xlu2 %v1994_v41, %s1574_s5  ;;  %1216 = vrot.lane.b32.xlu1 %v2039_v7, %s1574_s5 }
 0x917   :  { %1222 = vrot.lane.b32.xlu1 %v1899_v27, %s1574_s5 }
 0x951   :  { %v1186_v39 = vpop.permute.xlu2 %1185 }
 0x959   :  { %v1138_v22 = vpop.permute.xlu2 %1137 }
 0x961   :  { %v1213_v33 = vpop.permute.xlu2 %1212 }
 0x962   :  { %v1228_v6 = vsel %vm1225_vm6, %v1213_v33, 0.0 }
 0x963   :  { %v1236_v41 = vsel %vm1224_vm7, %v2000_v45, %v1228_v6 }
 0x964   :  { %1244 = vst [vmem:[%s2246_s7 + $0x10] sm:$0xff] %v1236_v41 }
 0x969   :  { %v1219_v7 = vpop.permute.xlu2 %1218  ;;  %v1182_v27 = vpop.permute.xlu1 %1181 }
 0x96a   :  { %v1179_v21 = vpop.permute.xlu0 %1178  ;;  %v1231_v52 = vsel %vm1225_vm6, %v1219_v7, 0.0  ;;  %v1183_v35 = vmul.f32 %v1182_v27, %v2125_v24 }
 0x96b   :  { %v1180_v37 = vmul.f32 %v1179_v21, %v1177_v36  ;;  %v1239_v19 = vsel %vm1224_vm7, %v2102_v59, %v1231_v52  ;;  %v1193_v59 = vld [vmem:[%s2246_s7 + $0x8] sm:$0xff] }
 0x96c   :  { %1247 = vst [vmem:[%s2246_s7 + $0x28] sm:$0xff] %v1239_v19 }
 0x96d   :  { %v1184_v45 = vadd.f32 %v1183_v35, %v1180_v37 }
 0x96f   :  { %1567 = vtanh.f32 %v1184_v45 }
 0x971   :  { %v1134_v46 = vpop.permute.xlu1 %1133 }
 0x972   :  { %v1131_v48 = vpop.permute.xlu0 %1130  ;;  %v1135_v29 = vmul.f32 %v1134_v46, %v2129_v10 }
 0x973   :  { %v1132_v14 = vmul.f32 %v1131_v48, %v1129_v38 }
 0x975   :  { %v1568_v11 = vpop.eup %1567  ;;  %v1136_v16 = vadd.f32 %v1135_v29, %v1132_v14 }
 0x976   :  { %v1188_v54 = vmul.f32 %v1568_v11, %v1186_v39 }
 0x977   :  { %1569 = vtanh.f32 %v1136_v16 }
 0x978   :  { %1208 = vrot.lane.b32.xlu0 %v1188_v54, %s1574_s5 }
 0x979   :  { %v1211_v24 = vpop.permute.xlu1 %1210 }
 0x97a   :  { %v1215_v61 = vpop.permute.xlu0 %1214  ;;  %v1227_v57 = vsel %vm1225_vm6, %v1211_v24, 0.0 }
 0x97b   :  { %v1229_v58 = vsel %vm1225_vm6, %v1215_v61, 0.0  ;;  %v1235_v51 = vsel %vm1224_vm7, %v1193_v59, %v1227_v57 }
 0x97c   :  { %v1237_v10 = vsel %vm1224_vm7, %v2044_v15, %v1229_v58  ;;  %1243 = vst [vmem:[%s2246_s7 + $0x8] sm:$0xff] %v1235_v51 }
 0x97d   :  { %1245 = vst [vmem:[%s2246_s7 + $0x18] sm:$0xff] %v1237_v10  ;;  %v1570_v56 = vpop.eup %1569 }
 0x97e   :  { %v1140_v62 = vmul.f32 %v1570_v56, %v1138_v22 }
 0x980   :  { %1220 = vrot.lane.b32.xlu0 %v1941_v53, %s1574_s5 }
 0x981   :  { %v1217_v49 = vpop.permute.xlu1 %1216 }
 0x982   :  { %v1230_v60 = vsel %vm1225_vm6, %v1217_v49, 0.0 }
 0x983   :  { %v1238_v15 = vsel %vm1224_vm7, %v2073_v25, %v1230_v60  ;;  %v1192_v25 = vld [vmem:[%s2246_s7] sm:$0xff] }
 0x984   :  { %1246 = vst [vmem:[%s2246_s7 + $0x20] sm:$0xff] %v1238_v15 }
 0x989   :  { %v1223_v3 = vpop.permute.xlu1 %1222 }
 0x98a   :  { %v1233_v4 = vsel %vm1225_vm6, %v1223_v3, 0.0 }
 0x98b   :  { %v1241_v53 = vsel %vm1224_vm7, %v1140_v62, %v1233_v4 }
 0x98c   :  { %1249 = vst [vmem:[%s2246_s7 + $0x38] sm:$0xff] %v1241_v53 }
 0x9ea   :  { %v1209_v5 = vpop.permute.xlu0 %1208 }
 0x9eb   :  { %v1226_v63 = vsel %vm1225_vm6, %v1209_v5, 0.0 }
 0x9ec   :  { %v1234_v8 = vsel %vm1224_vm7, %v1192_v25, %v1226_v63 }
 0x9ed   :  { %1242 = vst [vmem:[%s2246_s7] sm:$0xff] %v1234_v8 }
 0x9f2   :  { %v1221_v12 = vpop.permute.xlu0 %1220 }
 0x9f3   :  { %v1232_v47 = vsel %vm1225_vm6, %v1221_v12, 0.0 }
 0x9f4   :  { %v1240_v13 = vsel %vm1224_vm7, %v2136_v55, %v1232_v47 }
 0x9f5   :  { %1248 = vst [vmem:[%s2246_s7 + $0x30] sm:$0xff] %v1240_v13 }

</bundles_post_ra>
